<compile_context>
chip_gen: v7x
topology: tpu7x:2x2x1
jax: 0.10.0
libtpu: 0.0.40
codegen_flags: <defaults>
</compile_context>

<pallas_src>
import functools
import math

import numpy as np
import jax
import jax.numpy as jnp
from jax.experimental import pallas as pl
from jax.experimental.pallas import tpu as pltpu

SPARSITY = 0.5   # fraction of weights KEPT (matches GetSubnet semantics)
COUT_PAD = 128   # lane-dense output / weight-matrix width


def _round_up(x, m):
    return ((x + m - 1) // m) * m


# ----------------------------------------------------------------------------
# Pallas kernel: tiled GEMM (bf16 operands, f32 acc) + f32 bias + optional ReLU
# ----------------------------------------------------------------------------
def _gemm_bias_act_kernel(p_ref, w_ref, b_ref, o_ref, *, apply_relu):
    # (tm, Kdp) bf16 @ (Kdp, 128) bf16 -> f32 on the MXU.
    acc = jnp.dot(p_ref[...], w_ref[...], preferred_element_type=jnp.float32)
    acc = acc + b_ref[...]              # f32 epilogue; (1,128) broadcasts
    if apply_relu:
        acc = jnp.maximum(acc, 0.0)
    o_ref[...] = acc.astype(o_ref.dtype)


def convt_pallas(x_nhwc, w_mat, b_pad, K, Cin, Cout, apply_relu):
    """ConvTranspose2d (stride=1, pad=0) + bias + optional ReLU.

    x_nhwc : (N, H, W, Cin) float32 activations
    w_mat  : (Kdp, 128) bfloat16 -- masked, spatially flipped, reshaped and
             zero-padded weight matrix (row index = kh*K*Cin + kw*Cin + ci)
    b_pad  : (1, 128) float32 zero-padded bias
    """
    N, H, W, _ = x_nhwc.shape
    Ho, Wo = H + K - 1, W + K - 1
    Kd = K * K * Cin
    Kdp = w_mat.shape[0]

    # Transposed conv (stride 1, pad 0) == correlation with the spatially
    # flipped kernel over a (K-1)-padded input.  im2col glue stays in XLA but
    # is done in bf16 to halve the HBM traffic of the inflated patches tensor.
    x_bf = x_nhwc.astype(jnp.bfloat16)
    xpad = jnp.pad(x_bf, ((0, 0), (K - 1, K - 1), (K - 1, K - 1), (0, 0)))
    cols = [xpad[:, kh:kh + Ho, kw:kw + Wo, :]
            for kh in range(K) for kw in range(K)]
    if Kdp > Kd:    # pad the contraction dim up to a multiple of 128
        cols.append(jnp.zeros((N, Ho, Wo, Kdp - Kd), jnp.bfloat16))
    patches = jnp.concatenate(cols, axis=-1).reshape(N * Ho * Wo, Kdp)

    M = N * Ho * Wo
    tm = 512 if M >= 1024 else 128      # big tiles for the big layers
    Mp = _round_up(M, tm)
    patches = jnp.pad(patches, ((0, Mp - M), (0, 0)))

    kern = functools.partial(_gemm_bias_act_kernel, apply_relu=apply_relu)
    out = pl.pallas_call(
        kern,
        out_shape=jax.ShapeDtypeStruct((Mp, COUT_PAD), jnp.float32),
        grid=(Mp // tm,),
        in_specs=[
            pl.BlockSpec((tm, Kdp), lambda i: (i, 0)),
            pl.BlockSpec((Kdp, COUT_PAD), lambda i: (0, 0)),
            pl.BlockSpec((1, COUT_PAD), lambda i: (0, 0)),
        ],
        out_specs=pl.BlockSpec((tm, COUT_PAD), lambda i: (i, 0)),
        compiler_params=pltpu.CompilerParams(
            dimension_semantics=("parallel",)),
    )(patches, w_mat, b_pad)

    # Drop the padded rows / lanes and restore NHWC.
    return out[:M, :Cout].reshape(N, Ho, Wo, Cout)


# ----------------------------------------------------------------------------
# Plain-JAX glue: supermask, bilinear x2 upsample (align_corners=True)
# ----------------------------------------------------------------------------
def supermask(scores, k):
    """GetSubnet: keep (set to 1) the top-k fraction by |score|, zero the rest."""
    flat = jnp.abs(scores).reshape(-1)
    n = flat.shape[0]
    j = int((1.0 - k) * n)          # number of weights dropped
    keep = n - j
    _, idx = jax.lax.top_k(flat, keep)
    mask = jnp.zeros((n,), scores.dtype).at[idx].set(1.0)
    return mask.reshape(scores.shape)


def _interp_matrix(n_in, n_out):
    i = np.arange(n_out)
    src = i * (n_in - 1) / (n_out - 1) if n_out > 1 else np.zeros(1)
    i0 = np.clip(np.floor(src).astype(np.int64), 0, n_in - 1)
    i1 = np.minimum(i0 + 1, n_in - 1)
    w1 = (src - i0).astype(np.float32)
    L = np.zeros((n_out, n_in), np.float32)
    L[np.arange(n_out), i0] += 1.0 - w1
    L[np.arange(n_out), i1] += w1
    return jnp.asarray(L)


def upsample_bilinear_x2(x_nhwc):
    # TODO(synk): bilinear interpolate stays as separable einsums in XLA glue.
    N, H, W, C = x_nhwc.shape
    Lh = _interp_matrix(H, 2 * H)
    Lw = _interp_matrix(W, 2 * W)
    y = jnp.einsum('Oh,nhwc->nOwc', Lh, x_nhwc)
    y = jnp.einsum('Pw,nOwc->nOPc', Lw, y)
    return y


# ----------------------------------------------------------------------------
# Network: parameters, hoisted preprocessing, forward
# ----------------------------------------------------------------------------
def init_params(key, in_chan=1, out_chan=1, nh=2):
    layer_defs = [
        (in_chan, nh * 16, 4),
        (nh * 16, nh * 8, 3),
        (nh * 8, nh * 8, 3),
        (nh * 8, nh * 4, 3),
        (nh * 4, out_chan, 3),
    ]
    params = []
    for (cin, cout, k) in layer_defs:
        key, kw, ks, kb = jax.random.split(key, 4)
        fan_in = cout * k * k          # PyTorch fan_in for (Cin, Cout, k, k)
        std = math.sqrt(2.0 / fan_in)  # kaiming_normal, relu gain
        weight = std * jax.random.normal(kw, (cin, cout, k, k), jnp.float32)
        bound = 1.0 / math.sqrt(fan_in)
        scores = jax.random.uniform(ks, (cin, cout, k, k), jnp.float32,
                                    -bound, bound)
        bias = jax.random.uniform(kb, (cout,), jnp.float32, -bound, bound)
        params.append((weight, scores, bias))
    return params


def prepare_params(params):
    """One-time (hoisted) parameter preprocessing: supermask, spatial flip,
    reshape to a GEMM matrix, zero-pad (Kd -> mult of 128, Cout -> 128),
    cast weights to bf16, keep the bias in f32."""
    w_mats, b_pads, layer_defs = [], [], []
    for (weight, scores, bias) in params:
        cin, cout, k, _ = weight.shape
        wm = weight * supermask(scores, SPARSITY)
        # (Cin,Cout,K,K) --flip spatial--> (K,K,Cin,Cout) --> (K*K*Cin, Cout)
        wf = jnp.transpose(wm[:, :, ::-1, ::-1], (2, 3, 0, 1))
        w2 = wf.reshape(k * k * cin, cout)
        kd = k * k * cin
        kdp = _round_up(kd, 128)
        w_full = jnp.zeros((kdp, COUT_PAD), jnp.float32).at[:kd, :cout].set(w2)
        b_full = jnp.zeros((1, COUT_PAD), jnp.float32).at[0, :cout].set(bias)
        w_mats.append(w_full.astype(jnp.bfloat16))
        b_pads.append(b_full)
        layer_defs.append((cin, cout, k))
    return tuple(w_mats), tuple(b_pads), tuple(layer_defs)


def make_forward(layer_defs, out_activation=None):
    relu_flags = (True, True, True, True, False)
    upsample_after = (0, 2)   # conv1 -> relu -> up, conv3 -> relu -> up

    def forward(x_nhwc, w_mats, b_pads):
        x = x_nhwc
        for li, (cin, cout, k) in enumerate(layer_defs):
            x = convt_pallas(x, w_mats[li], b_pads[li], k, cin, cout,
                             relu_flags[li])
            if li in upsample_after:
                x = upsample_bilinear_x2(x)
        if out_activation == 'sigmoid':
            x = jax.nn.sigmoid(x)
        return x

    return forward


# ----------------------------------------------------------------------------
# Pure-JAX reference (lax conv, f32) for a self-consistency check.
# ----------------------------------------------------------------------------
def _convt_ref(x_nhwc, w_pt, bias, relu):
    K = w_pt.shape[2]
    wf = jnp.transpose(w_pt[:, :, ::-1, ::-1], (2, 3, 0, 1))
    y = jax.lax.conv_general_dilated(
        x_nhwc, wf, (1, 1),
        padding=[(K - 1, K - 1), (K - 1, K - 1)],
        dimension_numbers=('NHWC', 'HWIO', 'NHWC'))
    y = y + bias.reshape(1, 1, 1, -1)
    return jnp.maximum(y, 0.0) if relu else y


def forward_ref(x_nhwc, params, out_activation=None):
    def layer(x, p, relu):
        w, s, b = p
        return _convt_ref(x, w * supermask(s, SPARSITY), b, relu)
    x = layer(x_nhwc, params[0], True)
    x = upsample_bilinear_x2(x)
    x = layer(x, params[1], True)
    x = layer(x, params[2], True)
    x = upsample_bilinear_x2(x)
    x = layer(x, params[3], True)
    x = layer(x, params[4], False)
    if out_activation == 'sigmoid':
        x = jax.nn.sigmoid(x)
    return x


if __name__ == "__main__":
    key = jax.random.PRNGKey(0)
    kp, kx = jax.random.split(key)

    # small config: batch=2, in_chan=1, nh=2, spatial 8x8
    params = init_params(kp, in_chan=1, out_chan=1, nh=2)
    x_nchw = jax.random.normal(kx, (2, 1, 8, 8), jnp.float32)
    x_nhwc = jnp.transpose(x_nchw, (0, 2, 3, 1))

    # Hoisted, one-time weight preprocessing (not on the per-call path).
    w_mats, b_pads, layer_defs = prepare_params(params)

    fwd = jax.jit(make_forward(layer_defs))
    y_nhwc = fwd(x_nhwc, w_mats, b_pads)
    y_nchw = jnp.transpose(y_nhwc, (0, 3, 1, 2))   # back to PyTorch NCHW
    jax.block_until_ready(y_nchw)

    # self-consistency check against a pure-JAX f32 reference
    y_ref = forward_ref(x_nhwc, params)
    err = float(jnp.max(jnp.abs(y_nhwc - y_ref)))
    scale = 1.0 + float(jnp.max(jnp.abs(y_ref)))
    assert y_nchw.shape == (2, 1, 56, 56), y_nchw.shape
    # bf16 MXU operands -> looser tolerance than the previous all-f32 version.
    assert err <= 5e-2 * scale, f"mismatch vs reference: {err}"

    print("KERNEL_OK")
</pallas_src>

<mosaic_0001>
module attributes {stable_mosaic.version = 11 : i64} {
  func.func @_gemm_bias_act_kernel(%arg0: i32, %arg1: memref<128x128xbf16, #tpu.memory_space<vmem>>, %arg2: memref<128x128xbf16, #tpu.memory_space<vmem>>, %arg3: memref<1x128xf32, #tpu.memory_space<vmem>>, %arg4: memref<128x128xf32, #tpu.memory_space<vmem>>) attributes {dimension_semantics = [#tpu.dimension_semantics<parallel>], iteration_bounds = array<i64: 2>, scalar_prefetch = 0 : i64, scratch_operands = 0 : i64, tpu.core_type = #tpu.core_type<tc>, window_params = [{transform_indices = @transform_0, window_bounds = array<i64: 128, 128>}, {pipeline_mode = #tpu.pipeline_mode<synchronous>, transform_indices = @transform_1, window_bounds = array<i64: 128, 128>}, {pipeline_mode = #tpu.pipeline_mode<synchronous>, transform_indices = @transform_2, window_bounds = array<i64: 1, 128>}, {transform_indices = @transform_3, window_bounds = array<i64: 128, 128>}]} {
    %c0 = arith.constant 0 : index
    %c0_0 = arith.constant 0 : index
    %0 = vector.load %arg1[%c0, %c0_0] : memref<128x128xbf16, #tpu.memory_space<vmem>>, vector<128x128xbf16>
    %c0_1 = arith.constant 0 : index
    %c0_2 = arith.constant 0 : index
    %1 = vector.load %arg2[%c0_1, %c0_2] : memref<128x128xbf16, #tpu.memory_space<vmem>>, vector<128x128xbf16>
    %cst = arith.constant dense<0.000000e+00> : vector<128x128xf32>
    %2 = tpu.matmul %0, %1, %cst {dimension_numbers = #tpu.dot_dimension_numbers<[1], [0], [0], [1], [0, 0, 1, 1], [], []>} : vector<128x128xbf16>, vector<128x128xbf16>, vector<128x128xf32> -> vector<128x128xf32>
    %c0_3 = arith.constant 0 : index
    %c0_4 = arith.constant 0 : index
    %3 = vector.load %arg3[%c0_3, %c0_4] : memref<1x128xf32, #tpu.memory_space<vmem>>, vector<1x128xf32>
    %4 = vector.broadcast %3 : vector<1x128xf32> to vector<128x128xf32>
    %5 = arith.addf %2, %4 : vector<128x128xf32>
    %cst_5 = arith.constant 0.000000e+00 : f32
    %6 = vector.broadcast %cst_5 : f32 to vector<128x128xf32>
    %7 = arith.maximumf %5, %6 : vector<128x128xf32>
    %c0_6 = arith.constant 0 : index
    %c0_7 = arith.constant 0 : index
    %8 = vector.load %arg4[%c0_6, %c0_7] : memref<128x128xf32, #tpu.memory_space<vmem>>, vector<128x128xf32>
    tpu.vector_store %arg4[%c0_6, %c0_7], %7 {strides = array<i32>} : memref<128x128xf32, #tpu.memory_space<vmem>>, vector<128x128xf32>,
    return
  }
  func.func @transform_0(%arg0: i32) -> (i32, i32) {
    %c0_i32 = arith.constant 0 : i32
    %c0_i32_0 = arith.constant 0 : i32
    return %arg0, %c0_i32 : i32, i32
  }
  func.func @transform_1(%arg0: i32) -> (i32, i32) {
    %c0_i32 = arith.constant 0 : i32
    %c0_i32_0 = arith.constant 0 : i32
    %c0_i32_1 = arith.constant 0 : i32
    return %c0_i32, %c0_i32_0 : i32, i32
  }
  func.func @transform_2(%arg0: i32) -> (i32, i32) {
    %c0_i32 = arith.constant 0 : i32
    %c0_i32_0 = arith.constant 0 : i32
    %c0_i32_1 = arith.constant 0 : i32
    return %c0_i32, %c0_i32_0 : i32, i32
  }
  func.func @transform_3(%arg0: i32) -> (i32, i32) {
    %c0_i32 = arith.constant 0 : i32
    %c0_i32_0 = arith.constant 0 : i32
    return %arg0, %c0_i32 : i32, i32
  }
}

module attributes {stable_mosaic.version = 11 : i64} {
  func.func @_gemm_bias_act_kernel(%arg0: i32, %arg1: memref<512x384xbf16, #tpu.memory_space<vmem>>, %arg2: memref<384x128xbf16, #tpu.memory_space<vmem>>, %arg3: memref<1x128xf32, #tpu.memory_space<vmem>>, %arg4: memref<512x128xf32, #tpu.memory_space<vmem>>) attributes {dimension_semantics = [#tpu.dimension_semantics<parallel>], iteration_bounds = array<i64: 3>, scalar_prefetch = 0 : i64, scratch_operands = 0 : i64, tpu.core_type = #tpu.core_type<tc>, window_params = [{transform_indices = @transform_0, window_bounds = array<i64: 512, 384>}, {pipeline_mode = #tpu.pipeline_mode<synchronous>, transform_indices = @transform_1, window_bounds = array<i64: 384, 128>}, {pipeline_mode = #tpu.pipeline_mode<synchronous>, transform_indices = @transform_2, window_bounds = array<i64: 1, 128>}, {transform_indices = @transform_3, window_bounds = array<i64: 512, 128>}]} {
    %c0 = arith.constant 0 : index
    %c0_0 = arith.constant 0 : index
    %0 = vector.load %arg1[%c0, %c0_0] : memref<512x384xbf16, #tpu.memory_space<vmem>>, vector<512x384xbf16>
    %c0_1 = arith.constant 0 : index
    %c0_2 = arith.constant 0 : index
    %1 = vector.load %arg2[%c0_1, %c0_2] : memref<384x128xbf16, #tpu.memory_space<vmem>>, vector<384x128xbf16>
    %cst = arith.constant dense<0.000000e+00> : vector<512x128xf32>
    %2 = tpu.matmul %0, %1, %cst {dimension_numbers = #tpu.dot_dimension_numbers<[1], [0], [0], [1], [0, 0, 1, 1], [], []>} : vector<512x384xbf16>, vector<384x128xbf16>, vector<512x128xf32> -> vector<512x128xf32>
    %c0_3 = arith.constant 0 : index
    %c0_4 = arith.constant 0 : index
    %3 = vector.load %arg3[%c0_3, %c0_4] : memref<1x128xf32, #tpu.memory_space<vmem>>, vector<1x128xf32>
    %4 = vector.broadcast %3 : vector<1x128xf32> to vector<512x128xf32>
    %5 = arith.addf %2, %4 : vector<512x128xf32>
    %cst_5 = arith.constant 0.000000e+00 : f32
    %6 = vector.broadcast %cst_5 : f32 to vector<512x128xf32>
    %7 = arith.maximumf %5, %6 : vector<512x128xf32>
    %c0_6 = arith.constant 0 : index
    %c0_7 = arith.constant 0 : index
    %8 = vector.load %arg4[%c0_6, %c0_7] : memref<512x128xf32, #tpu.memory_space<vmem>>, vector<512x128xf32>
    tpu.vector_store %arg4[%c0_6, %c0_7], %7 {strides = array<i32>} : memref<512x128xf32, #tpu.memory_space<vmem>>, vector<512x128xf32>,
    return
  }
  func.func @transform_0(%arg0: i32) -> (i32, i32) {
    %c0_i32 = arith.constant 0 : i32
    %c0_i32_0 = arith.constant 0 : i32
    return %arg0, %c0_i32 : i32, i32
  }
  func.func @transform_1(%arg0: i32) -> (i32, i32) {
    %c0_i32 = arith.constant 0 : i32
    %c0_i32_0 = arith.constant 0 : i32
    %c0_i32_1 = arith.constant 0 : i32
    return %c0_i32, %c0_i32_0 : i32, i32
  }
  func.func @transform_2(%arg0: i32) -> (i32, i32) {
    %c0_i32 = arith.constant 0 : i32
    %c0_i32_0 = arith.constant 0 : i32
    %c0_i32_1 = arith.constant 0 : i32
    return %c0_i32, %c0_i32_0 : i32, i32
  }
  func.func @transform_3(%arg0: i32) -> (i32, i32) {
    %c0_i32 = arith.constant 0 : i32
    %c0_i32_0 = arith.constant 0 : i32
    return %arg0, %c0_i32 : i32, i32
  }
}

module attributes {stable_mosaic.version = 11 : i64} {
  func.func @_gemm_bias_act_kernel(%arg0: i32, %arg1: memref<512x256xbf16, #tpu.memory_space<vmem>>, %arg2: memref<256x128xbf16, #tpu.memory_space<vmem>>, %arg3: memref<1x128xf32, #tpu.memory_space<vmem>>, %arg4: memref<512x128xf32, #tpu.memory_space<vmem>>) attributes {dimension_semantics = [#tpu.dimension_semantics<parallel>], iteration_bounds = array<i64: 3>, scalar_prefetch = 0 : i64, scratch_operands = 0 : i64, tpu.core_type = #tpu.core_type<tc>, window_params = [{transform_indices = @transform_0, window_bounds = array<i64: 512, 256>}, {pipeline_mode = #tpu.pipeline_mode<synchronous>, transform_indices = @transform_1, window_bounds = array<i64: 256, 128>}, {pipeline_mode = #tpu.pipeline_mode<synchronous>, transform_indices = @transform_2, window_bounds = array<i64: 1, 128>}, {transform_indices = @transform_3, window_bounds = array<i64: 512, 128>}]} {
    %c0 = arith.constant 0 : index
    %c0_0 = arith.constant 0 : index
    %0 = vector.load %arg1[%c0, %c0_0] : memref<512x256xbf16, #tpu.memory_space<vmem>>, vector<512x256xbf16>
    %c0_1 = arith.constant 0 : index
    %c0_2 = arith.constant 0 : index
    %1 = vector.load %arg2[%c0_1, %c0_2] : memref<256x128xbf16, #tpu.memory_space<vmem>>, vector<256x128xbf16>
    %cst = arith.constant dense<0.000000e+00> : vector<512x128xf32>
    %2 = tpu.matmul %0, %1, %cst {dimension_numbers = #tpu.dot_dimension_numbers<[1], [0], [0], [1], [0, 0, 1, 1], [], []>} : vector<512x256xbf16>, vector<256x128xbf16>, vector<512x128xf32> -> vector<512x128xf32>
    %c0_3 = arith.constant 0 : index
    %c0_4 = arith.constant 0 : index
    %3 = vector.load %arg3[%c0_3, %c0_4] : memref<1x128xf32, #tpu.memory_space<vmem>>, vector<1x128xf32>
    %4 = vector.broadcast %3 : vector<1x128xf32> to vector<512x128xf32>
    %5 = arith.addf %2, %4 : vector<512x128xf32>
    %cst_5 = arith.constant 0.000000e+00 : f32
    %6 = vector.broadcast %cst_5 : f32 to vector<512x128xf32>
    %7 = arith.maximumf %5, %6 : vector<512x128xf32>
    %c0_6 = arith.constant 0 : index
    %c0_7 = arith.constant 0 : index
    %8 = vector.load %arg4[%c0_6, %c0_7] : memref<512x128xf32, #tpu.memory_space<vmem>>, vector<512x128xf32>
    tpu.vector_store %arg4[%c0_6, %c0_7], %7 {strides = array<i32>} : memref<512x128xf32, #tpu.memory_space<vmem>>, vector<512x128xf32>,
    return
  }
  func.func @transform_0(%arg0: i32) -> (i32, i32) {
    %c0_i32 = arith.constant 0 : i32
    %c0_i32_0 = arith.constant 0 : i32
    return %arg0, %c0_i32 : i32, i32
  }
  func.func @transform_1(%arg0: i32) -> (i32, i32) {
    %c0_i32 = arith.constant 0 : i32
    %c0_i32_0 = arith.constant 0 : i32
    %c0_i32_1 = arith.constant 0 : i32
    return %c0_i32, %c0_i32_0 : i32, i32
  }
  func.func @transform_2(%arg0: i32) -> (i32, i32) {
    %c0_i32 = arith.constant 0 : i32
    %c0_i32_0 = arith.constant 0 : i32
    %c0_i32_1 = arith.constant 0 : i32
    return %c0_i32, %c0_i32_0 : i32, i32
  }
  func.func @transform_3(%arg0: i32) -> (i32, i32) {
    %c0_i32 = arith.constant 0 : i32
    %c0_i32_0 = arith.constant 0 : i32
    return %arg0, %c0_i32 : i32, i32
  }
}

module attributes {stable_mosaic.version = 11 : i64} {
  func.func @_gemm_bias_act_kernel(%arg0: i32, %arg1: memref<512x256xbf16, #tpu.memory_space<vmem>>, %arg2: memref<256x128xbf16, #tpu.memory_space<vmem>>, %arg3: memref<1x128xf32, #tpu.memory_space<vmem>>, %arg4: memref<512x128xf32, #tpu.memory_space<vmem>>) attributes {dimension_semantics = [#tpu.dimension_semantics<parallel>], iteration_bounds = array<i64: 12>, scalar_prefetch = 0 : i64, scratch_operands = 0 : i64, tpu.core_type = #tpu.core_type<tc>, window_params = [{transform_indices = @transform_0, window_bounds = array<i64: 512, 256>}, {pipeline_mode = #tpu.pipeline_mode<synchronous>, transform_indices = @transform_1, window_bounds = array<i64: 256, 128>}, {pipeline_mode = #tpu.pipeline_mode<synchronous>, transform_indices = @transform_2, window_bounds = array<i64: 1, 128>}, {transform_indices = @transform_3, window_bounds = array<i64: 512, 128>}]} {
    %c0 = arith.constant 0 : index
    %c0_0 = arith.constant 0 : index
    %0 = vector.load %arg1[%c0, %c0_0] : memref<512x256xbf16, #tpu.memory_space<vmem>>, vector<512x256xbf16>
    %c0_1 = arith.constant 0 : index
    %c0_2 = arith.constant 0 : index
    %1 = vector.load %arg2[%c0_1, %c0_2] : memref<256x128xbf16, #tpu.memory_space<vmem>>, vector<256x128xbf16>
    %cst = arith.constant dense<0.000000e+00> : vector<512x128xf32>
    %2 = tpu.matmul %0, %1, %cst {dimension_numbers = #tpu.dot_dimension_numbers<[1], [0], [0], [1], [0, 0, 1, 1], [], []>} : vector<512x256xbf16>, vector<256x128xbf16>, vector<512x128xf32> -> vector<512x128xf32>
    %c0_3 = arith.constant 0 : index
    %c0_4 = arith.constant 0 : index
    %3 = vector.load %arg3[%c0_3, %c0_4] : memref<1x128xf32, #tpu.memory_space<vmem>>, vector<1x128xf32>
    %4 = vector.broadcast %3 : vector<1x128xf32> to vector<512x128xf32>
    %5 = arith.addf %2, %4 : vector<512x128xf32>
    %cst_5 = arith.constant 0.000000e+00 : f32
    %6 = vector.broadcast %cst_5 : f32 to vector<512x128xf32>
    %7 = arith.maximumf %5, %6 : vector<512x128xf32>
    %c0_6 = arith.constant 0 : index
    %c0_7 = arith.constant 0 : index
    %8 = vector.load %arg4[%c0_6, %c0_7] : memref<512x128xf32, #tpu.memory_space<vmem>>, vector<512x128xf32>
    tpu.vector_store %arg4[%c0_6, %c0_7], %7 {strides = array<i32>} : memref<512x128xf32, #tpu.memory_space<vmem>>, vector<512x128xf32>,
    return
  }
  func.func @transform_0(%arg0: i32) -> (i32, i32) {
    %c0_i32 = arith.constant 0 : i32
    %c0_i32_0 = arith.constant 0 : i32
    return %arg0, %c0_i32 : i32, i32
  }
  func.func @transform_1(%arg0: i32) -> (i32, i32) {
    %c0_i32 = arith.constant 0 : i32
    %c0_i32_0 = arith.constant 0 : i32
    %c0_i32_1 = arith.constant 0 : i32
    return %c0_i32, %c0_i32_0 : i32, i32
  }
  func.func @transform_2(%arg0: i32) -> (i32, i32) {
    %c0_i32 = arith.constant 0 : i32
    %c0_i32_0 = arith.constant 0 : i32
    %c0_i32_1 = arith.constant 0 : i32
    return %c0_i32, %c0_i32_0 : i32, i32
  }
  func.func @transform_3(%arg0: i32) -> (i32, i32) {
    %c0_i32 = arith.constant 0 : i32
    %c0_i32_0 = arith.constant 0 : i32
    return %arg0, %c0_i32 : i32, i32
  }
}

module attributes {stable_mosaic.version = 11 : i64} {
  func.func @_gemm_bias_act_kernel(%arg0: i32, %arg1: memref<512x128xbf16, #tpu.memory_space<vmem>>, %arg2: memref<128x128xbf16, #tpu.memory_space<vmem>>, %arg3: memref<1x128xf32, #tpu.memory_space<vmem>>, %arg4: memref<512x128xf32, #tpu.memory_space<vmem>>) attributes {dimension_semantics = [#tpu.dimension_semantics<parallel>], iteration_bounds = array<i64: 13>, scalar_prefetch = 0 : i64, scratch_operands = 0 : i64, tpu.core_type = #tpu.core_type<tc>, window_params = [{transform_indices = @transform_0, window_bounds = array<i64: 512, 128>}, {pipeline_mode = #tpu.pipeline_mode<synchronous>, transform_indices = @transform_1, window_bounds = array<i64: 128, 128>}, {pipeline_mode = #tpu.pipeline_mode<synchronous>, transform_indices = @transform_2, window_bounds = array<i64: 1, 128>}, {transform_indices = @transform_3, window_bounds = array<i64: 512, 128>}]} {
    %c0 = arith.constant 0 : index
    %c0_0 = arith.constant 0 : index
    %0 = vector.load %arg1[%c0, %c0_0] : memref<512x128xbf16, #tpu.memory_space<vmem>>, vector<512x128xbf16>
    %c0_1 = arith.constant 0 : index
    %c0_2 = arith.constant 0 : index
    %1 = vector.load %arg2[%c0_1, %c0_2] : memref<128x128xbf16, #tpu.memory_space<vmem>>, vector<128x128xbf16>
    %cst = arith.constant dense<0.000000e+00> : vector<512x128xf32>
    %2 = tpu.matmul %0, %1, %cst {dimension_numbers = #tpu.dot_dimension_numbers<[1], [0], [0], [1], [0, 0, 1, 1], [], []>} : vector<512x128xbf16>, vector<128x128xbf16>, vector<512x128xf32> -> vector<512x128xf32>
    %c0_3 = arith.constant 0 : index
    %c0_4 = arith.constant 0 : index
    %3 = vector.load %arg3[%c0_3, %c0_4] : memref<1x128xf32, #tpu.memory_space<vmem>>, vector<1x128xf32>
    %4 = vector.broadcast %3 : vector<1x128xf32> to vector<512x128xf32>
    %5 = arith.addf %2, %4 : vector<512x128xf32>
    %c0_5 = arith.constant 0 : index
    %c0_6 = arith.constant 0 : index
    %6 = vector.load %arg4[%c0_5, %c0_6] : memref<512x128xf32, #tpu.memory_space<vmem>>, vector<512x128xf32>
    tpu.vector_store %arg4[%c0_5, %c0_6], %5 {strides = array<i32>} : memref<512x128xf32, #tpu.memory_space<vmem>>, vector<512x128xf32>,
    return
  }
  func.func @transform_0(%arg0: i32) -> (i32, i32) {
    %c0_i32 = arith.constant 0 : i32
    %c0_i32_0 = arith.constant 0 : i32
    return %arg0, %c0_i32 : i32, i32
  }
  func.func @transform_1(%arg0: i32) -> (i32, i32) {
    %c0_i32 = arith.constant 0 : i32
    %c0_i32_0 = arith.constant 0 : i32
    %c0_i32_1 = arith.constant 0 : i32
    return %c0_i32, %c0_i32_0 : i32, i32
  }
  func.func @transform_2(%arg0: i32) -> (i32, i32) {
    %c0_i32 = arith.constant 0 : i32
    %c0_i32_0 = arith.constant 0 : i32
    %c0_i32_1 = arith.constant 0 : i32
    return %c0_i32, %c0_i32_0 : i32, i32
  }
  func.func @transform_3(%arg0: i32) -> (i32, i32) {
    %c0_i32 = arith.constant 0 : i32
    %c0_i32_0 = arith.constant 0 : i32
    return %arg0, %c0_i32 : i32, i32
  }
}

</mosaic_0001>

<bundles_post_ra>
// kernel: forward.5
= control target key start
LH: loop header
LB: loop body
LE: loop exit
PB: predicated region body
PF: predicated region fallthrough
CT: control target
= control target key end

     0   :  { %s639_s12 = smov 0   ;;  %s715_s0 = inlined_call_operand.vmem [shape: bf16[256,128], index: 0, kind: input, shape index: {}]   ;;  %s716_s1 = inlined_call_operand.vmem [shape: bf16[128,128], index: 1, kind: input, shape index: {}]   ;;  %s717_s2 = inlined_call_operand.vmem [shape: f32[1,128], index: 2, kind: input, shape index: {}]   ;;  %s718_s3 = inlined_call_operand.vmem [shape: f32[256,128], index: 3, kind: output, shape index: {}]  }
   0x1 LB: > { %s495_s13 = sadd.s32 4294967295, %s617_s12   ;;  %p499_p0 = scmp.ge.s32.totalorder %s617_s12, 1  ;;  %s617_s12 = sphi %s639_s12, %s13_s12  }
   0x2   : > { %p138_p1 = scmp.lt.s32.totalorder %s617_s12, 3 }
   0x4   : > { %p139_p2 = pnand %p499_p0, %p138_p1 }
   0x5   : > { %v595_v0 = vld [vmem:[%s716_s1] sm:$0xff] (!%p139_p2)   ;;  %s500_s16 = sshll.u32 (!%p139_p2), %s495_s13, 4  ;;  %v596_v1 = vld [vmem:[%s716_s1 + $0x8] sm:$0xff] (!%p139_p2)   ;;  %v597_v2 = vld [vmem:[%s716_s1 + $0x10] sm:$0xff] (!%p139_p2)  }
   0x6   : > { %142 = sbr.rel (%p139_p2) target bundleno = 266 (0x10a), region = 32  ;;  %p163_p3 = scmp.lt.s32.totalorder (!%p139_p2), %s500_s16, 31  ;;  %539 = vmatprep.subr.bf16.mxu0 (!%p139_p2), %v595_v0  ;;  %571 = vmatprep.subr.bf16.mxu1 (!%p139_p2), %v595_v0  ;;  %v598_v3 = vld [vmem:[%s716_s1 + $0x18] sm:$0xff] (!%p139_p2)   ;;  %v599_v6 = vld [vmem:[%s716_s1 + $0x20] sm:$0xff] (!%p139_p2)   ;;  %v600_v7 = vld [vmem:[%s716_s1 + $0x28] sm:$0xff] (!%p139_p2)  }
   0x7   : > { %540 = vmatpush3.bf16.msra.mxu0 (!%p139_p2), %v595_v0  ;;  %579 = vmatpush3.bf16.msra.mxu1 (!%p139_p2), %v595_v0  ;;  %v601_v8 = vld [vmem:[%s716_s1 + $0x30] sm:$0xff] (!%p139_p2)   ;;  %v602_v9 = vld [vmem:[%s716_s1 + $0x38] sm:$0xff] (!%p139_p2)   ;;  %v504_v16 = vld [vmem:[%s717_s2] ss:$0 sm:$0xff] (!%p139_p2) }
   0x8   : > { %541 = vmatprep.subr.bf16.mxu0 (!%p139_p2), %v596_v1  ;;  %572 = vmatprep.subr.bf16.mxu1 (!%p139_p2), %v596_v1 }
   0xb   : > { %542 = vmatpush3.bf16.msra.mxu0 (!%p139_p2), %v596_v1  ;;  %580 = vmatpush3.bf16.msra.mxu1 (!%p139_p2), %v596_v1 }
   0xc   : > { %543 = vmatprep.subr.bf16.mxu0 (!%p139_p2), %v597_v2  ;;  %573 = vmatprep.subr.bf16.mxu1 (!%p139_p2), %v597_v2 }
   0xd   : > { %s720_s16 = smov (!%p163_p3, %s500_s16), 31 }
   0xe   : > { %s501_s21 = sshll.u32 %s720_s16, 2  ;;  %s503_s10 = sshll.u32 %s720_s16, 3 }
   0xf   : > { %s662_s24 = scalar_lea.vmem %s715_s0, %s501_s21  ;;  %544 = vmatpush3.bf16.msra.mxu0 %v597_v2  ;;  %581 = vmatpush3.bf16.msra.mxu1 %v597_v2  ;;  %s694_s14 = scalar_lea.vmem %s718_s3, %s503_s10 }
  0x10   : > { %v603_v4 = vld [vmem:[%s662_s24] sm:$0xff]   ;;  %545 = vmatprep.subr.bf16.mxu0 %v598_v3  ;;  %574 = vmatprep.subr.bf16.mxu1 %v598_v3  ;;  %v605_v10 = vld [vmem:[%s662_s24 + $0x8] sm:$0xff]   ;;  %v607_v12 = vld [vmem:[%s662_s24 + $0x10] sm:$0xff]  }
  0x11   : > { %v604_v5 = vld [vmem:[%s662_s24 + $0x20] sm:$0xff]   ;;  %555 = vmatprep.mubr.bf16.mxu0 %v603_v4  ;;  %v606_v11 = vld [vmem:[%s662_s24 + $0x28] sm:$0xff]   ;;  %v608_v13 = vld [vmem:[%s662_s24 + $0x30] sm:$0xff]  }
  0x12   : > { %563 = vmatprep.mubr.bf16.mxu1 %v604_v5  ;;  %v609_v14 = vld [vmem:[%s662_s24 + $0x18] sm:$0xff]  }
  0x13   : > { %546 = vmatpush3.bf16.msra.mxu0 %v598_v3  ;;  %582 = vmatpush3.bf16.msra.mxu1 %v598_v3  ;;  %v610_v15 = vld [vmem:[%s662_s24 + $0x38] sm:$0xff]  }
  0x14   : > { %547 = vmatprep.subr.bf16.mxu0 %v599_v6  ;;  %575 = vmatprep.subr.bf16.mxu1 %v599_v6 }
  0x17   : > { %548 = vmatpush3.bf16.msra.mxu0 %v599_v6  ;;  %583 = vmatpush3.bf16.msra.mxu1 %v599_v6 }
  0x18   : > { %549 = vmatprep.subr.bf16.mxu0 %v600_v7  ;;  %576 = vmatprep.subr.bf16.mxu1 %v600_v7 }
  0x1b   : > { %550 = vmatpush3.bf16.msra.mxu0 %v600_v7  ;;  %584 = vmatpush3.bf16.msra.mxu1 %v600_v7 }
  0x1c   : > { %551 = vmatprep.subr.bf16.mxu0 %v601_v8  ;;  %577 = vmatprep.subr.bf16.mxu1 %v601_v8 }
  0x1f   : > { %552 = vmatpush3.bf16.msra.mxu0 %v601_v8  ;;  %585 = vmatpush3.bf16.msra.mxu1 %v601_v8 }
  0x20   : > { %553 = vmatprep.subr.bf16.mxu0 %v602_v9  ;;  %578 = vmatprep.subr.bf16.mxu1 %v602_v9 }
  0x23   : > { %554 = vmatpush3.bf16.msra.mxu0 %v602_v9  ;;  %586 = vmatpush3.bf16.msra.mxu1 %v602_v9 }
  0x26   : > { %556 = vmatmul.mubr.bf16.vlgmr.msra.gmra.mrb[0].mxu0 %v605_v10  ;;  %564 = vmatmul.mubr.bf16.vlgmr.msra.gmra.mrb[0].mxu1 %v606_v11 }
  0x27   : > { %559 = vmatprep.mubr.bf16.mxu0 %v607_v12  ;;  %567 = vmatprep.mubr.bf16.mxu1 %v608_v13 }
  0x2e   : > { %560 = vmatmul.mubr.bf16.gmra.mrb[4].mxu0 %v609_v14  ;;  %568 = vmatmul.mubr.bf16.gmra.mrb[4].mxu1 %v610_v15 }
  0xf9   : > { %v557_v17 = vpop.f32.mrb[0].mxu0  ;;  %v565_v18 = vpop.f32.mrb[0].mxu1 }
  0xfa   : > { %v353_v19 = vadd.f32 %v557_v17, %v504_v16  ;;  %v385_v20 = vadd.f32 %v565_v18, %v504_v16  ;;  %v344_v21 = vpop.f32.mrb[1].mxu0  ;;  %v376_v22 = vpop.f32.mrb[1].mxu1 }
  0xfb   : > { %v345_v23 = vadd.f32 %v504_v16, %v344_v21  ;;  %v377_v24 = vadd.f32 %v504_v16, %v376_v22  ;;  %v558_v25 = vpop.f32.mrb[2].mxu0  ;;  %v566_v26 = vpop.f32.mrb[2].mxu1 }
  0xfc   : > { %v409_v27 = vmax.f32 %v353_v19, 0.0  ;;  %v417_v28 = vmax.f32 %v385_v20, 0.0  ;;  %v356_v29 = vadd.f32 %v558_v25, %v504_v16  ;;  %v388_v30 = vadd.f32 %v566_v26, %v504_v16  ;;  %v347_v31 = vpop.f32.mrb[3].mxu0  ;;  %v379_v32 = vpop.f32.mrb[3].mxu1 }
  0xfd   : > { %v407_v33 = vmax.f32 %v345_v23, 0.0  ;;  %v415_v34 = vmax.f32 %v377_v24, 0.0  ;;  %v348_v35 = vadd.f32 %v504_v16, %v347_v31  ;;  %v380_v36 = vadd.f32 %v504_v16, %v379_v32 }
  0xfe   : > { %425 = vst [vmem:[%s694_s14 + $0x10] sm:$0xff] %v409_v27  ;;  %433 = vst [vmem:[%s694_s14 + $0x50] sm:$0xff] %v417_v28  ;;  %v410_v37 = vmax.f32 %v356_v29, 0.0  ;;  %v418_v38 = vmax.f32 %v388_v30, 0.0 }
  0xff   : > { %423 = vst [vmem:[%s694_s14] sm:$0xff] %v407_v33  ;;  %431 = vst [vmem:[%s694_s14 + $0x40] sm:$0xff] %v415_v34  ;;  %v408_v39 = vmax.f32 %v348_v35, 0.0  ;;  %v416_v40 = vmax.f32 %v380_v36, 0.0 }
 0x100   : > { %426 = vst [vmem:[%s694_s14 + $0x18] sm:$0xff] %v410_v37  ;;  %434 = vst [vmem:[%s694_s14 + $0x58] sm:$0xff] %v418_v38 }
 0x101   : > { %424 = vst [vmem:[%s694_s14 + $0x8] sm:$0xff] %v408_v39  ;;  %432 = vst [vmem:[%s694_s14 + $0x48] sm:$0xff] %v416_v40  ;;  %v561_v41 = vpop.f32.mrb[4].mxu0  ;;  %v569_v42 = vpop.f32.mrb[4].mxu1 }
 0x102   : > { %v369_v43 = vadd.f32 %v561_v41, %v504_v16  ;;  %v401_v44 = vadd.f32 %v569_v42, %v504_v16  ;;  %v360_v45 = vpop.f32.mrb[5].mxu0  ;;  %v392_v46 = vpop.f32.mrb[5].mxu1 }
 0x103   : > { %v361_v47 = vadd.f32 %v504_v16, %v360_v45  ;;  %v393_v48 = vadd.f32 %v504_v16, %v392_v46  ;;  %v562_v49 = vpop.f32.mrb[6].mxu0  ;;  %v570_v50 = vpop.f32.mrb[6].mxu1 }
 0x104   : > { %v413_v51 = vmax.f32 %v369_v43, 0.0  ;;  %v421_v52 = vmax.f32 %v401_v44, 0.0  ;;  %v372_v53 = vadd.f32 %v562_v49, %v504_v16  ;;  %v404_v54 = vadd.f32 %v570_v50, %v504_v16  ;;  %v363_v55 = vpop.f32.mrb[7].mxu0  ;;  %v395_v56 = vpop.f32.mrb[7].mxu1 }
 0x105   : > { %v411_v57 = vmax.f32 %v361_v47, 0.0  ;;  %v419_v58 = vmax.f32 %v393_v48, 0.0  ;;  %v364_v59 = vadd.f32 %v504_v16, %v363_v55  ;;  %v396_v60 = vadd.f32 %v504_v16, %v395_v56 }
 0x106   : > { %429 = vst [vmem:[%s694_s14 + $0x30] sm:$0xff] %v413_v51  ;;  %437 = vst [vmem:[%s694_s14 + $0x70] sm:$0xff] %v421_v52  ;;  %v414_v61 = vmax.f32 %v372_v53, 0.0  ;;  %v422_v62 = vmax.f32 %v404_v54, 0.0 }
 0x107   : > { %427 = vst [vmem:[%s694_s14 + $0x20] sm:$0xff] %v411_v57  ;;  %435 = vst [vmem:[%s694_s14 + $0x60] sm:$0xff] %v419_v58  ;;  %v412_v63 = vmax.f32 %v364_v59, 0.0  ;;  %v420_v0 = vmax.f32 %v396_v60, 0.0 }
 0x108   : > { %430 = vst [vmem:[%s694_s14 + $0x38] sm:$0xff] %v414_v61  ;;  %438 = vst [vmem:[%s694_s14 + $0x78] sm:$0xff] %v422_v62 }
 0x109   : > { %428 = vst [vmem:[%s694_s14 + $0x28] sm:$0xff] %v412_v63  ;;  %436 = vst [vmem:[%s694_s14 + $0x68] sm:$0xff] %v420_v0 }
 0x10a PF: > { %s13_s12 = sadd.s32 1, %s617_s12  }
 0x10b   : > { %p10_p4 = scmp.ge.s32.totalorder %s13_s12, 4  }
 0x10d   :  { %12 = sbr.rel (!%p10_p4) target bundleno = 1 (0x1), region = 62 }

// kernel: forward.6
= control target key start
LH: loop header
LB: loop body
LE: loop exit
PB: predicated region body
PF: predicated region fallthrough
CT: control target
= control target key end

     0   :  { %s2254_s12 = smov 0   ;;  %s2738_s0 = inlined_call_operand.vmem [shape: bf16[1536,384], index: 0, kind: input, shape index: {}]   ;;  %s2739_s1 = inlined_call_operand.vmem [shape: bf16[384,128], index: 1, kind: input, shape index: {}]   ;;  %s2740_s2 = inlined_call_operand.vmem [shape: f32[1,128], index: 2, kind: input, shape index: {}]   ;;  %s2741_s3 = inlined_call_operand.vmem [shape: f32[1536,128], index: 3, kind: output, shape index: {}]  }
   0x1 LB: > { %s1779_s13 = sadd.s32 4294967295, %s2231_s12   ;;  %p1783_p0 = scmp.ge.s32.totalorder %s2231_s12, 1  ;;  %s2231_s12 = sphi %s2254_s12, %s13_s12  }
   0x2   : > { %p139_p1 = scmp.lt.s32.totalorder %s2231_s12, 4 }
   0x4   : > { %p140_p2 = pnand %p1783_p0, %p139_p1 }
   0x5   : > { %v2073_v0 = vld [vmem:[%s2739_s1] sm:$0xff] (!%p140_p2)   ;;  %v2233_v1 = vmov (!%p140_p2), 0   ;;  %s1784_s16 = sshll.u32 (!%p140_p2), %s1779_s13, 6  ;;  %v2074_v2 = vld [vmem:[%s2739_s1 + $0x8] sm:$0xff] (!%p140_p2)   ;;  %v2075_v3 = vld [vmem:[%s2739_s1 + $0x10] sm:$0xff] (!%p140_p2)  }
   0x6   : > { %143 = sbr.rel (%p140_p2) target bundleno = 475 (0x1db), region = 32  ;;  %1017 = vmatprep.subr.bf16.mxu0 (!%p140_p2), %v2233_v1  ;;  %2031 = vmatprep.subr.bf16.mxu1 (!%p140_p2), %v2233_v1  ;;  %p165_p3 = scmp.lt.s32.totalorder (!%p140_p2), %s1784_s16, 191  ;;  %v2076_v4 = vld [vmem:[%s2739_s1 + $0x18] sm:$0xff] (!%p140_p2)   ;;  %v2077_v5 = vld [vmem:[%s2739_s1 + $0x20] sm:$0xff] (!%p140_p2)   ;;  %v2078_v7 = vld [vmem:[%s2739_s1 + $0x28] sm:$0xff] (!%p140_p2)  }
   0x7   : > { %1018 = vmatpush1.bf16.msra.mxu0 (!%p140_p2), %v2073_v0  ;;  %2047 = vmatpush1.bf16.msra.mxu1 (!%p140_p2), %v2073_v0  ;;  %v2079_v9 = vld [vmem:[%s2739_s1 + $0x30] sm:$0xff] (!%p140_p2)   ;;  %v2080_v10 = vld [vmem:[%s2739_s1 + $0x38] sm:$0xff] (!%p140_p2)   ;;  %v2081_v11 = vld [vmem:[%s2739_s1 + $0x40] sm:$0xff] (!%p140_p2)  }
   0x8   : > { %1019 = vmatprep.subr.bf16.mxu0 (!%p140_p2), %v2233_v1  ;;  %2032 = vmatprep.subr.bf16.mxu1 (!%p140_p2), %v2233_v1  ;;  %v2082_v12 = vld [vmem:[%s2739_s1 + $0x48] sm:$0xff] (!%p140_p2)   ;;  %v2083_v13 = vld [vmem:[%s2739_s1 + $0x50] sm:$0xff] (!%p140_p2)   ;;  %v2084_v14 = vld [vmem:[%s2739_s1 + $0x58] sm:$0xff] (!%p140_p2)  }
   0x9   : > { %v2085_v15 = vld [vmem:[%s2739_s1 + $0x60] sm:$0xff] (!%p140_p2)   ;;  %v2086_v16 = vld [vmem:[%s2739_s1 + $0x68] sm:$0xff] (!%p140_p2)   ;;  %v2087_v17 = vld [vmem:[%s2739_s1 + $0x70] sm:$0xff] (!%p140_p2)  }
   0xa   : > { %v2088_v18 = vld [vmem:[%s2739_s1 + $0x78] sm:$0xff] (!%p140_p2)   ;;  %v2095_v19 = vld [vmem:[%s2739_s1 + $0x80] sm:$0xff] (!%p140_p2)   ;;  %v2102_v24 = vld [vmem:[%s2739_s1 + $0x88] sm:$0xff] (!%p140_p2)  }
   0xb   : > { %1020 = vmatpush1.bf16.msra.mxu0 (!%p140_p2), %v2074_v2  ;;  %2048 = vmatpush1.bf16.msra.mxu1 (!%p140_p2), %v2074_v2  ;;  %v2109_v25 = vld [vmem:[%s2739_s1 + $0x90] sm:$0xff] (!%p140_p2)   ;;  %v2116_v30 = vld [vmem:[%s2739_s1 + $0x98] sm:$0xff] (!%p140_p2)   ;;  %v2123_v32 = vld [vmem:[%s2739_s1 + $0xa0] sm:$0xff] (!%p140_p2)  }
   0xc   : > { %1021 = vmatprep.subr.bf16.mxu0 (!%p140_p2), %v2233_v1  ;;  %2033 = vmatprep.subr.bf16.mxu1 (!%p140_p2), %v2233_v1  ;;  %v2130_v36 = vld [vmem:[%s2739_s1 + $0xa8] sm:$0xff] (!%p140_p2)   ;;  %v2137_v41 = vld [vmem:[%s2739_s1 + $0xb0] sm:$0xff] (!%p140_p2)   ;;  %v2144_v42 = vld [vmem:[%s2739_s1 + $0xb8] sm:$0xff] (!%p140_p2)  }
   0xd   : > { %s2743_s16 = smov (!%p165_p3, %s1784_s16), 191 }
   0xe   : > { %s2063_s23 = smul.u32 12, %s2743_s16  ;;  %s1787_s19 = sshll.u32 %s2743_s16, 3 }
   0xf   : > { %1022 = vmatpush1.bf16.msra.mxu0 %v2075_v3  ;;  %2049 = vmatpush1.bf16.msra.mxu1 %v2075_v3  ;;  %s2547_s22 = scalar_lea.vmem %s2741_s3, %s1787_s19 }
  0x10   : > { %1023 = vmatprep.subr.bf16.mxu0 %v2233_v1  ;;  %2034 = vmatprep.subr.bf16.mxu1 %v2233_v1  ;;  %s2291_s28 = scalar_lea.vmem %s2738_s0, %s2063_s23 }
  0x11   : > { %v2091_v6 = vld [vmem:[%s2291_s28 + $0x4] ss:$12 sps:$4 sm:$0xff]   ;;  %v2089_v20 = vld [vmem:[%s2291_s28] ss:$12 sps:$4 sm:$0xff]   ;;  %v2096_v22 = vld [vmem:[%s2291_s28 + $0x1c] ss:$12 sps:$4 sm:$0xff]  }
  0x12   : > { %v2094_v8 = vld [vmem:[%s2291_s28 + $0x244] ss:$12 sps:$4 sm:$0xff]   ;;  %1049 = vmatprep.mubr.bf16.mxu0 %v2091_v6  ;;  %v2092_v21 = vld [vmem:[%s2291_s28 + $0x240] ss:$12 sps:$4 sm:$0xff]   ;;  %v2098_v23 = vld [vmem:[%s2291_s28 + $0x25c] ss:$12 sps:$4 sm:$0xff]  }
  0x13   : > { %1024 = vmatpush1.bf16.msra.mxu0 %v2076_v4  ;;  %2050 = vmatpush1.bf16.msra.mxu1 %v2076_v4  ;;  %v2100_v26 = vld [vmem:[%s2291_s28 + $0x18] ss:$12 sps:$4 sm:$0xff]   ;;  %v2103_v28 = vld [vmem:[%s2291_s28 + $0x34] ss:$12 sps:$4 sm:$0xff]   ;;  %v2107_v31 = vld [vmem:[%s2291_s28 + $0x30] ss:$12 sps:$4 sm:$0xff]  }
  0x14   : > { %1025 = vmatprep.subr.bf16.mxu0 %v2233_v1  ;;  %2035 = vmatprep.subr.bf16.mxu1 %v2233_v1  ;;  %v2101_v27 = vld [vmem:[%s2291_s28 + $0x258] ss:$12 sps:$4 sm:$0xff]   ;;  %v2105_v29 = vld [vmem:[%s2291_s28 + $0x274] ss:$12 sps:$4 sm:$0xff]   ;;  %v2108_v33 = vld [vmem:[%s2291_s28 + $0x270] ss:$12 sps:$4 sm:$0xff]  }
  0x15   : > { %1241 = vmatprep.mubr.bf16.mxu1 %v2094_v8  ;;  %v2110_v34 = vld [vmem:[%s2291_s28 + $0x4c] ss:$12 sps:$4 sm:$0xff]   ;;  %v2114_v37 = vld [vmem:[%s2291_s28 + $0x48] ss:$12 sps:$4 sm:$0xff]   ;;  %v2117_v39 = vld [vmem:[%s2291_s28 + $0x64] ss:$12 sps:$4 sm:$0xff]  }
  0x16   : > { %v2112_v35 = vld [vmem:[%s2291_s28 + $0x28c] ss:$12 sps:$4 sm:$0xff]   ;;  %v2115_v38 = vld [vmem:[%s2291_s28 + $0x288] ss:$12 sps:$4 sm:$0xff]   ;;  %v2119_v40 = vld [vmem:[%s2291_s28 + $0x2a4] ss:$12 sps:$4 sm:$0xff]  }
  0x17   : > { %1026 = vmatpush1.bf16.msra.mxu0 %v2077_v5  ;;  %2051 = vmatpush1.bf16.msra.mxu1 %v2077_v5  ;;  %v2121_v43 = vld [vmem:[%s2291_s28 + $0x60] ss:$12 sps:$4 sm:$0xff]   ;;  %v2124_v45 = vld [vmem:[%s2291_s28 + $0x7c] ss:$12 sps:$4 sm:$0xff]   ;;  %v2128_v47 = vld [vmem:[%s2291_s28 + $0x78] ss:$12 sps:$4 sm:$0xff]  }
  0x18   : > { %1027 = vmatprep.subr.bf16.mxu0 %v2233_v1  ;;  %2036 = vmatprep.subr.bf16.mxu1 %v2233_v1  ;;  %v2122_v44 = vld [vmem:[%s2291_s28 + $0x2a0] ss:$12 sps:$4 sm:$0xff]   ;;  %v2126_v46 = vld [vmem:[%s2291_s28 + $0x2bc] ss:$12 sps:$4 sm:$0xff]   ;;  %v2129_v48 = vld [vmem:[%s2291_s28 + $0x2b8] ss:$12 sps:$4 sm:$0xff]  }
  0x19   : > { %v2131_v49 = vld [vmem:[%s2291_s28 + $0x94] ss:$12 sps:$4 sm:$0xff]   ;;  %v2135_v51 = vld [vmem:[%s2291_s28 + $0x90] ss:$12 sps:$4 sm:$0xff]   ;;  %v2138_v53 = vld [vmem:[%s2291_s28 + $0xac] ss:$12 sps:$4 sm:$0xff]  }
  0x1a   : > { %v2133_v50 = vld [vmem:[%s2291_s28 + $0x2d4] ss:$12 sps:$4 sm:$0xff]   ;;  %v2136_v52 = vld [vmem:[%s2291_s28 + $0x2d0] ss:$12 sps:$4 sm:$0xff]   ;;  %v2140_v54 = vld [vmem:[%s2291_s28 + $0x2ec] ss:$12 sps:$4 sm:$0xff]  }
  0x1b   : > { %1028 = vmatpush1.bf16.msra.mxu0 %v2078_v7  ;;  %2052 = vmatpush1.bf16.msra.mxu1 %v2078_v7  ;;  %v2142_v55 = vld [vmem:[%s2291_s28 + $0xa8] ss:$12 sps:$4 sm:$0xff]   ;;  %v2145_v57 = vld [vmem:[%s2291_s28 + $0xc4] ss:$12 sps:$4 sm:$0xff]   ;;  %v2148_v59 = vld [vmem:[%s2291_s28 + $0xc0] ss:$12 sps:$4 sm:$0xff]  }
  0x1c   : > { %1029 = vmatprep.subr.bf16.mxu0 %v2233_v1  ;;  %2037 = vmatprep.subr.bf16.mxu1 %v2233_v1  ;;  %v2143_v56 = vld [vmem:[%s2291_s28 + $0x2e8] ss:$12 sps:$4 sm:$0xff]   ;;  %v2149_v60 = vld [vmem:[%s2291_s28 + $0x20] ss:$12 sps:$4 sm:$0xff]   ;;  %v2152_v62 = vld [vmem:[%s2291_s28 + $0x38] ss:$12 sps:$4 sm:$0xff]  }
  0x1d   : > { %v2147_v58 = vld [vmem:[%s2291_s28 + $0x8] ss:$12 sps:$4 sm:$0xff]   ;;  %v2153_v63 = vld [vmem:[%s2291_s28 + $0xd8] ss:$12 sps:$4 sm:$0xff]   ;;  %v2154_v0 = vld [vmem:[%s2291_s28 + $0x50] ss:$12 sps:$4 sm:$0xff]  }
  0x1e   : > { %v2150_v61 = vld [vmem:[%s2291_s28 + $0xdc] ss:$12 sps:$4 sm:$0xff]   ;;  %v2159_v4 = vld [vmem:[%s2291_s28 + $0x80] ss:$12 sps:$4 sm:$0xff]   ;;  %v2162_v6 = vld [vmem:[%s2291_s28 + $0x98] ss:$12 sps:$4 sm:$0xff]  }
  0x1f   : > { %1030 = vmatpush1.bf16.msra.mxu0 %v2079_v9  ;;  %2053 = vmatpush1.bf16.msra.mxu1 %v2079_v9  ;;  %v2157_v2 = vld [vmem:[%s2291_s28 + $0x68] ss:$12 sps:$4 sm:$0xff]   ;;  %v2158_v3 = vld [vmem:[%s2291_s28 + $0xf0] ss:$12 sps:$4 sm:$0xff]   ;;  %v2160_v5 = vld [vmem:[%s2291_s28 + $0x10c] ss:$12 sps:$4 sm:$0xff]  }
  0x20   : > { %1031 = vmatprep.subr.bf16.mxu0 %v2233_v1  ;;  %2038 = vmatprep.subr.bf16.mxu1 %v2233_v1  ;;  %v2163_v7 = vld [vmem:[%s2291_s28 + $0x108] ss:$12 sps:$4 sm:$0xff]   ;;  %v2164_v8 = vld [vmem:[%s2291_s28 + $0xb0] ss:$12 sps:$4 sm:$0xff]  }
  0x21   : > { %v2165_v9 = vld [vmem:[%s2291_s28 + $0x124] ss:$12 sps:$4 sm:$0xff]  }
  0x23   : > { %1032 = vmatpush1.bf16.msra.mxu0 %v2080_v10  ;;  %2054 = vmatpush1.bf16.msra.mxu1 %v2080_v10  ;;  %v2167_v10 = vld [vmem:[%s2291_s28 + $0xc8] ss:$12 sps:$4 sm:$0xff]  }
  0x24   : > { %1033 = vmatprep.subr.bf16.mxu0 %v2233_v1  ;;  %2039 = vmatprep.subr.bf16.mxu1 %v2233_v1 }
  0x27   : > { %1034 = vmatpush1.bf16.msra.mxu0 %v2081_v11  ;;  %2055 = vmatpush1.bf16.msra.mxu1 %v2081_v11  ;;  %v2168_v11 = vld [vmem:[%s2291_s28 + $0x120] ss:$12 sps:$4 sm:$0xff]  }
  0x28   : > { %1035 = vmatprep.subr.bf16.mxu0 %v2233_v1  ;;  %2040 = vmatprep.subr.bf16.mxu1 %v2233_v1 }
  0x2b   : > { %1036 = vmatpush1.bf16.msra.mxu0 %v2082_v12  ;;  %2056 = vmatpush1.bf16.msra.mxu1 %v2082_v12  ;;  %v2169_v12 = vld [vmem:[%s2291_s28 + $0xe0] ss:$12 sps:$4 sm:$0xff]  }
  0x2c   : > { %1037 = vmatprep.subr.bf16.mxu0 %v2233_v1  ;;  %2041 = vmatprep.subr.bf16.mxu1 %v2233_v1 }
  0x2f   : > { %1038 = vmatpush1.bf16.msra.mxu0 %v2083_v13  ;;  %2057 = vmatpush1.bf16.msra.mxu1 %v2083_v13  ;;  %v2170_v13 = vld [vmem:[%s2291_s28 + $0x13c] ss:$12 sps:$4 sm:$0xff]  }
  0x30   : > { %1039 = vmatprep.subr.bf16.mxu0 %v2233_v1  ;;  %2042 = vmatprep.subr.bf16.mxu1 %v2233_v1 }
  0x33   : > { %1040 = vmatpush1.bf16.msra.mxu0 %v2084_v14  ;;  %2058 = vmatpush1.bf16.msra.mxu1 %v2084_v14  ;;  %v2172_v14 = vld [vmem:[%s2291_s28 + $0xf8] ss:$12 sps:$4 sm:$0xff]  }
  0x34   : > { %1041 = vmatprep.subr.bf16.mxu0 %v2233_v1  ;;  %2043 = vmatprep.subr.bf16.mxu1 %v2233_v1 }
  0x37   : > { %1042 = vmatpush1.bf16.msra.mxu0 %v2085_v15  ;;  %2059 = vmatpush1.bf16.msra.mxu1 %v2085_v15  ;;  %v2173_v15 = vld [vmem:[%s2291_s28 + $0x138] ss:$12 sps:$4 sm:$0xff]  }
  0x38   : > { %1043 = vmatprep.subr.bf16.mxu0 %v2233_v1  ;;  %2044 = vmatprep.subr.bf16.mxu1 %v2233_v1 }
  0x3b   : > { %1044 = vmatpush1.bf16.msra.mxu0 %v2086_v16  ;;  %2060 = vmatpush1.bf16.msra.mxu1 %v2086_v16  ;;  %v2174_v16 = vld [vmem:[%s2291_s28 + $0x110] ss:$12 sps:$4 sm:$0xff]  }
  0x3c   : > { %1045 = vmatprep.subr.bf16.mxu0 %v2233_v1  ;;  %2045 = vmatprep.subr.bf16.mxu1 %v2233_v1 }
  0x3f   : > { %1046 = vmatpush1.bf16.msra.mxu0 %v2087_v17  ;;  %2061 = vmatpush1.bf16.msra.mxu1 %v2087_v17  ;;  %v2175_v17 = vld [vmem:[%s2291_s28 + $0x154] ss:$12 sps:$4 sm:$0xff]  }
  0x40   : > { %1047 = vmatprep.subr.bf16.mxu0 %v2233_v1  ;;  %2046 = vmatprep.subr.bf16.mxu1 %v2233_v1  ;;  %v2155_v1 = vld [vmem:[%s2291_s28 + $0xf4] ss:$12 sps:$4 sm:$0xff]  }
  0x43   : > { %1048 = vmatpush1.bf16.msra.mxu0 %v2088_v18  ;;  %2062 = vmatpush1.bf16.msra.mxu1 %v2088_v18  ;;  %v2177_v18 = vld [vmem:[%s2291_s28 + $0x128] ss:$12 sps:$4 sm:$0xff]  }
  0x44   : > { %1951 = vmatprep.subr.bf16.mxu1 %v2095_v19 }
  0x46   : > { %1050 = vmatmul.mubr.bf16.vlgmr.msra.gmra.mrb[0].mxu0 %v2089_v20  ;;  %1242 = vmatmul.mubr.bf16.vlgmr.msra.gmra.mrb[0].mxu1 %v2092_v21  ;;  %v2179_v20 = vld [vmem:[%s2291_s28 + $0x140] ss:$12 sps:$4 sm:$0xff]  }
  0x47   : > { %1952 = vmatpush3.bf16.msra.mxu1 %v2095_v19  ;;  %1057 = vmatprep.mubr.bf16.mxu0 %v2096_v22  ;;  %v2178_v19 = vld [vmem:[%s2291_s28 + $0x150] ss:$12 sps:$4 sm:$0xff]   ;;  %v2180_v21 = vld [vmem:[%s2291_s28 + $0x16c] ss:$12 sps:$4 sm:$0xff]  }
  0x48   : > { %1249 = vmatprep.mubr.bf16.mxu1 %v2098_v23  ;;  %1953 = vmatprep.subr.bf16.mxu1 %v2102_v24  ;;  %v2182_v22 = vld [vmem:[%s2291_s28 + $0x158] ss:$12 sps:$4 sm:$0xff]   ;;  %v2183_v23 = vld [vmem:[%s2291_s28 + $0x168] ss:$12 sps:$4 sm:$0xff]  }
  0x4b   : > { %1954 = vmatpush3.bf16.msra.mxu1 %v2102_v24  ;;  %v2184_v24 = vld [vmem:[%s2291_s28 + $0x170] ss:$12 sps:$4 sm:$0xff]  }
  0x4c   : > { %1955 = vmatprep.subr.bf16.mxu1 %v2109_v25 }
  0x4e   : > { %1058 = vmatmul.mubr.bf16.gmra.mrb[4].mxu0 %v2100_v26  ;;  %1250 = vmatmul.mubr.bf16.gmra.mrb[4].mxu1 %v2101_v27  ;;  %v2187_v26 = vld [vmem:[%s2291_s28 + $0x188] ss:$12 sps:$4 sm:$0xff]   ;;  %v2188_v27 = vld [vmem:[%s2291_s28 + $0x180] ss:$12 sps:$4 sm:$0xff]  }
  0x4f   : > { %1065 = vmatprep.mubr.bf16.mxu0 %v2103_v28  ;;  %1257 = vmatprep.mubr.bf16.mxu1 %v2105_v29  ;;  %v2189_v28 = vld [vmem:[%s2291_s28 + $0x1a0] ss:$12 sps:$4 sm:$0xff]   ;;  %v2190_v29 = vld [vmem:[%s2291_s28 + $0x19c] ss:$12 sps:$4 sm:$0xff]  }
  0x50   : > { %1956 = vmatpush3.bf16.msra.mxu1 %v2109_v25  ;;  %v2185_v25 = vld [vmem:[%s2291_s28 + $0x184] ss:$12 sps:$4 sm:$0xff]  }
  0x51   : > { %1957 = vmatprep.subr.bf16.mxu1 %v2116_v30 }
  0x54   : > { %1958 = vmatpush3.bf16.msra.mxu1 %v2116_v30  ;;  %v2192_v30 = vld [vmem:[%s2291_s28 + $0x1b8] ss:$12 sps:$4 sm:$0xff]  }
  0x55   : > { %1959 = vmatprep.subr.bf16.mxu1 %v2123_v32 }
  0x56   : > { %1066 = vmatmul.mubr.bf16.gmra.mrb[8].mxu0 %v2107_v31  ;;  %1258 = vmatmul.mubr.bf16.gmra.mrb[8].mxu1 %v2108_v33  ;;  %v2193_v31 = vld [vmem:[%s2291_s28 + $0x198] ss:$12 sps:$4 sm:$0xff]   ;;  %v2195_v33 = vld [vmem:[%s2291_s28 + $0x1b4] ss:$12 sps:$4 sm:$0xff]  }
  0x57   : > { %1073 = vmatprep.mubr.bf16.mxu0 %v2110_v34  ;;  %1265 = vmatprep.mubr.bf16.mxu1 %v2112_v35  ;;  %v2197_v34 = vld [vmem:[%s2291_s28 + $0x1e8] ss:$12 sps:$4 sm:$0xff]   ;;  %v2198_v35 = vld [vmem:[%s2291_s28 + $0x1b0] ss:$12 sps:$4 sm:$0xff]  }
  0x58   : > { %1960 = vmatpush3.bf16.msra.mxu1 %v2123_v32  ;;  %v2194_v32 = vld [vmem:[%s2291_s28 + $0x1d0] ss:$12 sps:$4 sm:$0xff]  }
  0x59   : > { %1961 = vmatprep.subr.bf16.mxu1 %v2130_v36 }
  0x5c   : > { %1962 = vmatpush3.bf16.msra.mxu1 %v2130_v36  ;;  %v2199_v36 = vld [vmem:[%s2291_s28 + $0x200] ss:$12 sps:$4 sm:$0xff]  }
  0x5d   : > { %1963 = vmatprep.subr.bf16.mxu1 %v2137_v41 }
  0x5e   : > { %1074 = vmatmul.mubr.bf16.gmra.mrb[12].mxu0 %v2114_v37  ;;  %1266 = vmatmul.mubr.bf16.gmra.mrb[12].mxu1 %v2115_v38  ;;  %v2200_v37 = vld [vmem:[%s2291_s28 + $0x1cc] ss:$12 sps:$4 sm:$0xff]  }
  0x5f   : > { %1081 = vmatprep.mubr.bf16.mxu0 %v2117_v39  ;;  %1273 = vmatprep.mubr.bf16.mxu1 %v2119_v40  ;;  %v2202_v38 = vld [vmem:[%s2291_s28 + $0x218] ss:$12 sps:$4 sm:$0xff]   ;;  %v2203_v39 = vld [vmem:[%s2291_s28 + $0x1c8] ss:$12 sps:$4 sm:$0xff]   ;;  %v2204_v40 = vld [vmem:[%s2291_s28 + $0x230] ss:$12 sps:$4 sm:$0xff]  }
  0x60   : > { %1964 = vmatpush3.bf16.msra.mxu1 %v2137_v41  ;;  %v2205_v41 = vld [vmem:[%s2291_s28 + $0x1e4] ss:$12 sps:$4 sm:$0xff]  }
  0x61   : > { %1965 = vmatprep.subr.bf16.mxu1 %v2144_v42 }
  0x64   : > { %1966 = vmatpush3.bf16.msra.mxu1 %v2144_v42  ;;  %v2207_v42 = vld [vmem:[%s2291_s28 + $0x248] ss:$12 sps:$4 sm:$0xff]  }
  0x66   : > { %1082 = vmatmul.mubr.bf16.gmra.mrb[16].mxu0 %v2121_v43  ;;  %1274 = vmatmul.mubr.bf16.gmra.mrb[16].mxu1 %v2122_v44  ;;  %v2208_v43 = vld [vmem:[%s2291_s28 + $0x1e0] ss:$12 sps:$4 sm:$0xff]  }
  0x67   : > { %1089 = vmatprep.mubr.bf16.mxu0 %v2124_v45  ;;  %1281 = vmatprep.mubr.bf16.mxu1 %v2126_v46  ;;  %v2209_v44 = vld [vmem:[%s2291_s28 + $0x260] ss:$12 sps:$4 sm:$0xff]   ;;  %v2210_v45 = vld [vmem:[%s2291_s28 + $0x1fc] ss:$12 sps:$4 sm:$0xff]   ;;  %v2212_v46 = vld [vmem:[%s2291_s28 + $0x278] ss:$12 sps:$4 sm:$0xff]  }
  0x6e   : > { %1090 = vmatmul.mubr.bf16.gmra.mrb[20].mxu0 %v2128_v47  ;;  %1282 = vmatmul.mubr.bf16.gmra.mrb[20].mxu1 %v2129_v48  ;;  %v2213_v47 = vld [vmem:[%s2291_s28 + $0x1f8] ss:$12 sps:$4 sm:$0xff]   ;;  %v2214_v48 = vld [vmem:[%s2291_s28 + $0x290] ss:$12 sps:$4 sm:$0xff]  }
  0x6f   : > { %1097 = vmatprep.mubr.bf16.mxu0 %v2131_v49  ;;  %1289 = vmatprep.mubr.bf16.mxu1 %v2133_v50  ;;  %v2215_v49 = vld [vmem:[%s2291_s28 + $0x214] ss:$12 sps:$4 sm:$0xff]  }
  0x70   : > { %v2217_v50 = vld [vmem:[%s2291_s28 + $0x2a8] ss:$12 sps:$4 sm:$0xff]  }
  0x76   : > { %1098 = vmatmul.mubr.bf16.gmra.mrb[24].mxu0 %v2135_v51  ;;  %1290 = vmatmul.mubr.bf16.gmra.mrb[24].mxu1 %v2136_v52  ;;  %v2218_v51 = vld [vmem:[%s2291_s28 + $0x210] ss:$12 sps:$4 sm:$0xff]   ;;  %v2219_v52 = vld [vmem:[%s2291_s28 + $0x2c0] ss:$12 sps:$4 sm:$0xff]  }
  0x77   : > { %1105 = vmatprep.mubr.bf16.mxu0 %v2138_v53  ;;  %1297 = vmatprep.mubr.bf16.mxu1 %v2140_v54  ;;  %v2220_v53 = vld [vmem:[%s2291_s28 + $0x22c] ss:$12 sps:$4 sm:$0xff]  }
  0x78   : > { %v2222_v54 = vld [vmem:[%s2291_s28 + $0x2d8] ss:$12 sps:$4 sm:$0xff]  }
  0x7e   : > { %1106 = vmatmul.mubr.bf16.gmra.mrb[28].mxu0 %v2142_v55  ;;  %1298 = vmatmul.mubr.bf16.gmra.mrb[28].mxu1 %v2143_v56  ;;  %v2223_v55 = vld [vmem:[%s2291_s28 + $0x228] ss:$12 sps:$4 sm:$0xff]   ;;  %v2224_v56 = vld [vmem:[%s2291_s28 + $0x2f0] ss:$12 sps:$4 sm:$0xff]  }
  0x7f   : > { %1113 = vmatprep.mubr.bf16.mxu0 %v2145_v57  ;;  %1967 = vmatprep.mubr.bf16.mxu1 %v2147_v58 }
  0x86   : > { %1114 = vmatmul.mubr.bf16.gmra.mrb[32].mxu0 %v2148_v59  ;;  %1968 = vmatmul.mubr.bf16.vlgmr.msra.gmra.mrb[32].mxu1 %v2149_v60 }
  0x87   : > { %1121 = vmatprep.mubr.bf16.mxu0 %v2150_v61  ;;  %1971 = vmatprep.mubr.bf16.mxu1 %v2152_v62 }
  0x8e   : > { %1122 = vmatmul.mubr.bf16.gmra.mrb[36].mxu0 %v2153_v63  ;;  %1972 = vmatmul.mubr.bf16.gmra.mrb[36].mxu1 %v2154_v0 }
  0x8f   : > { %1129 = vmatprep.mubr.bf16.mxu0 %v2155_v1  ;;  %1975 = vmatprep.mubr.bf16.mxu1 %v2157_v2 }
  0x96   : > { %1130 = vmatmul.mubr.bf16.gmra.mrb[40].mxu0 %v2158_v3  ;;  %1976 = vmatmul.mubr.bf16.gmra.mrb[40].mxu1 %v2159_v4 }
  0x97   : > { %1137 = vmatprep.mubr.bf16.mxu0 %v2160_v5  ;;  %1979 = vmatprep.mubr.bf16.mxu1 %v2162_v6 }
  0x9e   : > { %1138 = vmatmul.mubr.bf16.gmra.mrb[44].mxu0 %v2163_v7  ;;  %1980 = vmatmul.mubr.bf16.gmra.mrb[44].mxu1 %v2164_v8 }
  0x9f   : > { %1145 = vmatprep.mubr.bf16.mxu0 %v2165_v9  ;;  %1983 = vmatprep.mubr.bf16.mxu1 %v2167_v10 }
  0xa6   : > { %1146 = vmatmul.mubr.bf16.gmra.mrb[48].mxu0 %v2168_v11  ;;  %1984 = vmatmul.mubr.bf16.gmra.mrb[48].mxu1 %v2169_v12 }
  0xa7   : > { %1153 = vmatprep.mubr.bf16.mxu0 %v2170_v13  ;;  %1987 = vmatprep.mubr.bf16.mxu1 %v2172_v14 }
  0xae   : > { %1154 = vmatmul.mubr.bf16.gmra.mrb[52].mxu0 %v2173_v15  ;;  %1988 = vmatmul.mubr.bf16.gmra.mrb[52].mxu1 %v2174_v16 }
  0xaf   : > { %1161 = vmatprep.mubr.bf16.mxu0 %v2175_v17  ;;  %1991 = vmatprep.mubr.bf16.mxu1 %v2177_v18 }
  0xb6   : > { %1162 = vmatmul.mubr.bf16.gmra.mrb[56].mxu0 %v2178_v19  ;;  %1992 = vmatmul.mubr.bf16.gmra.mrb[56].mxu1 %v2179_v20 }
  0xb7   : > { %1169 = vmatprep.mubr.bf16.mxu0 %v2180_v21  ;;  %1995 = vmatprep.mubr.bf16.mxu1 %v2182_v22 }
  0xbe   : > { %1170 = vmatmul.mubr.bf16.gmra.mrb[60].mxu0 %v2183_v23  ;;  %1996 = vmatmul.mubr.bf16.gmra.mrb[60].mxu1 %v2184_v24 }
  0xbf   : > { %1177 = vmatprep.mubr.bf16.mxu0 %v2185_v25  ;;  %1999 = vmatprep.mubr.bf16.mxu1 %v2187_v26 }
  0xc6   : > { %1178 = vmatmul.mubr.bf16.gmra.mrb[64].mxu0 %v2188_v27  ;;  %2000 = vmatmul.mubr.bf16.gmra.mrb[64].mxu1 %v2189_v28 }
  0xc7   : > { %1185 = vmatprep.mubr.bf16.mxu0 %v2190_v29  ;;  %2003 = vmatprep.mubr.bf16.mxu1 %v2192_v30 }
  0xce   : > { %1186 = vmatmul.mubr.bf16.gmra.mrb[68].mxu0 %v2193_v31  ;;  %2004 = vmatmul.mubr.bf16.gmra.mrb[68].mxu1 %v2194_v32 }
  0xcf   : > { %1193 = vmatprep.mubr.bf16.mxu0 %v2195_v33  ;;  %2007 = vmatprep.mubr.bf16.mxu1 %v2197_v34 }
  0xd6   : > { %1194 = vmatmul.mubr.bf16.gmra.mrb[72].mxu0 %v2198_v35  ;;  %2008 = vmatmul.mubr.bf16.gmra.mrb[72].mxu1 %v2199_v36 }
  0xd7   : > { %1201 = vmatprep.mubr.bf16.mxu0 %v2200_v37  ;;  %2011 = vmatprep.mubr.bf16.mxu1 %v2202_v38 }
  0xde   : > { %1202 = vmatmul.mubr.bf16.gmra.mrb[76].mxu0 %v2203_v39  ;;  %2012 = vmatmul.mubr.bf16.gmra.mrb[76].mxu1 %v2204_v40 }
  0xdf   : > { %1209 = vmatprep.mubr.bf16.mxu0 %v2205_v41  ;;  %2015 = vmatprep.mubr.bf16.mxu1 %v2207_v42 }
  0xe6   : > { %1210 = vmatmul.mubr.bf16.gmra.mrb[80].mxu0 %v2208_v43  ;;  %2016 = vmatmul.mubr.bf16.gmra.mrb[80].mxu1 %v2209_v44 }
  0xe7   : > { %1217 = vmatprep.mubr.bf16.mxu0 %v2210_v45  ;;  %2019 = vmatprep.mubr.bf16.mxu1 %v2212_v46 }
  0xee   : > { %1218 = vmatmul.mubr.bf16.gmra.mrb[84].mxu0 %v2213_v47  ;;  %2020 = vmatmul.mubr.bf16.gmra.mrb[84].mxu1 %v2214_v48 }
  0xef   : > { %1225 = vmatprep.mubr.bf16.mxu0 %v2215_v49  ;;  %2023 = vmatprep.mubr.bf16.mxu1 %v2217_v50 }
  0xf6   : > { %1226 = vmatmul.mubr.bf16.gmra.mrb[88].mxu0 %v2218_v51  ;;  %2024 = vmatmul.mubr.bf16.gmra.mrb[88].mxu1 %v2219_v52 }
  0xf7   : > { %1233 = vmatprep.mubr.bf16.mxu0 %v2220_v53  ;;  %2027 = vmatprep.mubr.bf16.mxu1 %v2222_v54 }
  0xfe   : > { %1234 = vmatmul.mubr.bf16.gmra.mrb[92].mxu0 %v2223_v55  ;;  %2028 = vmatmul.mubr.bf16.gmra.mrb[92].mxu1 %v2224_v56 }
 0x119   : > { %v2470_v57 = vpop.f32.mrb[0].mxu0  ;;  %v2472_v58 = vpop.f32.mrb[0].mxu1 }
 0x11a   : > { %v1053_v59 = vpop.f32.mrb[1].mxu0  ;;  %v1245_v60 = vpop.f32.mrb[1].mxu1 }
 0x11b   : > { %v2474_v61 = vpop.f32.mrb[2].mxu0  ;;  %v2476_v62 = vpop.f32.mrb[2].mxu1  ;;  %v2533_v59 = vld [vmem:[%s2740_s2] ss:$0 sm:$0xff] }
 0x11c   : > { %v1056_v63 = vpop.f32.mrb[3].mxu0  ;;  %v1248_v0 = vpop.f32.mrb[3].mxu1 }
 0x11d   : > { %v1052_v63 = vadd.f32 %v2533_v59, %v2470_v57 }
 0x121   : > { %v1059_v1 = vpop.f32.mrb[4].mxu0  ;;  %v2478_v2 = vpop.f32.mrb[4].mxu1 }
 0x122   : > { %v1061_v3 = vpop.f32.mrb[5].mxu0  ;;  %v1253_v4 = vpop.f32.mrb[5].mxu1  ;;  %v1060_v60 = vadd.f32 %v2533_v59, %v1059_v1 }
 0x123   : > { %v1062_v5 = vpop.f32.mrb[6].mxu0  ;;  %v2480_v6 = vpop.f32.mrb[6].mxu1 }
 0x124   : > { %v1064_v7 = vpop.f32.mrb[7].mxu0  ;;  %v1256_v8 = vpop.f32.mrb[7].mxu1  ;;  %v1063_v4 = vadd.f32 %v2533_v59, %v1062_v5 }
 0x129   : > { %v2482_v9 = vpop.f32.mrb[8].mxu0  ;;  %v2484_v10 = vpop.f32.mrb[8].mxu1 }
 0x12a   : > { %v1069_v11 = vpop.f32.mrb[9].mxu0  ;;  %v1261_v12 = vpop.f32.mrb[9].mxu1 }
 0x12b   : > { %v2486_v13 = vpop.f32.mrb[10].mxu0  ;;  %v2488_v14 = vpop.f32.mrb[10].mxu1  ;;  %v1055_v12 = vadd.f32 %v2533_v59, %v2474_v61 }
 0x12c   : > { %v1072_v15 = vpop.f32.mrb[11].mxu0  ;;  %v1264_v16 = vpop.f32.mrb[11].mxu1 }
 0x131   : > { %v2490_v17 = vpop.f32.mrb[12].mxu0  ;;  %v2492_v18 = vpop.f32.mrb[12].mxu1 }
 0x132   : > { %v1077_v19 = vpop.f32.mrb[13].mxu0  ;;  %v1269_v20 = vpop.f32.mrb[13].mxu1 }
 0x133   : > { %v2494_v21 = vpop.f32.mrb[14].mxu0  ;;  %v2496_v22 = vpop.f32.mrb[14].mxu1 }
 0x134   : > { %v1080_v23 = vpop.f32.mrb[15].mxu0  ;;  %v1272_v24 = vpop.f32.mrb[15].mxu1 }
 0x139   : > { %v2498_v25 = vpop.f32.mrb[16].mxu0  ;;  %v2500_v26 = vpop.f32.mrb[16].mxu1 }
 0x13a   : > { %v1085_v27 = vpop.f32.mrb[17].mxu0  ;;  %v1277_v28 = vpop.f32.mrb[17].mxu1 }
 0x13b   : > { %v2502_v29 = vpop.f32.mrb[18].mxu0  ;;  %v2504_v30 = vpop.f32.mrb[18].mxu1  ;;  %v1076_v28 = vadd.f32 %v2533_v59, %v2490_v17  ;;  %v1071_v17 = vadd.f32 %v2533_v59, %v2486_v13  ;;  %v1084_v13 = vadd.f32 %v2533_v59, %v2498_v25 }
 0x13c   : > { %v1088_v31 = vpop.f32.mrb[19].mxu0  ;;  %v1280_v32 = vpop.f32.mrb[19].mxu1 }
 0x13d   : > { %v1068_v31 = vadd.f32 %v2533_v59, %v2482_v9 }
 0x141   : > { %v2506_v33 = vpop.f32.mrb[20].mxu0  ;;  %v2508_v34 = vpop.f32.mrb[20].mxu1 }
 0x142   : > { %v1093_v35 = vpop.f32.mrb[21].mxu0  ;;  %v1285_v36 = vpop.f32.mrb[21].mxu1 }
 0x143   : > { %v2510_v37 = vpop.f32.mrb[22].mxu0  ;;  %v2512_v38 = vpop.f32.mrb[22].mxu1  ;;  %v1079_v36 = vadd.f32 %v2533_v59, %v2494_v21 }
 0x144   : > { %v1096_v39 = vpop.f32.mrb[23].mxu0  ;;  %v1288_v40 = vpop.f32.mrb[23].mxu1 }
 0x149   : > { %v2514_v41 = vpop.f32.mrb[24].mxu0  ;;  %v2516_v42 = vpop.f32.mrb[24].mxu1 }
 0x14a   : > { %v1101_v43 = vpop.f32.mrb[25].mxu0  ;;  %v1293_v44 = vpop.f32.mrb[25].mxu1 }
 0x14b   : > { %v2518_v45 = vpop.f32.mrb[26].mxu0  ;;  %v2520_v46 = vpop.f32.mrb[26].mxu1 }
 0x14c   : > { %v1104_v47 = vpop.f32.mrb[27].mxu0  ;;  %v1296_v48 = vpop.f32.mrb[27].mxu1 }
 0x151   : > { %v2522_v49 = vpop.f32.mrb[28].mxu0  ;;  %v2524_v50 = vpop.f32.mrb[28].mxu1 }
 0x152   : > { %v1109_v51 = vpop.f32.mrb[29].mxu0  ;;  %v1301_v52 = vpop.f32.mrb[29].mxu1 }
 0x153   : > { %v2526_v53 = vpop.f32.mrb[30].mxu0  ;;  %v2528_v54 = vpop.f32.mrb[30].mxu1 }
 0x154   : > { %v1112_v55 = vpop.f32.mrb[31].mxu0  ;;  %v1304_v56 = vpop.f32.mrb[31].mxu1 }
 0x159   : > { %v2539_v0 = vpop.f32.mrb[32].mxu0  ;;  %v1969_v3 = vpop.f32.mrb[32].mxu1 }
 0x15a   : > { %v1349_v7 = vadd.f32 %v1969_v3, %v1060_v60  ;;  %v1117_v8 = vpop.f32.mrb[33].mxu0  ;;  %v1340_v11 = vpop.f32.mrb[33].mxu1  ;;  %v1092_v3 = vadd.f32 %v2533_v59, %v2506_v33  ;;  %v1087_v33 = vadd.f32 %v2533_v59, %v2502_v29  ;;  %v1100_v29 = vadd.f32 %v2533_v59, %v2514_v41 }
 0x15b   : > { %v1341_v57 = vadd.f32 %v1340_v11, %v1052_v63  ;;  %v2549_v1 = vpop.f32.mrb[34].mxu0  ;;  %v1970_v15 = vpop.f32.mrb[34].mxu1  ;;  %v1095_v8 = vadd.f32 %v2533_v59, %v2510_v37 }
 0x15c   : > { %v1597_v5 = vmax.f32 %v1349_v7, 0.0  ;;  %v1352_v16 = vadd.f32 %v1970_v15, %v1063_v4  ;;  %v1120_v19 = vpop.f32.mrb[35].mxu0  ;;  %v1343_v20 = vpop.f32.mrb[35].mxu1 }
 0x15d   : > { %v1595_v23 = vmax.f32 %v1341_v57, 0.0  ;;  %v1344_v24 = vadd.f32 %v1343_v20, %v1055_v12 }
 0x15e   : > { %1661 = vst [vmem:[%s2547_s22 + $0x10] sm:$0xff] %v1597_v5  ;;  %v1598_v61 = vmax.f32 %v1352_v16, 0.0 }
 0x15f   : > { %1659 = vst [vmem:[%s2547_s22] sm:$0xff] %v1595_v23  ;;  %v1596_v27 = vmax.f32 %v1344_v24, 0.0 }
 0x160   : > { %1662 = vst [vmem:[%s2547_s22 + $0x18] sm:$0xff] %v1598_v61 }
 0x161   : > { %1660 = vst [vmem:[%s2547_s22 + $0x8] sm:$0xff] %v1596_v27  ;;  %v2559_v32 = vpop.f32.mrb[36].mxu0  ;;  %v1973_v35 = vpop.f32.mrb[36].mxu1 }
 0x162   : > { %v1365_v39 = vadd.f32 %v1973_v35, %v1076_v28  ;;  %v1125_v40 = vpop.f32.mrb[37].mxu0  ;;  %v1356_v43 = vpop.f32.mrb[37].mxu1  ;;  %v1108_v28 = vadd.f32 %v2533_v59, %v2522_v49 }
 0x163   : > { %v1357_v44 = vadd.f32 %v1356_v43, %v1068_v31  ;;  %v2565_v47 = vpop.f32.mrb[38].mxu0  ;;  %v1974_v9 = vpop.f32.mrb[38].mxu1 }
 0x164   : > { %v1601_v48 = vmax.f32 %v1365_v39, 0.0  ;;  %v1368_v51 = vadd.f32 %v1974_v9, %v1079_v36  ;;  %v1128_v52 = vpop.f32.mrb[39].mxu0  ;;  %v1359_v55 = vpop.f32.mrb[39].mxu1  ;;  %v1111_v36 = vadd.f32 %v2533_v59, %v2526_v53 }
 0x165   : > { %v1599_v56 = vmax.f32 %v1357_v44, 0.0  ;;  %v1360_v60 = vadd.f32 %v1359_v55, %v1071_v17  ;;  %v1103_v17 = vadd.f32 %v2533_v59, %v2518_v45  ;;  %v1116_v45 = vadd.f32 %v2533_v59, %v2539_v0 }
 0x166   : > { %1665 = vst [vmem:[%s2547_s22 + $0x30] sm:$0xff] %v1601_v48  ;;  %v1602_v21 = vmax.f32 %v1368_v51, 0.0 }
 0x167   : > { %1663 = vst [vmem:[%s2547_s22 + $0x20] sm:$0xff] %v1599_v56  ;;  %v1600_v63 = vmax.f32 %v1360_v60, 0.0 }
 0x168   : > { %1666 = vst [vmem:[%s2547_s22 + $0x38] sm:$0xff] %v1602_v21  ;;  %v1124_v21 = vadd.f32 %v2533_v59, %v2559_v32 }
 0x169   : > { %1664 = vst [vmem:[%s2547_s22 + $0x28] sm:$0xff] %v1600_v63  ;;  %v2575_v4 = vpop.f32.mrb[40].mxu0  ;;  %v1977_v7 = vpop.f32.mrb[40].mxu1 }
 0x16a   : > { %v1381_v11 = vadd.f32 %v1977_v7, %v1092_v3  ;;  %v1133_v12 = vpop.f32.mrb[41].mxu0  ;;  %v1372_v57 = vpop.f32.mrb[41].mxu1 }
 0x16b   : > { %v1373_v15 = vadd.f32 %v1372_v57, %v1084_v13  ;;  %v2581_v5 = vpop.f32.mrb[42].mxu0  ;;  %v1978_v25 = vpop.f32.mrb[42].mxu1  ;;  %v1127_v13 = vadd.f32 %v2533_v59, %v2565_v47  ;;  %v1119_v12 = vadd.f32 %v2533_v59, %v2549_v1  ;;  %v1132_v1 = vadd.f32 %v2533_v59, %v2575_v4 }
 0x16c   : > { %v1605_v16 = vmax.f32 %v1381_v11, 0.0  ;;  %v1384_v19 = vadd.f32 %v1978_v25, %v1095_v8  ;;  %v1136_v20 = vpop.f32.mrb[43].mxu0  ;;  %v1375_v23 = vpop.f32.mrb[43].mxu1 }
 0x16d   : > { %v1603_v24 = vmax.f32 %v1373_v15, 0.0  ;;  %v1376_v61 = vadd.f32 %v1375_v23, %v1087_v33 }
 0x16e   : > { %1669 = vst [vmem:[%s2547_s22 + $0x50] sm:$0xff] %v1605_v16  ;;  %v1606_v37 = vmax.f32 %v1384_v19, 0.0 }
 0x16f   : > { %1667 = vst [vmem:[%s2547_s22 + $0x40] sm:$0xff] %v1603_v24  ;;  %v1604_v27 = vmax.f32 %v1376_v61, 0.0 }
 0x170   : > { %1670 = vst [vmem:[%s2547_s22 + $0x58] sm:$0xff] %v1606_v37 }
 0x171   : > { %1668 = vst [vmem:[%s2547_s22 + $0x48] sm:$0xff] %v1604_v27  ;;  %v1139_v31 = vpop.f32.mrb[44].mxu0  ;;  %v1981_v35 = vpop.f32.mrb[44].mxu1 }
 0x172   : > { %v1397_v39 = vadd.f32 %v1981_v35, %v1108_v28  ;;  %v1141_v40 = vpop.f32.mrb[45].mxu0  ;;  %v1388_v43 = vpop.f32.mrb[45].mxu1  ;;  %v1140_v24 = vadd.f32 %v2533_v59, %v1139_v31 }
 0x173   : > { %v1389_v49 = vadd.f32 %v1388_v43, %v1100_v29  ;;  %v1142_v44 = vpop.f32.mrb[46].mxu0  ;;  %v1982_v9 = vpop.f32.mrb[46].mxu1 }
 0x174   : > { %v1609_v41 = vmax.f32 %v1397_v39, 0.0  ;;  %v1400_v48 = vadd.f32 %v1982_v9, %v1111_v36  ;;  %v1144_v51 = vpop.f32.mrb[47].mxu0  ;;  %v1391_v52 = vpop.f32.mrb[47].mxu1  ;;  %v1143_v27 = vadd.f32 %v2533_v59, %v1142_v44  ;;  %v1135_v36 = vadd.f32 %v2533_v59, %v2581_v5 }
 0x175   : > { %v1607_v55 = vmax.f32 %v1389_v49, 0.0  ;;  %v1392_v56 = vadd.f32 %v1391_v52, %v1103_v17 }
 0x176   : > { %1673 = vst [vmem:[%s2547_s22 + $0x70] sm:$0xff] %v1609_v41  ;;  %v1610_v53 = vmax.f32 %v1400_v48, 0.0 }
 0x177   : > { %1671 = vst [vmem:[%s2547_s22 + $0x60] sm:$0xff] %v1607_v55  ;;  %v1608_v60 = vmax.f32 %v1392_v56, 0.0 }
 0x178   : > { %1674 = vst [vmem:[%s2547_s22 + $0x78] sm:$0xff] %v1610_v53 }
 0x179   : > { %1672 = vst [vmem:[%s2547_s22 + $0x68] sm:$0xff] %v1608_v60  ;;  %v1147_v63 = vpop.f32.mrb[48].mxu0  ;;  %v1985_v3 = vpop.f32.mrb[48].mxu1 }
 0x17a   : > { %v1413_v7 = vadd.f32 %v1985_v3, %v1124_v21  ;;  %v1149_v8 = vpop.f32.mrb[49].mxu0  ;;  %v1404_v11 = vpop.f32.mrb[49].mxu1  ;;  %v1148_v52 = vadd.f32 %v2533_v59, %v1147_v63 }
 0x17b   : > { %v1405_v32 = vadd.f32 %v1404_v11, %v1116_v45  ;;  %v1150_v57 = vpop.f32.mrb[50].mxu0  ;;  %v1986_v33 = vpop.f32.mrb[50].mxu1 }
 0x17c   : > { %v1613_v0 = vmax.f32 %v1413_v7, 0.0  ;;  %v1416_v15 = vadd.f32 %v1986_v33, %v1127_v13  ;;  %v1152_v25 = vpop.f32.mrb[51].mxu0  ;;  %v1407_v16 = vpop.f32.mrb[51].mxu1  ;;  %v1151_v45 = vadd.f32 %v2533_v59, %v1150_v57 }
 0x17d   : > { %v1611_v19 = vmax.f32 %v1405_v32, 0.0  ;;  %v1408_v20 = vadd.f32 %v1407_v16, %v1119_v12 }
 0x17e   : > { %1677 = vst [vmem:[%s2547_s22 + $0x90] sm:$0xff] %v1613_v0  ;;  %v1614_v47 = vmax.f32 %v1416_v15, 0.0 }
 0x17f   : > { %1675 = vst [vmem:[%s2547_s22 + $0x80] sm:$0xff] %v1611_v19  ;;  %v1612_v23 = vmax.f32 %v1408_v20, 0.0 }
 0x180   : > { %1678 = vst [vmem:[%s2547_s22 + $0x98] sm:$0xff] %v1614_v47 }
 0x181   : > { %1676 = vst [vmem:[%s2547_s22 + $0x88] sm:$0xff] %v1612_v23  ;;  %v1155_v61 = vpop.f32.mrb[52].mxu0  ;;  %v1989_v37 = vpop.f32.mrb[52].mxu1 }
 0x182   : > { %v1429_v28 = vadd.f32 %v1989_v37, %v1140_v24  ;;  %v1157_v29 = vpop.f32.mrb[53].mxu0  ;;  %v1420_v35 = vpop.f32.mrb[53].mxu1  ;;  %v1156_v51 = vadd.f32 %v2533_v59, %v1155_v61 }
 0x183   : > { %v1421_v39 = vadd.f32 %v1420_v35, %v1132_v1  ;;  %v1158_v31 = vpop.f32.mrb[54].mxu0  ;;  %v1990_v40 = vpop.f32.mrb[54].mxu1 }
 0x184   : > { %v1617_v43 = vmax.f32 %v1429_v28, 0.0  ;;  %v1432_v4 = vadd.f32 %v1990_v40, %v1143_v27  ;;  %v1160_v17 = vpop.f32.mrb[55].mxu0  ;;  %v1423_v49 = vpop.f32.mrb[55].mxu1  ;;  %v1159_v56 = vadd.f32 %v2533_v59, %v1158_v31 }
 0x185   : > { %v1615_v9 = vmax.f32 %v1421_v39, 0.0  ;;  %v1424_v41 = vadd.f32 %v1423_v49, %v1135_v36 }
 0x186   : > { %1681 = vst [vmem:[%s2547_s22 + $0xb0] sm:$0xff] %v1617_v43  ;;  %v1618_v44 = vmax.f32 %v1432_v4, 0.0 }
 0x187   : > { %1679 = vst [vmem:[%s2547_s22 + $0xa0] sm:$0xff] %v1615_v9  ;;  %v1616_v48 = vmax.f32 %v1424_v41, 0.0 }
 0x188   : > { %1682 = vst [vmem:[%s2547_s22 + $0xb8] sm:$0xff] %v1618_v44 }
 0x189   : > { %1680 = vst [vmem:[%s2547_s22 + $0xa8] sm:$0xff] %v1616_v48  ;;  %v1163_v5 = vpop.f32.mrb[56].mxu0  ;;  %v1993_v55 = vpop.f32.mrb[56].mxu1 }
 0x18a   : > { %v1445_v53 = vadd.f32 %v1993_v55, %v1156_v51  ;;  %v1165_v60 = vpop.f32.mrb[57].mxu0  ;;  %v1436_v21 = vpop.f32.mrb[57].mxu1  ;;  %v1164_v25 = vadd.f32 %v2533_v59, %v1163_v5 }
 0x18b   : > { %v1437_v3 = vadd.f32 %v1436_v21, %v1148_v52  ;;  %v1166_v13 = vpop.f32.mrb[58].mxu0  ;;  %v1994_v7 = vpop.f32.mrb[58].mxu1 }
 0x18c   : > { %v1621_v8 = vmax.f32 %v1445_v53, 0.0  ;;  %v1448_v11 = vadd.f32 %v1994_v7, %v1159_v56  ;;  %v1168_v63 = vpop.f32.mrb[59].mxu0  ;;  %v1439_v12 = vpop.f32.mrb[59].mxu1  ;;  %v1167_v23 = vadd.f32 %v2533_v59, %v1166_v13 }
 0x18d   : > { %v1619_v32 = vmax.f32 %v1437_v3, 0.0  ;;  %v1440_v33 = vadd.f32 %v1439_v12, %v1151_v45 }
 0x18e   : > { %1685 = vst [vmem:[%s2547_s22 + $0xd0] sm:$0xff] %v1621_v8  ;;  %v1622_v0 = vmax.f32 %v1448_v11, 0.0 }
 0x18f   : > { %1683 = vst [vmem:[%s2547_s22 + $0xc0] sm:$0xff] %v1619_v32  ;;  %v1620_v15 = vmax.f32 %v1440_v33, 0.0 }
 0x190   : > { %1686 = vst [vmem:[%s2547_s22 + $0xd8] sm:$0xff] %v1622_v0 }
 0x191   : > { %1684 = vst [vmem:[%s2547_s22 + $0xc8] sm:$0xff] %v1620_v15  ;;  %v1171_v16 = vpop.f32.mrb[60].mxu0  ;;  %v1997_v57 = vpop.f32.mrb[60].mxu1 }
 0x192   : > { %v1172_v19 = vadd.f32 %v2533_v59, %v1171_v16  ;;  %v1173_v20 = vpop.f32.mrb[61].mxu0  ;;  %v1452_v47 = vpop.f32.mrb[61].mxu1 }
 0x193   : > { %v1453_v24 = vadd.f32 %v1452_v47, %v1164_v25  ;;  %v1174_v1 = vpop.f32.mrb[62].mxu0  ;;  %v1998_v61 = vpop.f32.mrb[62].mxu1 }
 0x194   : > { %v1461_v37 = vadd.f32 %v1997_v57, %v1172_v19  ;;  %v1175_v27 = vadd.f32 %v2533_v59, %v1174_v1  ;;  %v1176_v28 = vpop.f32.mrb[63].mxu0  ;;  %v1455_v29 = vpop.f32.mrb[63].mxu1 }
 0x195   : > { %v1623_v35 = vmax.f32 %v1453_v24, 0.0  ;;  %v1456_v36 = vadd.f32 %v1455_v29, %v1167_v23 }
 0x196   : > { %v1625_v39 = vmax.f32 %v1461_v37, 0.0  ;;  %v1464_v31 = vadd.f32 %v1998_v61, %v1175_v27 }
 0x197   : > { %1687 = vst [vmem:[%s2547_s22 + $0xe0] sm:$0xff] %v1623_v35  ;;  %v1624_v40 = vmax.f32 %v1456_v36, 0.0 }
 0x198   : > { %1689 = vst [vmem:[%s2547_s22 + $0xf0] sm:$0xff] %v1625_v39  ;;  %v1626_v43 = vmax.f32 %v1464_v31, 0.0 }
 0x199   : > { %1688 = vst [vmem:[%s2547_s22 + $0xe8] sm:$0xff] %v1624_v40  ;;  %v1179_v4 = vpop.f32.mrb[64].mxu0  ;;  %v2001_v17 = vpop.f32.mrb[64].mxu1 }
 0x19a   : > { %1690 = vst [vmem:[%s2547_s22 + $0xf8] sm:$0xff] %v1626_v43  ;;  %v1180_v49 = vadd.f32 %v2533_v59, %v1179_v4  ;;  %v1181_v9 = vpop.f32.mrb[65].mxu0  ;;  %v1468_v41 = vpop.f32.mrb[65].mxu1 }
 0x19b   : > { %v1182_v44 = vpop.f32.mrb[66].mxu0  ;;  %v2002_v48 = vpop.f32.mrb[66].mxu1 }
 0x19c   : > { %v1469_v51 = vadd.f32 %v1468_v41, %v1180_v49  ;;  %v1183_v52 = vadd.f32 %v2533_v59, %v1182_v44  ;;  %v1184_v5 = vpop.f32.mrb[67].mxu0  ;;  %v1471_v55 = vpop.f32.mrb[67].mxu1 }
 0x19e   : > { %v1627_v56 = vmax.f32 %v1469_v51, 0.0  ;;  %v1472_v53 = vadd.f32 %v1471_v55, %v1183_v52  ;;  %v1252_v52 = vadd.f32 %v2533_v59, %v2478_v2  ;;  %v1244_v55 = vadd.f32 %v2533_v59, %v2472_v58 }
 0x19f   : > { %v1247_v2 = vadd.f32 %v2533_v59, %v2476_v62 }
 0x1a0   : > { %1691 = vst [vmem:[%s2547_s22 + $0x100] sm:$0xff] %v1627_v56  ;;  %v1628_v60 = vmax.f32 %v1472_v53, 0.0 }
 0x1a1   : > { %v1187_v21 = vpop.f32.mrb[68].mxu0  ;;  %v2005_v45 = vpop.f32.mrb[68].mxu1 }
 0x1a2   : > { %1692 = vst [vmem:[%s2547_s22 + $0x108] sm:$0xff] %v1628_v60  ;;  %v1188_v3 = vadd.f32 %v2533_v59, %v1187_v21  ;;  %v1189_v13 = vpop.f32.mrb[69].mxu0  ;;  %v1484_v7 = vpop.f32.mrb[69].mxu1  ;;  %v1255_v60 = vadd.f32 %v2533_v59, %v2480_v6 }
 0x1a3   : > { %v1190_v8 = vpop.f32.mrb[70].mxu0  ;;  %v2006_v11 = vpop.f32.mrb[70].mxu1 }
 0x1a4   : > { %v1477_v63 = vadd.f32 %v2001_v17, %v1188_v3  ;;  %v1191_v12 = vadd.f32 %v2533_v59, %v1190_v8  ;;  %v1192_v32 = vpop.f32.mrb[71].mxu0  ;;  %v1487_v33 = vpop.f32.mrb[71].mxu1 }
 0x1a6   : > { %v1629_v0 = vmax.f32 %v1477_v63, 0.0  ;;  %v1480_v15 = vadd.f32 %v2002_v48, %v1191_v12 }
 0x1a8   : > { %1693 = vst [vmem:[%s2547_s22 + $0x110] sm:$0xff] %v1629_v0  ;;  %v1630_v25 = vmax.f32 %v1480_v15, 0.0 }
 0x1a9   : > { %v1195_v16 = vpop.f32.mrb[72].mxu0  ;;  %v2644_v57 = vpop.f32.mrb[72].mxu1 }
 0x1aa   : > { %1694 = vst [vmem:[%s2547_s22 + $0x118] sm:$0xff] %v1630_v25  ;;  %v1196_v19 = vadd.f32 %v2533_v59, %v1195_v16  ;;  %v1197_v20 = vpop.f32.mrb[73].mxu0  ;;  %v1500_v47 = vpop.f32.mrb[73].mxu1 }
 0x1ab   : > { %v1198_v23 = vpop.f32.mrb[74].mxu0  ;;  %v2648_v24 = vpop.f32.mrb[74].mxu1  ;;  %v1268_v20 = vadd.f32 %v2533_v59, %v2492_v18  ;;  %v1263_v18 = vadd.f32 %v2533_v59, %v2488_v14 }
 0x1ac   : > { %v1485_v1 = vadd.f32 %v1484_v7, %v1196_v19  ;;  %v1199_v61 = vadd.f32 %v2533_v59, %v1198_v23  ;;  %v1200_v37 = vpop.f32.mrb[75].mxu0  ;;  %v1503_v27 = vpop.f32.mrb[75].mxu1  ;;  %v1260_v23 = vadd.f32 %v2533_v59, %v2484_v10 }
 0x1ad   : > { %v1271_v37 = vadd.f32 %v2533_v59, %v2496_v22 }
 0x1ae   : > { %v1631_v28 = vmax.f32 %v1485_v1, 0.0  ;;  %v1488_v29 = vadd.f32 %v1487_v33, %v1199_v61 }
 0x1b0   : > { %1695 = vst [vmem:[%s2547_s22 + $0x120] sm:$0xff] %v1631_v28  ;;  %v1632_v35 = vmax.f32 %v1488_v29, 0.0 }
 0x1b1   : > { %v1203_v36 = vpop.f32.mrb[76].mxu0  ;;  %v2652_v39 = vpop.f32.mrb[76].mxu1 }
 0x1b2   : > { %1696 = vst [vmem:[%s2547_s22 + $0x128] sm:$0xff] %v1632_v35  ;;  %v1204_v31 = vadd.f32 %v2533_v59, %v1203_v36  ;;  %v1205_v40 = vpop.f32.mrb[77].mxu0  ;;  %v2656_v43 = vpop.f32.mrb[77].mxu1 }
 0x1b3   : > { %v1206_v4 = vpop.f32.mrb[78].mxu0  ;;  %v2658_v17 = vpop.f32.mrb[78].mxu1 }
 0x1b4   : > { %v1493_v49 = vadd.f32 %v2005_v45, %v1204_v31  ;;  %v1207_v9 = vadd.f32 %v2533_v59, %v1206_v4  ;;  %v1208_v41 = vpop.f32.mrb[79].mxu0  ;;  %v2661_v44 = vpop.f32.mrb[79].mxu1 }
 0x1b6   : > { %v1633_v48 = vmax.f32 %v1493_v49, 0.0  ;;  %v1496_v51 = vadd.f32 %v2006_v11, %v1207_v9 }
 0x1b8   : > { %1697 = vst [vmem:[%s2547_s22 + $0x130] sm:$0xff] %v1633_v48  ;;  %v1634_v5 = vmax.f32 %v1496_v51, 0.0 }
 0x1b9   : > { %v1211_v56 = vpop.f32.mrb[80].mxu0  ;;  %v2017_v53 = vpop.f32.mrb[80].mxu1 }
 0x1ba   : > { %1698 = vst [vmem:[%s2547_s22 + $0x138] sm:$0xff] %v1634_v5  ;;  %v1212_v21 = vadd.f32 %v2533_v59, %v1211_v56  ;;  %v1541_v45 = vadd.f32 %v2017_v53, %v1252_v52  ;;  %v1213_v3 = vpop.f32.mrb[81].mxu0  ;;  %v1532_v13 = vpop.f32.mrb[81].mxu1  ;;  %v1276_v53 = vadd.f32 %v2533_v59, %v2500_v26 }
 0x1bb   : > { %v1533_v7 = vadd.f32 %v1532_v13, %v1244_v55  ;;  %v1214_v8 = vpop.f32.mrb[82].mxu0  ;;  %v2018_v11 = vpop.f32.mrb[82].mxu1 }
 0x1bc   : > { %v1501_v58 = vadd.f32 %v1500_v47, %v1212_v21  ;;  %v1645_v63 = vmax.f32 %v1541_v45, 0.0  ;;  %v1215_v6 = vadd.f32 %v2533_v59, %v1214_v8  ;;  %v1544_v12 = vadd.f32 %v2018_v11, %v1255_v60  ;;  %v1216_v32 = vpop.f32.mrb[83].mxu0  ;;  %v1535_v33 = vpop.f32.mrb[83].mxu1 }
 0x1bd   : > { %v1643_v0 = vmax.f32 %v1533_v7, 0.0  ;;  %v1536_v15 = vadd.f32 %v1535_v33, %v1247_v2  ;;  %v1287_v45 = vadd.f32 %v2533_v59, %v2512_v38 }
 0x1be   : > { %v1635_v25 = vmax.f32 %v1501_v58, 0.0  ;;  %1709 = vst [vmem:[%s2547_s22 + $0x190] sm:$0xff] %v1645_v63  ;;  %v1504_v62 = vadd.f32 %v1503_v27, %v1215_v6  ;;  %v1646_v16 = vmax.f32 %v1544_v12, 0.0 }
 0x1bf   : > { %1707 = vst [vmem:[%s2547_s22 + $0x180] sm:$0xff] %v1643_v0  ;;  %v1644_v19 = vmax.f32 %v1536_v15, 0.0 }
 0x1c0   : > { %1699 = vst [vmem:[%s2547_s22 + $0x140] sm:$0xff] %v1635_v25  ;;  %v1636_v47 = vmax.f32 %v1504_v62, 0.0  ;;  %1710 = vst [vmem:[%s2547_s22 + $0x198] sm:$0xff] %v1646_v16  ;;  %v1292_v16 = vadd.f32 %v2533_v59, %v2516_v42 }
 0x1c1   : > { %1708 = vst [vmem:[%s2547_s22 + $0x188] sm:$0xff] %v1644_v19  ;;  %v1219_v1 = vpop.f32.mrb[84].mxu0  ;;  %v2021_v61 = vpop.f32.mrb[84].mxu1 }
 0x1c2   : > { %1700 = vst [vmem:[%s2547_s22 + $0x148] sm:$0xff] %v1636_v47  ;;  %v1220_v27 = vadd.f32 %v2533_v59, %v1219_v1  ;;  %v1557_v28 = vadd.f32 %v2021_v61, %v1268_v20  ;;  %v1221_v29 = vpop.f32.mrb[85].mxu0  ;;  %v1548_v35 = vpop.f32.mrb[85].mxu1  ;;  %v1303_v47 = vadd.f32 %v2533_v59, %v2528_v54 }
 0x1c3   : > { %v1549_v36 = vadd.f32 %v1548_v35, %v1260_v23  ;;  %v1222_v31 = vpop.f32.mrb[86].mxu0  ;;  %v2022_v10 = vpop.f32.mrb[86].mxu1 }
 0x1c4   : > { %v1509_v40 = vadd.f32 %v2644_v57, %v1220_v27  ;;  %v1649_v4 = vmax.f32 %v1557_v28, 0.0  ;;  %v1223_v22 = vadd.f32 %v2533_v59, %v1222_v31  ;;  %v1560_v49 = vadd.f32 %v2022_v10, %v1271_v37  ;;  %v1224_v9 = vpop.f32.mrb[87].mxu0  ;;  %v1551_v41 = vpop.f32.mrb[87].mxu1 }
 0x1c5   : > { %v1647_v48 = vmax.f32 %v1549_v36, 0.0  ;;  %v1552_v51 = vadd.f32 %v1551_v41, %v1263_v18  ;;  %v1284_v57 = vadd.f32 %v2533_v59, %v2508_v34  ;;  %v1279_v34 = vadd.f32 %v2533_v59, %v2504_v30 }
 0x1c6   : > { %v1637_v52 = vmax.f32 %v1509_v40, 0.0  ;;  %1713 = vst [vmem:[%s2547_s22 + $0x1b0] sm:$0xff] %v1649_v4  ;;  %v1512_v14 = vadd.f32 %v2648_v24, %v1223_v22  ;;  %v1650_v5 = vmax.f32 %v1560_v49, 0.0 }
 0x1c7   : > { %1711 = vst [vmem:[%s2547_s22 + $0x1a0] sm:$0xff] %v1647_v48  ;;  %v1648_v55 = vmax.f32 %v1552_v51, 0.0 }
 0x1c8   : > { %1701 = vst [vmem:[%s2547_s22 + $0x150] sm:$0xff] %v1637_v52  ;;  %v1638_v56 = vmax.f32 %v1512_v14, 0.0  ;;  %1714 = vst [vmem:[%s2547_s22 + $0x1b8] sm:$0xff] %v1650_v5 }
 0x1c9   : > { %1712 = vst [vmem:[%s2547_s22 + $0x1a8] sm:$0xff] %v1648_v55  ;;  %v1227_v60 = vpop.f32.mrb[88].mxu0  ;;  %v2025_v21 = vpop.f32.mrb[88].mxu1 }
 0x1ca   : > { %1702 = vst [vmem:[%s2547_s22 + $0x158] sm:$0xff] %v1638_v56  ;;  %v1228_v24 = vadd.f32 %v2533_v59, %v1227_v60  ;;  %v1573_v3 = vadd.f32 %v2025_v21, %v1284_v57  ;;  %v1229_v13 = vpop.f32.mrb[89].mxu0  ;;  %v1564_v2 = vpop.f32.mrb[89].mxu1 }
 0x1cb   : > { %v1565_v7 = vadd.f32 %v1564_v2, %v1276_v53  ;;  %v1230_v8 = vpop.f32.mrb[90].mxu0  ;;  %v2026_v26 = vpop.f32.mrb[90].mxu1 }
 0x1cc   : > { %v1517_v11 = vadd.f32 %v2656_v43, %v1228_v24  ;;  %v1653_v58 = vmax.f32 %v1573_v3, 0.0  ;;  %v1231_v38 = vadd.f32 %v2533_v59, %v1230_v8  ;;  %v1576_v63 = vadd.f32 %v2026_v26, %v1287_v45  ;;  %v1232_v6 = vpop.f32.mrb[91].mxu0  ;;  %v1567_v12 = vpop.f32.mrb[91].mxu1 }
 0x1cd   : > { %v1651_v32 = vmax.f32 %v1565_v7, 0.0  ;;  %v1568_v33 = vadd.f32 %v1567_v12, %v1279_v34  ;;  %v1300_v43 = vadd.f32 %v2533_v59, %v2524_v50  ;;  %v1295_v50 = vadd.f32 %v2533_v59, %v2520_v46 }
 0x1ce   : > { %v1639_v0 = vmax.f32 %v1517_v11, 0.0  ;;  %1717 = vst [vmem:[%s2547_s22 + $0x1d0] sm:$0xff] %v1653_v58  ;;  %v1520_v30 = vadd.f32 %v2661_v44, %v1231_v38  ;;  %v1654_v15 = vmax.f32 %v1576_v63, 0.0 }
 0x1cf   : > { %1715 = vst [vmem:[%s2547_s22 + $0x1c0] sm:$0xff] %v1651_v32  ;;  %v1652_v25 = vmax.f32 %v1568_v33, 0.0 }
 0x1d0   : > { %1703 = vst [vmem:[%s2547_s22 + $0x160] sm:$0xff] %v1639_v0  ;;  %v1640_v62 = vmax.f32 %v1520_v30, 0.0  ;;  %1718 = vst [vmem:[%s2547_s22 + $0x1d8] sm:$0xff] %v1654_v15 }
 0x1d1   : > { %1716 = vst [vmem:[%s2547_s22 + $0x1c8] sm:$0xff] %v1652_v25  ;;  %v1235_v19 = vpop.f32.mrb[92].mxu0  ;;  %v2029_v20 = vpop.f32.mrb[92].mxu1 }
 0x1d2   : > { %1704 = vst [vmem:[%s2547_s22 + $0x168] sm:$0xff] %v1640_v62  ;;  %v1236_v44 = vadd.f32 %v2533_v59, %v1235_v19  ;;  %v1589_v23 = vadd.f32 %v2029_v20, %v1300_v43  ;;  %v1237_v1 = vpop.f32.mrb[93].mxu0  ;;  %v1580_v61 = vpop.f32.mrb[93].mxu1 }
 0x1d3   : > { %v1581_v37 = vadd.f32 %v1580_v61, %v1292_v16  ;;  %v1238_v27 = vpop.f32.mrb[94].mxu0  ;;  %v2030_v42 = vpop.f32.mrb[94].mxu1 }
 0x1d4   : > { %v1525_v28 = vadd.f32 %v2652_v39, %v1236_v44  ;;  %v1657_v29 = vmax.f32 %v1589_v23, 0.0  ;;  %v1239_v54 = vadd.f32 %v2533_v59, %v1238_v27  ;;  %v1592_v35 = vadd.f32 %v2030_v42, %v1303_v47  ;;  %v1240_v18 = vpop.f32.mrb[95].mxu0  ;;  %v1583_v36 = vpop.f32.mrb[95].mxu1 }
 0x1d5   : > { %v1655_v31 = vmax.f32 %v1581_v37, 0.0  ;;  %v1584_v10 = vadd.f32 %v1583_v36, %v1295_v50 }
 0x1d6   : > { %v1641_v40 = vmax.f32 %v1525_v28, 0.0  ;;  %1721 = vst [vmem:[%s2547_s22 + $0x1f0] sm:$0xff] %v1657_v29  ;;  %v1528_v46 = vadd.f32 %v2658_v17, %v1239_v54  ;;  %v1658_v4 = vmax.f32 %v1592_v35, 0.0 }
 0x1d7   : > { %1719 = vst [vmem:[%s2547_s22 + $0x1e0] sm:$0xff] %v1655_v31  ;;  %v1656_v22 = vmax.f32 %v1584_v10, 0.0 }
 0x1d8   : > { %1705 = vst [vmem:[%s2547_s22 + $0x170] sm:$0xff] %v1641_v40  ;;  %v1642_v39 = vmax.f32 %v1528_v46, 0.0  ;;  %1722 = vst [vmem:[%s2547_s22 + $0x1f8] sm:$0xff] %v1658_v4 }
 0x1d9   : > { %1720 = vst [vmem:[%s2547_s22 + $0x1e8] sm:$0xff] %v1656_v22 }
 0x1da   : > { %1706 = vst [vmem:[%s2547_s22 + $0x178] sm:$0xff] %v1642_v39 }
 0x1db PF: > { %s13_s12 = sadd.s32 1, %s2231_s12  }
 0x1dc   : > { %p10_p4 = scmp.ge.s32.totalorder %s13_s12, 5  }
 0x1de   :  { %12 = sbr.rel (!%p10_p4) target bundleno = 1 (0x1), region = 62 }

// kernel: forward.7
= control target key start
LH: loop header
LB: loop body
LE: loop exit
PB: predicated region body
PF: predicated region fallthrough
CT: control target
= control target key end

     0   :  { %s1446_s12 = smov 0   ;;  %s1751_s0 = inlined_call_operand.vmem [shape: bf16[1536,256], index: 0, kind: input, shape index: {}]   ;;  %s1752_s1 = inlined_call_operand.vmem [shape: bf16[256,128], index: 1, kind: input, shape index: {}]   ;;  %s1753_s2 = inlined_call_operand.vmem [shape: f32[1,128], index: 2, kind: input, shape index: {}]   ;;  %s1754_s3 = inlined_call_operand.vmem [shape: f32[1536,128], index: 3, kind: output, shape index: {}]  }
   0x1 LB: > { %s1170_s13 = sadd.s32 4294967295, %s1423_s12   ;;  %p1174_p0 = scmp.ge.s32.totalorder %s1423_s12, 1  ;;  %s1423_s12 = sphi %s1446_s12, %s13_s12  }
   0x2   : > { %p139_p1 = scmp.lt.s32.totalorder %s1423_s12, 4 }
   0x4   : > { %p140_p2 = pnand %p1174_p0, %p139_p1 }
   0x5   : > { %v1305_v0 = vld [vmem:[%s1752_s1] sm:$0xff] (!%p140_p2)   ;;  %v1425_v1 = vmov (!%p140_p2), 0   ;;  %s1175_s16 = sshll.u32 (!%p140_p2), %s1170_s13, 6  ;;  %v1306_v2 = vld [vmem:[%s1752_s1 + $0x8] sm:$0xff] (!%p140_p2)   ;;  %v1307_v3 = vld [vmem:[%s1752_s1 + $0x10] sm:$0xff] (!%p140_p2)  }
   0x6   : > { %143 = sbr.rel (%p140_p2) target bundleno = 409 (0x199), region = 32  ;;  %697 = vmatprep.subr.bf16.mxu0 (!%p140_p2), %v1425_v1  ;;  %1264 = vmatprep.subr.bf16.mxu1 (!%p140_p2), %v1425_v1  ;;  %p165_p3 = scmp.lt.s32.totalorder (!%p140_p2), %s1175_s16, 191  ;;  %v1308_v4 = vld [vmem:[%s1752_s1 + $0x18] sm:$0xff] (!%p140_p2)   ;;  %v1309_v5 = vld [vmem:[%s1752_s1 + $0x20] sm:$0xff] (!%p140_p2)   ;;  %v1310_v7 = vld [vmem:[%s1752_s1 + $0x28] sm:$0xff] (!%p140_p2)  }
   0x7   : > { %698 = vmatpush1.bf16.msra.mxu0 (!%p140_p2), %v1305_v0  ;;  %1280 = vmatpush1.bf16.msra.mxu1 (!%p140_p2), %v1305_v0  ;;  %v1311_v9 = vld [vmem:[%s1752_s1 + $0x30] sm:$0xff] (!%p140_p2)   ;;  %v1312_v10 = vld [vmem:[%s1752_s1 + $0x38] sm:$0xff] (!%p140_p2)   ;;  %v1313_v11 = vld [vmem:[%s1752_s1 + $0x40] sm:$0xff] (!%p140_p2)  }
   0x8   : > { %699 = vmatprep.subr.bf16.mxu0 (!%p140_p2), %v1425_v1  ;;  %1265 = vmatprep.subr.bf16.mxu1 (!%p140_p2), %v1425_v1  ;;  %v1314_v12 = vld [vmem:[%s1752_s1 + $0x48] sm:$0xff] (!%p140_p2)   ;;  %v1315_v13 = vld [vmem:[%s1752_s1 + $0x50] sm:$0xff] (!%p140_p2)   ;;  %v1316_v14 = vld [vmem:[%s1752_s1 + $0x58] sm:$0xff] (!%p140_p2)  }
   0x9   : > { %v1317_v15 = vld [vmem:[%s1752_s1 + $0x60] sm:$0xff] (!%p140_p2)   ;;  %v1318_v16 = vld [vmem:[%s1752_s1 + $0x68] sm:$0xff] (!%p140_p2)   ;;  %v1319_v17 = vld [vmem:[%s1752_s1 + $0x70] sm:$0xff] (!%p140_p2)  }
   0xa   : > { %v1320_v18 = vld [vmem:[%s1752_s1 + $0x78] sm:$0xff] (!%p140_p2)  }
   0xb   : > { %700 = vmatpush1.bf16.msra.mxu0 (!%p140_p2), %v1306_v2  ;;  %1281 = vmatpush1.bf16.msra.mxu1 (!%p140_p2), %v1306_v2 }
   0xc   : > { %701 = vmatprep.subr.bf16.mxu0 (!%p140_p2), %v1425_v1  ;;  %1266 = vmatprep.subr.bf16.mxu1 (!%p140_p2), %v1425_v1 }
   0xd   : > { %s1756_s16 = smov (!%p165_p3, %s1175_s16), 191 }
   0xe   : > { %s1263_s23 = sshll.u32 %s1756_s16, 3 }
   0xf   : > { %702 = vmatpush1.bf16.msra.mxu0 %v1307_v3  ;;  %1282 = vmatpush1.bf16.msra.mxu1 %v1307_v3  ;;  %s1485_s28 = scalar_lea.vmem %s1751_s0, %s1263_s23 }
  0x10   : > { %703 = vmatprep.subr.bf16.mxu0 %v1425_v1  ;;  %1267 = vmatprep.subr.bf16.mxu1 %v1425_v1  ;;  %v1323_v6 = vld [vmem:[%s1485_s28 + $0x4] ss:$8 sps:$4 sm:$0xff]   ;;  %v1321_v19 = vld [vmem:[%s1485_s28] ss:$8 sps:$4 sm:$0xff]   ;;  %v1327_v21 = vld [vmem:[%s1485_s28 + $0x14] ss:$8 sps:$4 sm:$0xff]  }
  0x11   : > { %v1326_v8 = vld [vmem:[%s1485_s28 + $0x104] ss:$8 sps:$4 sm:$0xff]   ;;  %729 = vmatprep.mubr.bf16.mxu0 %v1323_v6  ;;  %v1324_v20 = vld [vmem:[%s1485_s28 + $0x100] ss:$8 sps:$4 sm:$0xff]   ;;  %v1329_v22 = vld [vmem:[%s1485_s28 + $0x114] ss:$8 sps:$4 sm:$0xff]  }
  0x12   : > { %857 = vmatprep.mubr.bf16.mxu1 %v1326_v8  ;;  %v1331_v23 = vld [vmem:[%s1485_s28 + $0x10] ss:$8 sps:$4 sm:$0xff]   ;;  %v1333_v25 = vld [vmem:[%s1485_s28 + $0x24] ss:$8 sps:$4 sm:$0xff]   ;;  %v1337_v27 = vld [vmem:[%s1485_s28 + $0x20] ss:$8 sps:$4 sm:$0xff]  }
  0x13   : > { %704 = vmatpush1.bf16.msra.mxu0 %v1308_v4  ;;  %1283 = vmatpush1.bf16.msra.mxu1 %v1308_v4  ;;  %v1332_v24 = vld [vmem:[%s1485_s28 + $0x110] ss:$8 sps:$4 sm:$0xff]   ;;  %v1335_v26 = vld [vmem:[%s1485_s28 + $0x124] ss:$8 sps:$4 sm:$0xff]   ;;  %v1338_v28 = vld [vmem:[%s1485_s28 + $0x120] ss:$8 sps:$4 sm:$0xff]  }
  0x14   : > { %705 = vmatprep.subr.bf16.mxu0 %v1425_v1  ;;  %1268 = vmatprep.subr.bf16.mxu1 %v1425_v1  ;;  %v1339_v29 = vld [vmem:[%s1485_s28 + $0x34] ss:$8 sps:$4 sm:$0xff]   ;;  %v1343_v31 = vld [vmem:[%s1485_s28 + $0x30] ss:$8 sps:$4 sm:$0xff]   ;;  %v1345_v33 = vld [vmem:[%s1485_s28 + $0x44] ss:$8 sps:$4 sm:$0xff]  }
  0x15   : > { %v1341_v30 = vld [vmem:[%s1485_s28 + $0x134] ss:$8 sps:$4 sm:$0xff]   ;;  %v1344_v32 = vld [vmem:[%s1485_s28 + $0x130] ss:$8 sps:$4 sm:$0xff]   ;;  %v1347_v34 = vld [vmem:[%s1485_s28 + $0x144] ss:$8 sps:$4 sm:$0xff]  }
  0x16   : > { %v1349_v35 = vld [vmem:[%s1485_s28 + $0x40] ss:$8 sps:$4 sm:$0xff]   ;;  %v1351_v37 = vld [vmem:[%s1485_s28 + $0x54] ss:$8 sps:$4 sm:$0xff]   ;;  %v1355_v39 = vld [vmem:[%s1485_s28 + $0x50] ss:$8 sps:$4 sm:$0xff]  }
  0x17   : > { %706 = vmatpush1.bf16.msra.mxu0 %v1309_v5  ;;  %1284 = vmatpush1.bf16.msra.mxu1 %v1309_v5  ;;  %v1350_v36 = vld [vmem:[%s1485_s28 + $0x140] ss:$8 sps:$4 sm:$0xff]   ;;  %v1353_v38 = vld [vmem:[%s1485_s28 + $0x154] ss:$8 sps:$4 sm:$0xff]   ;;  %v1356_v40 = vld [vmem:[%s1485_s28 + $0x150] ss:$8 sps:$4 sm:$0xff]  }
  0x18   : > { %707 = vmatprep.subr.bf16.mxu0 %v1425_v1  ;;  %1269 = vmatprep.subr.bf16.mxu1 %v1425_v1  ;;  %v1357_v41 = vld [vmem:[%s1485_s28 + $0x64] ss:$8 sps:$4 sm:$0xff]   ;;  %v1361_v43 = vld [vmem:[%s1485_s28 + $0x60] ss:$8 sps:$4 sm:$0xff]   ;;  %v1363_v45 = vld [vmem:[%s1485_s28 + $0x74] ss:$8 sps:$4 sm:$0xff]  }
  0x19   : > { %v1359_v42 = vld [vmem:[%s1485_s28 + $0x164] ss:$8 sps:$4 sm:$0xff]   ;;  %v1362_v44 = vld [vmem:[%s1485_s28 + $0x160] ss:$8 sps:$4 sm:$0xff]   ;;  %v1365_v46 = vld [vmem:[%s1485_s28 + $0x174] ss:$8 sps:$4 sm:$0xff]  }
  0x1a   : > { %v1367_v47 = vld [vmem:[%s1485_s28 + $0x70] ss:$8 sps:$4 sm:$0xff]   ;;  %v1369_v49 = vld [vmem:[%s1485_s28 + $0x84] ss:$8 sps:$4 sm:$0xff]   ;;  %v1373_v51 = vld [vmem:[%s1485_s28 + $0x80] ss:$8 sps:$4 sm:$0xff]  }
  0x1b   : > { %708 = vmatpush1.bf16.msra.mxu0 %v1310_v7  ;;  %1285 = vmatpush1.bf16.msra.mxu1 %v1310_v7  ;;  %v1368_v48 = vld [vmem:[%s1485_s28 + $0x170] ss:$8 sps:$4 sm:$0xff]   ;;  %v1371_v50 = vld [vmem:[%s1485_s28 + $0x184] ss:$8 sps:$4 sm:$0xff]   ;;  %v1374_v52 = vld [vmem:[%s1485_s28 + $0x180] ss:$8 sps:$4 sm:$0xff]  }
  0x1c   : > { %709 = vmatprep.subr.bf16.mxu0 %v1425_v1  ;;  %1270 = vmatprep.subr.bf16.mxu1 %v1425_v1  ;;  %v1375_v53 = vld [vmem:[%s1485_s28 + $0x94] ss:$8 sps:$4 sm:$0xff]   ;;  %v1379_v55 = vld [vmem:[%s1485_s28 + $0x90] ss:$8 sps:$4 sm:$0xff]   ;;  %v1381_v57 = vld [vmem:[%s1485_s28 + $0xa4] ss:$8 sps:$4 sm:$0xff]  }
  0x1d   : > { %v1377_v54 = vld [vmem:[%s1485_s28 + $0x194] ss:$8 sps:$4 sm:$0xff]   ;;  %v1380_v56 = vld [vmem:[%s1485_s28 + $0x190] ss:$8 sps:$4 sm:$0xff]   ;;  %v1383_v58 = vld [vmem:[%s1485_s28 + $0x1a4] ss:$8 sps:$4 sm:$0xff]  }
  0x1e   : > { %v1385_v59 = vld [vmem:[%s1485_s28 + $0xa0] ss:$8 sps:$4 sm:$0xff]   ;;  %v1387_v61 = vld [vmem:[%s1485_s28 + $0xb4] ss:$8 sps:$4 sm:$0xff]   ;;  %v1391_v63 = vld [vmem:[%s1485_s28 + $0xb0] ss:$8 sps:$4 sm:$0xff]  }
  0x1f   : > { %710 = vmatpush1.bf16.msra.mxu0 %v1311_v9  ;;  %1286 = vmatpush1.bf16.msra.mxu1 %v1311_v9  ;;  %v1386_v60 = vld [vmem:[%s1485_s28 + $0x1a0] ss:$8 sps:$4 sm:$0xff]   ;;  %v1389_v62 = vld [vmem:[%s1485_s28 + $0x1b4] ss:$8 sps:$4 sm:$0xff]   ;;  %v1392_v0 = vld [vmem:[%s1485_s28 + $0x1b0] ss:$8 sps:$4 sm:$0xff]  }
  0x20   : > { %711 = vmatprep.subr.bf16.mxu0 %v1425_v1  ;;  %1271 = vmatprep.subr.bf16.mxu1 %v1425_v1  ;;  %v1395_v2 = vld [vmem:[%s1485_s28 + $0x1c4] ss:$8 sps:$4 sm:$0xff]   ;;  %v1397_v3 = vld [vmem:[%s1485_s28 + $0xc0] ss:$8 sps:$4 sm:$0xff]   ;;  %v1399_v5 = vld [vmem:[%s1485_s28 + $0xd4] ss:$8 sps:$4 sm:$0xff]  }
  0x21   : > { %v1398_v4 = vld [vmem:[%s1485_s28 + $0x1c0] ss:$8 sps:$4 sm:$0xff]   ;;  %v1401_v6 = vld [vmem:[%s1485_s28 + $0x1d4] ss:$8 sps:$4 sm:$0xff]   ;;  %v1403_v7 = vld [vmem:[%s1485_s28 + $0xd0] ss:$8 sps:$4 sm:$0xff]  }
  0x22   : > { %v1404_v8 = vld [vmem:[%s1485_s28 + $0x1d0] ss:$8 sps:$4 sm:$0xff]   ;;  %v1405_v9 = vld [vmem:[%s1485_s28 + $0xe4] ss:$8 sps:$4 sm:$0xff]  }
  0x23   : > { %712 = vmatpush1.bf16.msra.mxu0 %v1312_v10  ;;  %1287 = vmatpush1.bf16.msra.mxu1 %v1312_v10  ;;  %v1407_v10 = vld [vmem:[%s1485_s28 + $0x1e4] ss:$8 sps:$4 sm:$0xff]  }
  0x24   : > { %713 = vmatprep.subr.bf16.mxu0 %v1425_v1  ;;  %1272 = vmatprep.subr.bf16.mxu1 %v1425_v1 }
  0x27   : > { %714 = vmatpush1.bf16.msra.mxu0 %v1313_v11  ;;  %1288 = vmatpush1.bf16.msra.mxu1 %v1313_v11  ;;  %v1409_v11 = vld [vmem:[%s1485_s28 + $0xe0] ss:$8 sps:$4 sm:$0xff]  }
  0x28   : > { %715 = vmatprep.subr.bf16.mxu0 %v1425_v1  ;;  %1273 = vmatprep.subr.bf16.mxu1 %v1425_v1 }
  0x2b   : > { %716 = vmatpush1.bf16.msra.mxu0 %v1314_v12  ;;  %1289 = vmatpush1.bf16.msra.mxu1 %v1314_v12  ;;  %v1410_v12 = vld [vmem:[%s1485_s28 + $0x1e0] ss:$8 sps:$4 sm:$0xff]  }
  0x2c   : > { %717 = vmatprep.subr.bf16.mxu0 %v1425_v1  ;;  %1274 = vmatprep.subr.bf16.mxu1 %v1425_v1 }
  0x2f   : > { %718 = vmatpush1.bf16.msra.mxu0 %v1315_v13  ;;  %1290 = vmatpush1.bf16.msra.mxu1 %v1315_v13  ;;  %v1411_v13 = vld [vmem:[%s1485_s28 + $0xf4] ss:$8 sps:$4 sm:$0xff]  }
  0x30   : > { %719 = vmatprep.subr.bf16.mxu0 %v1425_v1  ;;  %1275 = vmatprep.subr.bf16.mxu1 %v1425_v1 }
  0x33   : > { %720 = vmatpush1.bf16.msra.mxu0 %v1316_v14  ;;  %1291 = vmatpush1.bf16.msra.mxu1 %v1316_v14  ;;  %v1413_v14 = vld [vmem:[%s1485_s28 + $0x1f4] ss:$8 sps:$4 sm:$0xff]  }
  0x34   : > { %721 = vmatprep.subr.bf16.mxu0 %v1425_v1  ;;  %1276 = vmatprep.subr.bf16.mxu1 %v1425_v1 }
  0x37   : > { %722 = vmatpush1.bf16.msra.mxu0 %v1317_v15  ;;  %1292 = vmatpush1.bf16.msra.mxu1 %v1317_v15  ;;  %v1415_v15 = vld [vmem:[%s1485_s28 + $0xf0] ss:$8 sps:$4 sm:$0xff]  }
  0x38   : > { %723 = vmatprep.subr.bf16.mxu0 %v1425_v1  ;;  %1277 = vmatprep.subr.bf16.mxu1 %v1425_v1 }
  0x3b   : > { %724 = vmatpush1.bf16.msra.mxu0 %v1318_v16  ;;  %1293 = vmatpush1.bf16.msra.mxu1 %v1318_v16  ;;  %v1416_v16 = vld [vmem:[%s1485_s28 + $0x1f0] ss:$8 sps:$4 sm:$0xff]  }
  0x3c   : > { %725 = vmatprep.subr.bf16.mxu0 %v1425_v1  ;;  %1278 = vmatprep.subr.bf16.mxu1 %v1425_v1 }
  0x3f   : > { %726 = vmatpush1.bf16.msra.mxu0 %v1319_v17  ;;  %1294 = vmatpush1.bf16.msra.mxu1 %v1319_v17  ;;  %v1611_v17 = vld [vmem:[%s1753_s2] ss:$0 sm:$0xff] }
  0x40   : > { %727 = vmatprep.subr.bf16.mxu0 %v1425_v1  ;;  %1279 = vmatprep.subr.bf16.mxu1 %v1425_v1  ;;  %v1393_v1 = vld [vmem:[%s1485_s28 + $0xc4] ss:$8 sps:$4 sm:$0xff]   ;;  %s1620_s28 = scalar_lea.vmem %s1754_s3, %s1263_s23 }
  0x43   : > { %728 = vmatpush1.bf16.msra.mxu0 %v1320_v18  ;;  %1295 = vmatpush1.bf16.msra.mxu1 %v1320_v18 }
  0x46   : > { %730 = vmatmul.mubr.bf16.vlgmr.msra.gmra.mrb[0].mxu0 %v1321_v19  ;;  %858 = vmatmul.mubr.bf16.vlgmr.msra.gmra.mrb[0].mxu1 %v1324_v20 }
  0x47   : > { %737 = vmatprep.mubr.bf16.mxu0 %v1327_v21  ;;  %865 = vmatprep.mubr.bf16.mxu1 %v1329_v22 }
  0x4e   : > { %738 = vmatmul.mubr.bf16.gmra.mrb[4].mxu0 %v1331_v23  ;;  %866 = vmatmul.mubr.bf16.gmra.mrb[4].mxu1 %v1332_v24 }
  0x4f   : > { %745 = vmatprep.mubr.bf16.mxu0 %v1333_v25  ;;  %873 = vmatprep.mubr.bf16.mxu1 %v1335_v26 }
  0x56   : > { %746 = vmatmul.mubr.bf16.gmra.mrb[8].mxu0 %v1337_v27  ;;  %874 = vmatmul.mubr.bf16.gmra.mrb[8].mxu1 %v1338_v28 }
  0x57   : > { %753 = vmatprep.mubr.bf16.mxu0 %v1339_v29  ;;  %881 = vmatprep.mubr.bf16.mxu1 %v1341_v30 }
  0x5e   : > { %754 = vmatmul.mubr.bf16.gmra.mrb[12].mxu0 %v1343_v31  ;;  %882 = vmatmul.mubr.bf16.gmra.mrb[12].mxu1 %v1344_v32 }
  0x5f   : > { %761 = vmatprep.mubr.bf16.mxu0 %v1345_v33  ;;  %889 = vmatprep.mubr.bf16.mxu1 %v1347_v34 }
  0x66   : > { %762 = vmatmul.mubr.bf16.gmra.mrb[16].mxu0 %v1349_v35  ;;  %890 = vmatmul.mubr.bf16.gmra.mrb[16].mxu1 %v1350_v36 }
  0x67   : > { %769 = vmatprep.mubr.bf16.mxu0 %v1351_v37  ;;  %897 = vmatprep.mubr.bf16.mxu1 %v1353_v38 }
  0x6e   : > { %770 = vmatmul.mubr.bf16.gmra.mrb[20].mxu0 %v1355_v39  ;;  %898 = vmatmul.mubr.bf16.gmra.mrb[20].mxu1 %v1356_v40 }
  0x6f   : > { %777 = vmatprep.mubr.bf16.mxu0 %v1357_v41  ;;  %905 = vmatprep.mubr.bf16.mxu1 %v1359_v42 }
  0x76   : > { %778 = vmatmul.mubr.bf16.gmra.mrb[24].mxu0 %v1361_v43  ;;  %906 = vmatmul.mubr.bf16.gmra.mrb[24].mxu1 %v1362_v44 }
  0x77   : > { %785 = vmatprep.mubr.bf16.mxu0 %v1363_v45  ;;  %913 = vmatprep.mubr.bf16.mxu1 %v1365_v46 }
  0x7e   : > { %786 = vmatmul.mubr.bf16.gmra.mrb[28].mxu0 %v1367_v47  ;;  %914 = vmatmul.mubr.bf16.gmra.mrb[28].mxu1 %v1368_v48 }
  0x7f   : > { %793 = vmatprep.mubr.bf16.mxu0 %v1369_v49  ;;  %921 = vmatprep.mubr.bf16.mxu1 %v1371_v50 }
  0x86   : > { %794 = vmatmul.mubr.bf16.gmra.mrb[32].mxu0 %v1373_v51  ;;  %922 = vmatmul.mubr.bf16.gmra.mrb[32].mxu1 %v1374_v52 }
  0x87   : > { %801 = vmatprep.mubr.bf16.mxu0 %v1375_v53  ;;  %929 = vmatprep.mubr.bf16.mxu1 %v1377_v54 }
  0x8e   : > { %802 = vmatmul.mubr.bf16.gmra.mrb[36].mxu0 %v1379_v55  ;;  %930 = vmatmul.mubr.bf16.gmra.mrb[36].mxu1 %v1380_v56 }
  0x8f   : > { %809 = vmatprep.mubr.bf16.mxu0 %v1381_v57  ;;  %937 = vmatprep.mubr.bf16.mxu1 %v1383_v58 }
  0x96   : > { %810 = vmatmul.mubr.bf16.gmra.mrb[40].mxu0 %v1385_v59  ;;  %938 = vmatmul.mubr.bf16.gmra.mrb[40].mxu1 %v1386_v60 }
  0x97   : > { %817 = vmatprep.mubr.bf16.mxu0 %v1387_v61  ;;  %945 = vmatprep.mubr.bf16.mxu1 %v1389_v62 }
  0x9e   : > { %818 = vmatmul.mubr.bf16.gmra.mrb[44].mxu0 %v1391_v63  ;;  %946 = vmatmul.mubr.bf16.gmra.mrb[44].mxu1 %v1392_v0 }
  0x9f   : > { %825 = vmatprep.mubr.bf16.mxu0 %v1393_v1  ;;  %953 = vmatprep.mubr.bf16.mxu1 %v1395_v2 }
  0xa6   : > { %826 = vmatmul.mubr.bf16.gmra.mrb[48].mxu0 %v1397_v3  ;;  %954 = vmatmul.mubr.bf16.gmra.mrb[48].mxu1 %v1398_v4 }
  0xa7   : > { %833 = vmatprep.mubr.bf16.mxu0 %v1399_v5  ;;  %961 = vmatprep.mubr.bf16.mxu1 %v1401_v6 }
  0xae   : > { %834 = vmatmul.mubr.bf16.gmra.mrb[52].mxu0 %v1403_v7  ;;  %962 = vmatmul.mubr.bf16.gmra.mrb[52].mxu1 %v1404_v8 }
  0xaf   : > { %841 = vmatprep.mubr.bf16.mxu0 %v1405_v9  ;;  %969 = vmatprep.mubr.bf16.mxu1 %v1407_v10 }
  0xb6   : > { %842 = vmatmul.mubr.bf16.gmra.mrb[56].mxu0 %v1409_v11  ;;  %970 = vmatmul.mubr.bf16.gmra.mrb[56].mxu1 %v1410_v12 }
  0xb7   : > { %849 = vmatprep.mubr.bf16.mxu0 %v1411_v13  ;;  %977 = vmatprep.mubr.bf16.mxu1 %v1413_v14 }
  0xbe   : > { %850 = vmatmul.mubr.bf16.gmra.mrb[60].mxu0 %v1415_v15  ;;  %978 = vmatmul.mubr.bf16.gmra.mrb[60].mxu1 %v1416_v16 }
 0x119   : > { %v731_v18 = vpop.f32.mrb[0].mxu0  ;;  %v859_v19 = vpop.f32.mrb[0].mxu1 }
 0x11a   : > { %v732_v20 = vadd.f32 %v1611_v17, %v731_v18  ;;  %v860_v21 = vadd.f32 %v1611_v17, %v859_v19  ;;  %v733_v22 = vpop.f32.mrb[1].mxu0  ;;  %v861_v23 = vpop.f32.mrb[1].mxu1 }
 0x11b   : > { %v734_v24 = vpop.f32.mrb[2].mxu0  ;;  %v862_v25 = vpop.f32.mrb[2].mxu1 }
 0x11c   : > { %v986_v26 = vmax.f32 %v732_v20, 0.0  ;;  %v1018_v27 = vmax.f32 %v860_v21, 0.0  ;;  %v735_v28 = vadd.f32 %v1611_v17, %v734_v24  ;;  %v863_v29 = vadd.f32 %v1611_v17, %v862_v25  ;;  %v736_v30 = vpop.f32.mrb[3].mxu0  ;;  %v864_v31 = vpop.f32.mrb[3].mxu1 }
 0x11e   : > { %1050 = vst [vmem:[%s1620_s28] sm:$0xff] %v986_v26  ;;  %1082 = vst [vmem:[%s1620_s28 + $0x100] sm:$0xff] %v1018_v27  ;;  %v987_v32 = vmax.f32 %v735_v28, 0.0  ;;  %v1019_v33 = vmax.f32 %v863_v29, 0.0 }
 0x120   : > { %1051 = vst [vmem:[%s1620_s28 + $0x8] sm:$0xff] %v987_v32  ;;  %1083 = vst [vmem:[%s1620_s28 + $0x108] sm:$0xff] %v1019_v33 }
 0x121   : > { %v739_v34 = vpop.f32.mrb[4].mxu0  ;;  %v867_v35 = vpop.f32.mrb[4].mxu1 }
 0x122   : > { %v740_v36 = vadd.f32 %v1611_v17, %v739_v34  ;;  %v868_v37 = vadd.f32 %v1611_v17, %v867_v35  ;;  %v741_v38 = vpop.f32.mrb[5].mxu0  ;;  %v869_v39 = vpop.f32.mrb[5].mxu1 }
 0x123   : > { %v742_v40 = vpop.f32.mrb[6].mxu0  ;;  %v870_v41 = vpop.f32.mrb[6].mxu1 }
 0x124   : > { %v988_v42 = vmax.f32 %v740_v36, 0.0  ;;  %v1020_v43 = vmax.f32 %v868_v37, 0.0  ;;  %v743_v44 = vadd.f32 %v1611_v17, %v742_v40  ;;  %v871_v45 = vadd.f32 %v1611_v17, %v870_v41  ;;  %v744_v46 = vpop.f32.mrb[7].mxu0  ;;  %v872_v47 = vpop.f32.mrb[7].mxu1 }
 0x126   : > { %1052 = vst [vmem:[%s1620_s28 + $0x10] sm:$0xff] %v988_v42  ;;  %1084 = vst [vmem:[%s1620_s28 + $0x110] sm:$0xff] %v1020_v43  ;;  %v989_v48 = vmax.f32 %v743_v44, 0.0  ;;  %v1021_v49 = vmax.f32 %v871_v45, 0.0 }
 0x128   : > { %1053 = vst [vmem:[%s1620_s28 + $0x18] sm:$0xff] %v989_v48  ;;  %1085 = vst [vmem:[%s1620_s28 + $0x118] sm:$0xff] %v1021_v49 }
 0x129   : > { %v747_v50 = vpop.f32.mrb[8].mxu0  ;;  %v875_v51 = vpop.f32.mrb[8].mxu1 }
 0x12a   : > { %v748_v52 = vadd.f32 %v1611_v17, %v747_v50  ;;  %v876_v53 = vadd.f32 %v1611_v17, %v875_v51  ;;  %v749_v54 = vpop.f32.mrb[9].mxu0  ;;  %v877_v55 = vpop.f32.mrb[9].mxu1 }
 0x12b   : > { %v750_v56 = vpop.f32.mrb[10].mxu0  ;;  %v878_v57 = vpop.f32.mrb[10].mxu1 }
 0x12c   : > { %v990_v58 = vmax.f32 %v748_v52, 0.0  ;;  %v1022_v59 = vmax.f32 %v876_v53, 0.0  ;;  %v751_v60 = vadd.f32 %v1611_v17, %v750_v56  ;;  %v879_v61 = vadd.f32 %v1611_v17, %v878_v57  ;;  %v752_v62 = vpop.f32.mrb[11].mxu0  ;;  %v880_v63 = vpop.f32.mrb[11].mxu1 }
 0x12e   : > { %1054 = vst [vmem:[%s1620_s28 + $0x20] sm:$0xff] %v990_v58  ;;  %1086 = vst [vmem:[%s1620_s28 + $0x120] sm:$0xff] %v1022_v59  ;;  %v991_v0 = vmax.f32 %v751_v60, 0.0  ;;  %v1023_v1 = vmax.f32 %v879_v61, 0.0 }
 0x130   : > { %1055 = vst [vmem:[%s1620_s28 + $0x28] sm:$0xff] %v991_v0  ;;  %1087 = vst [vmem:[%s1620_s28 + $0x128] sm:$0xff] %v1023_v1 }
 0x131   : > { %v755_v2 = vpop.f32.mrb[12].mxu0  ;;  %v883_v3 = vpop.f32.mrb[12].mxu1 }
 0x132   : > { %v756_v4 = vadd.f32 %v1611_v17, %v755_v2  ;;  %v884_v5 = vadd.f32 %v1611_v17, %v883_v3  ;;  %v757_v6 = vpop.f32.mrb[13].mxu0  ;;  %v885_v7 = vpop.f32.mrb[13].mxu1 }
 0x133   : > { %v758_v8 = vpop.f32.mrb[14].mxu0  ;;  %v886_v9 = vpop.f32.mrb[14].mxu1 }
 0x134   : > { %v992_v10 = vmax.f32 %v756_v4, 0.0  ;;  %v1024_v11 = vmax.f32 %v884_v5, 0.0  ;;  %v759_v12 = vadd.f32 %v1611_v17, %v758_v8  ;;  %v887_v13 = vadd.f32 %v1611_v17, %v886_v9  ;;  %v760_v14 = vpop.f32.mrb[15].mxu0  ;;  %v888_v15 = vpop.f32.mrb[15].mxu1 }
 0x136   : > { %1056 = vst [vmem:[%s1620_s28 + $0x30] sm:$0xff] %v992_v10  ;;  %1088 = vst [vmem:[%s1620_s28 + $0x130] sm:$0xff] %v1024_v11  ;;  %v993_v16 = vmax.f32 %v759_v12, 0.0  ;;  %v1025_v18 = vmax.f32 %v887_v13, 0.0 }
 0x138   : > { %1057 = vst [vmem:[%s1620_s28 + $0x38] sm:$0xff] %v993_v16  ;;  %1089 = vst [vmem:[%s1620_s28 + $0x138] sm:$0xff] %v1025_v18 }
 0x139   : > { %v763_v19 = vpop.f32.mrb[16].mxu0  ;;  %v891_v20 = vpop.f32.mrb[16].mxu1 }
 0x13a   : > { %v764_v21 = vadd.f32 %v1611_v17, %v763_v19  ;;  %v892_v22 = vadd.f32 %v1611_v17, %v891_v20  ;;  %v765_v23 = vpop.f32.mrb[17].mxu0  ;;  %v893_v24 = vpop.f32.mrb[17].mxu1 }
 0x13b   : > { %v766_v25 = vpop.f32.mrb[18].mxu0  ;;  %v894_v26 = vpop.f32.mrb[18].mxu1 }
 0x13c   : > { %v994_v27 = vmax.f32 %v764_v21, 0.0  ;;  %v1026_v28 = vmax.f32 %v892_v22, 0.0  ;;  %v767_v29 = vadd.f32 %v1611_v17, %v766_v25  ;;  %v895_v30 = vadd.f32 %v1611_v17, %v894_v26  ;;  %v768_v31 = vpop.f32.mrb[19].mxu0  ;;  %v896_v32 = vpop.f32.mrb[19].mxu1 }
 0x13e   : > { %1058 = vst [vmem:[%s1620_s28 + $0x40] sm:$0xff] %v994_v27  ;;  %1090 = vst [vmem:[%s1620_s28 + $0x140] sm:$0xff] %v1026_v28  ;;  %v995_v33 = vmax.f32 %v767_v29, 0.0  ;;  %v1027_v34 = vmax.f32 %v895_v30, 0.0 }
 0x140   : > { %1059 = vst [vmem:[%s1620_s28 + $0x48] sm:$0xff] %v995_v33  ;;  %1091 = vst [vmem:[%s1620_s28 + $0x148] sm:$0xff] %v1027_v34 }
 0x141   : > { %v771_v35 = vpop.f32.mrb[20].mxu0  ;;  %v899_v36 = vpop.f32.mrb[20].mxu1 }
 0x142   : > { %v772_v37 = vadd.f32 %v1611_v17, %v771_v35  ;;  %v900_v38 = vadd.f32 %v1611_v17, %v899_v36  ;;  %v773_v39 = vpop.f32.mrb[21].mxu0  ;;  %v901_v40 = vpop.f32.mrb[21].mxu1 }
 0x143   : > { %v774_v41 = vpop.f32.mrb[22].mxu0  ;;  %v902_v42 = vpop.f32.mrb[22].mxu1 }
 0x144   : > { %v996_v43 = vmax.f32 %v772_v37, 0.0  ;;  %v1028_v44 = vmax.f32 %v900_v38, 0.0  ;;  %v775_v45 = vadd.f32 %v1611_v17, %v774_v41  ;;  %v903_v46 = vadd.f32 %v1611_v17, %v902_v42  ;;  %v776_v47 = vpop.f32.mrb[23].mxu0  ;;  %v904_v48 = vpop.f32.mrb[23].mxu1 }
 0x146   : > { %1060 = vst [vmem:[%s1620_s28 + $0x50] sm:$0xff] %v996_v43  ;;  %1092 = vst [vmem:[%s1620_s28 + $0x150] sm:$0xff] %v1028_v44  ;;  %v997_v49 = vmax.f32 %v775_v45, 0.0  ;;  %v1029_v50 = vmax.f32 %v903_v46, 0.0 }
 0x148   : > { %1061 = vst [vmem:[%s1620_s28 + $0x58] sm:$0xff] %v997_v49  ;;  %1093 = vst [vmem:[%s1620_s28 + $0x158] sm:$0xff] %v1029_v50 }
 0x149   : > { %v779_v51 = vpop.f32.mrb[24].mxu0  ;;  %v907_v52 = vpop.f32.mrb[24].mxu1 }
 0x14a   : > { %v780_v53 = vadd.f32 %v1611_v17, %v779_v51  ;;  %v908_v54 = vadd.f32 %v1611_v17, %v907_v52  ;;  %v781_v55 = vpop.f32.mrb[25].mxu0  ;;  %v909_v56 = vpop.f32.mrb[25].mxu1 }
 0x14b   : > { %v782_v57 = vpop.f32.mrb[26].mxu0  ;;  %v910_v58 = vpop.f32.mrb[26].mxu1 }
 0x14c   : > { %v998_v59 = vmax.f32 %v780_v53, 0.0  ;;  %v1030_v60 = vmax.f32 %v908_v54, 0.0  ;;  %v783_v61 = vadd.f32 %v1611_v17, %v782_v57  ;;  %v911_v62 = vadd.f32 %v1611_v17, %v910_v58  ;;  %v784_v63 = vpop.f32.mrb[27].mxu0  ;;  %v912_v0 = vpop.f32.mrb[27].mxu1 }
 0x14e   : > { %1062 = vst [vmem:[%s1620_s28 + $0x60] sm:$0xff] %v998_v59  ;;  %1094 = vst [vmem:[%s1620_s28 + $0x160] sm:$0xff] %v1030_v60  ;;  %v999_v1 = vmax.f32 %v783_v61, 0.0  ;;  %v1031_v2 = vmax.f32 %v911_v62, 0.0 }
 0x150   : > { %1063 = vst [vmem:[%s1620_s28 + $0x68] sm:$0xff] %v999_v1  ;;  %1095 = vst [vmem:[%s1620_s28 + $0x168] sm:$0xff] %v1031_v2 }
 0x151   : > { %v787_v3 = vpop.f32.mrb[28].mxu0  ;;  %v915_v4 = vpop.f32.mrb[28].mxu1 }
 0x152   : > { %v788_v5 = vadd.f32 %v1611_v17, %v787_v3  ;;  %v916_v6 = vadd.f32 %v1611_v17, %v915_v4  ;;  %v789_v7 = vpop.f32.mrb[29].mxu0  ;;  %v917_v8 = vpop.f32.mrb[29].mxu1 }
 0x153   : > { %v790_v9 = vpop.f32.mrb[30].mxu0  ;;  %v918_v10 = vpop.f32.mrb[30].mxu1 }
 0x154   : > { %v1000_v11 = vmax.f32 %v788_v5, 0.0  ;;  %v1032_v12 = vmax.f32 %v916_v6, 0.0  ;;  %v791_v13 = vadd.f32 %v1611_v17, %v790_v9  ;;  %v919_v14 = vadd.f32 %v1611_v17, %v918_v10  ;;  %v792_v15 = vpop.f32.mrb[31].mxu0  ;;  %v920_v16 = vpop.f32.mrb[31].mxu1 }
 0x156   : > { %1064 = vst [vmem:[%s1620_s28 + $0x70] sm:$0xff] %v1000_v11  ;;  %1096 = vst [vmem:[%s1620_s28 + $0x170] sm:$0xff] %v1032_v12  ;;  %v1001_v18 = vmax.f32 %v791_v13, 0.0  ;;  %v1033_v19 = vmax.f32 %v919_v14, 0.0 }
 0x158   : > { %1065 = vst [vmem:[%s1620_s28 + $0x78] sm:$0xff] %v1001_v18  ;;  %1097 = vst [vmem:[%s1620_s28 + $0x178] sm:$0xff] %v1033_v19 }
 0x159   : > { %v795_v20 = vpop.f32.mrb[32].mxu0  ;;  %v923_v21 = vpop.f32.mrb[32].mxu1 }
 0x15a   : > { %v796_v22 = vadd.f32 %v1611_v17, %v795_v20  ;;  %v924_v23 = vadd.f32 %v1611_v17, %v923_v21  ;;  %v797_v24 = vpop.f32.mrb[33].mxu0  ;;  %v925_v25 = vpop.f32.mrb[33].mxu1 }
 0x15b   : > { %v798_v26 = vpop.f32.mrb[34].mxu0  ;;  %v926_v27 = vpop.f32.mrb[34].mxu1 }
 0x15c   : > { %v1002_v28 = vmax.f32 %v796_v22, 0.0  ;;  %v1034_v29 = vmax.f32 %v924_v23, 0.0  ;;  %v799_v30 = vadd.f32 %v1611_v17, %v798_v26  ;;  %v927_v31 = vadd.f32 %v1611_v17, %v926_v27  ;;  %v800_v32 = vpop.f32.mrb[35].mxu0  ;;  %v928_v33 = vpop.f32.mrb[35].mxu1 }
 0x15e   : > { %1066 = vst [vmem:[%s1620_s28 + $0x80] sm:$0xff] %v1002_v28  ;;  %1098 = vst [vmem:[%s1620_s28 + $0x180] sm:$0xff] %v1034_v29  ;;  %v1003_v34 = vmax.f32 %v799_v30, 0.0  ;;  %v1035_v35 = vmax.f32 %v927_v31, 0.0 }
 0x160   : > { %1067 = vst [vmem:[%s1620_s28 + $0x88] sm:$0xff] %v1003_v34  ;;  %1099 = vst [vmem:[%s1620_s28 + $0x188] sm:$0xff] %v1035_v35 }
 0x161   : > { %v803_v36 = vpop.f32.mrb[36].mxu0  ;;  %v931_v37 = vpop.f32.mrb[36].mxu1 }
 0x162   : > { %v804_v38 = vadd.f32 %v1611_v17, %v803_v36  ;;  %v932_v39 = vadd.f32 %v1611_v17, %v931_v37  ;;  %v805_v40 = vpop.f32.mrb[37].mxu0  ;;  %v933_v41 = vpop.f32.mrb[37].mxu1 }
 0x163   : > { %v806_v42 = vpop.f32.mrb[38].mxu0  ;;  %v934_v43 = vpop.f32.mrb[38].mxu1 }
 0x164   : > { %v1004_v44 = vmax.f32 %v804_v38, 0.0  ;;  %v1036_v45 = vmax.f32 %v932_v39, 0.0  ;;  %v807_v46 = vadd.f32 %v1611_v17, %v806_v42  ;;  %v935_v47 = vadd.f32 %v1611_v17, %v934_v43  ;;  %v808_v48 = vpop.f32.mrb[39].mxu0  ;;  %v936_v49 = vpop.f32.mrb[39].mxu1 }
 0x166   : > { %1068 = vst [vmem:[%s1620_s28 + $0x90] sm:$0xff] %v1004_v44  ;;  %1100 = vst [vmem:[%s1620_s28 + $0x190] sm:$0xff] %v1036_v45  ;;  %v1005_v50 = vmax.f32 %v807_v46, 0.0  ;;  %v1037_v51 = vmax.f32 %v935_v47, 0.0 }
 0x168   : > { %1069 = vst [vmem:[%s1620_s28 + $0x98] sm:$0xff] %v1005_v50  ;;  %1101 = vst [vmem:[%s1620_s28 + $0x198] sm:$0xff] %v1037_v51 }
 0x169   : > { %v811_v52 = vpop.f32.mrb[40].mxu0  ;;  %v939_v53 = vpop.f32.mrb[40].mxu1 }
 0x16a   : > { %v812_v54 = vadd.f32 %v1611_v17, %v811_v52  ;;  %v940_v55 = vadd.f32 %v1611_v17, %v939_v53  ;;  %v813_v56 = vpop.f32.mrb[41].mxu0  ;;  %v941_v57 = vpop.f32.mrb[41].mxu1 }
 0x16b   : > { %v814_v58 = vpop.f32.mrb[42].mxu0  ;;  %v942_v59 = vpop.f32.mrb[42].mxu1 }
 0x16c   : > { %v1006_v60 = vmax.f32 %v812_v54, 0.0  ;;  %v1038_v61 = vmax.f32 %v940_v55, 0.0  ;;  %v815_v62 = vadd.f32 %v1611_v17, %v814_v58  ;;  %v943_v63 = vadd.f32 %v1611_v17, %v942_v59  ;;  %v816_v0 = vpop.f32.mrb[43].mxu0  ;;  %v944_v1 = vpop.f32.mrb[43].mxu1 }
 0x16e   : > { %1070 = vst [vmem:[%s1620_s28 + $0xa0] sm:$0xff] %v1006_v60  ;;  %1102 = vst [vmem:[%s1620_s28 + $0x1a0] sm:$0xff] %v1038_v61  ;;  %v1007_v2 = vmax.f32 %v815_v62, 0.0  ;;  %v1039_v3 = vmax.f32 %v943_v63, 0.0 }
 0x170   : > { %1071 = vst [vmem:[%s1620_s28 + $0xa8] sm:$0xff] %v1007_v2  ;;  %1103 = vst [vmem:[%s1620_s28 + $0x1a8] sm:$0xff] %v1039_v3 }
 0x171   : > { %v819_v4 = vpop.f32.mrb[44].mxu0  ;;  %v947_v5 = vpop.f32.mrb[44].mxu1 }
 0x172   : > { %v820_v6 = vadd.f32 %v1611_v17, %v819_v4  ;;  %v948_v7 = vadd.f32 %v1611_v17, %v947_v5  ;;  %v821_v8 = vpop.f32.mrb[45].mxu0  ;;  %v949_v9 = vpop.f32.mrb[45].mxu1 }
 0x173   : > { %v822_v10 = vpop.f32.mrb[46].mxu0  ;;  %v950_v11 = vpop.f32.mrb[46].mxu1 }
 0x174   : > { %v1008_v12 = vmax.f32 %v820_v6, 0.0  ;;  %v1040_v13 = vmax.f32 %v948_v7, 0.0  ;;  %v823_v14 = vadd.f32 %v1611_v17, %v822_v10  ;;  %v951_v15 = vadd.f32 %v1611_v17, %v950_v11  ;;  %v824_v16 = vpop.f32.mrb[47].mxu0  ;;  %v952_v18 = vpop.f32.mrb[47].mxu1 }
 0x176   : > { %1072 = vst [vmem:[%s1620_s28 + $0xb0] sm:$0xff] %v1008_v12  ;;  %1104 = vst [vmem:[%s1620_s28 + $0x1b0] sm:$0xff] %v1040_v13  ;;  %v1009_v19 = vmax.f32 %v823_v14, 0.0  ;;  %v1041_v20 = vmax.f32 %v951_v15, 0.0 }
 0x178   : > { %1073 = vst [vmem:[%s1620_s28 + $0xb8] sm:$0xff] %v1009_v19  ;;  %1105 = vst [vmem:[%s1620_s28 + $0x1b8] sm:$0xff] %v1041_v20 }
 0x179   : > { %v827_v21 = vpop.f32.mrb[48].mxu0  ;;  %v955_v22 = vpop.f32.mrb[48].mxu1 }
 0x17a   : > { %v828_v23 = vadd.f32 %v1611_v17, %v827_v21  ;;  %v956_v24 = vadd.f32 %v1611_v17, %v955_v22  ;;  %v829_v25 = vpop.f32.mrb[49].mxu0  ;;  %v957_v26 = vpop.f32.mrb[49].mxu1 }
 0x17b   : > { %v830_v27 = vpop.f32.mrb[50].mxu0  ;;  %v958_v28 = vpop.f32.mrb[50].mxu1 }
 0x17c   : > { %v1010_v29 = vmax.f32 %v828_v23, 0.0  ;;  %v1042_v30 = vmax.f32 %v956_v24, 0.0  ;;  %v831_v31 = vadd.f32 %v1611_v17, %v830_v27  ;;  %v959_v32 = vadd.f32 %v1611_v17, %v958_v28  ;;  %v832_v33 = vpop.f32.mrb[51].mxu0  ;;  %v960_v34 = vpop.f32.mrb[51].mxu1 }
 0x17e   : > { %1074 = vst [vmem:[%s1620_s28 + $0xc0] sm:$0xff] %v1010_v29  ;;  %1106 = vst [vmem:[%s1620_s28 + $0x1c0] sm:$0xff] %v1042_v30  ;;  %v1011_v35 = vmax.f32 %v831_v31, 0.0  ;;  %v1043_v36 = vmax.f32 %v959_v32, 0.0 }
 0x180   : > { %1075 = vst [vmem:[%s1620_s28 + $0xc8] sm:$0xff] %v1011_v35  ;;  %1107 = vst [vmem:[%s1620_s28 + $0x1c8] sm:$0xff] %v1043_v36 }
 0x181   : > { %v835_v37 = vpop.f32.mrb[52].mxu0  ;;  %v963_v38 = vpop.f32.mrb[52].mxu1 }
 0x182   : > { %v836_v39 = vadd.f32 %v1611_v17, %v835_v37  ;;  %v964_v40 = vadd.f32 %v1611_v17, %v963_v38  ;;  %v837_v41 = vpop.f32.mrb[53].mxu0  ;;  %v965_v42 = vpop.f32.mrb[53].mxu1 }
 0x183   : > { %v838_v43 = vpop.f32.mrb[54].mxu0  ;;  %v966_v44 = vpop.f32.mrb[54].mxu1 }
 0x184   : > { %v1012_v45 = vmax.f32 %v836_v39, 0.0  ;;  %v1044_v46 = vmax.f32 %v964_v40, 0.0  ;;  %v839_v47 = vadd.f32 %v1611_v17, %v838_v43  ;;  %v967_v48 = vadd.f32 %v1611_v17, %v966_v44  ;;  %v840_v49 = vpop.f32.mrb[55].mxu0  ;;  %v968_v50 = vpop.f32.mrb[55].mxu1 }
 0x186   : > { %1076 = vst [vmem:[%s1620_s28 + $0xd0] sm:$0xff] %v1012_v45  ;;  %1108 = vst [vmem:[%s1620_s28 + $0x1d0] sm:$0xff] %v1044_v46  ;;  %v1013_v51 = vmax.f32 %v839_v47, 0.0  ;;  %v1045_v52 = vmax.f32 %v967_v48, 0.0 }
 0x188   : > { %1077 = vst [vmem:[%s1620_s28 + $0xd8] sm:$0xff] %v1013_v51  ;;  %1109 = vst [vmem:[%s1620_s28 + $0x1d8] sm:$0xff] %v1045_v52 }
 0x189   : > { %v843_v53 = vpop.f32.mrb[56].mxu0  ;;  %v971_v54 = vpop.f32.mrb[56].mxu1 }
 0x18a   : > { %v844_v55 = vadd.f32 %v1611_v17, %v843_v53  ;;  %v972_v56 = vadd.f32 %v1611_v17, %v971_v54  ;;  %v845_v57 = vpop.f32.mrb[57].mxu0  ;;  %v973_v58 = vpop.f32.mrb[57].mxu1 }
 0x18b   : > { %v846_v59 = vpop.f32.mrb[58].mxu0  ;;  %v974_v60 = vpop.f32.mrb[58].mxu1 }
 0x18c   : > { %v1014_v61 = vmax.f32 %v844_v55, 0.0  ;;  %v1046_v62 = vmax.f32 %v972_v56, 0.0  ;;  %v847_v63 = vadd.f32 %v1611_v17, %v846_v59  ;;  %v975_v0 = vadd.f32 %v1611_v17, %v974_v60  ;;  %v848_v1 = vpop.f32.mrb[59].mxu0  ;;  %v976_v2 = vpop.f32.mrb[59].mxu1 }
 0x18e   : > { %1078 = vst [vmem:[%s1620_s28 + $0xe0] sm:$0xff] %v1014_v61  ;;  %1110 = vst [vmem:[%s1620_s28 + $0x1e0] sm:$0xff] %v1046_v62  ;;  %v1015_v3 = vmax.f32 %v847_v63, 0.0  ;;  %v1047_v4 = vmax.f32 %v975_v0, 0.0 }
 0x190   : > { %1079 = vst [vmem:[%s1620_s28 + $0xe8] sm:$0xff] %v1015_v3  ;;  %1111 = vst [vmem:[%s1620_s28 + $0x1e8] sm:$0xff] %v1047_v4 }
 0x191   : > { %v851_v5 = vpop.f32.mrb[60].mxu0  ;;  %v979_v6 = vpop.f32.mrb[60].mxu1 }
 0x192   : > { %v852_v7 = vadd.f32 %v1611_v17, %v851_v5  ;;  %v980_v8 = vadd.f32 %v1611_v17, %v979_v6  ;;  %v853_v9 = vpop.f32.mrb[61].mxu0  ;;  %v981_v10 = vpop.f32.mrb[61].mxu1 }
 0x193   : > { %v854_v11 = vpop.f32.mrb[62].mxu0  ;;  %v982_v12 = vpop.f32.mrb[62].mxu1 }
 0x194   : > { %v1016_v13 = vmax.f32 %v852_v7, 0.0  ;;  %v1048_v14 = vmax.f32 %v980_v8, 0.0  ;;  %v855_v15 = vadd.f32 %v1611_v17, %v854_v11  ;;  %v983_v16 = vadd.f32 %v1611_v17, %v982_v12  ;;  %v856_v18 = vpop.f32.mrb[63].mxu0  ;;  %v984_v19 = vpop.f32.mrb[63].mxu1 }
 0x196   : > { %1080 = vst [vmem:[%s1620_s28 + $0xf0] sm:$0xff] %v1016_v13  ;;  %1112 = vst [vmem:[%s1620_s28 + $0x1f0] sm:$0xff] %v1048_v14  ;;  %v1017_v20 = vmax.f32 %v855_v15, 0.0  ;;  %v1049_v21 = vmax.f32 %v983_v16, 0.0 }
 0x198   : > { %1081 = vst [vmem:[%s1620_s28 + $0xf8] sm:$0xff] %v1017_v20  ;;  %1113 = vst [vmem:[%s1620_s28 + $0x1f8] sm:$0xff] %v1049_v21 }
 0x199 PF: > { %s13_s12 = sadd.s32 1, %s1423_s12  }
 0x19a   : > { %p10_p4 = scmp.ge.s32.totalorder %s13_s12, 5  }
 0x19c   :  { %12 = sbr.rel (!%p10_p4) target bundleno = 1 (0x1), region = 62 }

// kernel: forward.8
= control target key start
LH: loop header
LB: loop body
LE: loop exit
PB: predicated region body
PF: predicated region fallthrough
CT: control target
= control target key end

     0   :  { %s1446_s12 = smov 0   ;;  %s1751_s0 = inlined_call_operand.vmem [shape: bf16[6144,256], index: 0, kind: input, shape index: {}]   ;;  %s1752_s1 = inlined_call_operand.vmem [shape: bf16[256,128], index: 1, kind: input, shape index: {}]   ;;  %s1753_s2 = inlined_call_operand.vmem [shape: f32[1,128], index: 2, kind: input, shape index: {}]   ;;  %s1754_s3 = inlined_call_operand.vmem [shape: f32[6144,128], index: 3, kind: output, shape index: {}]  }
   0x1 LB: > { %s1170_s13 = sadd.s32 4294967295, %s1423_s12   ;;  %p1174_p0 = scmp.ge.s32.totalorder %s1423_s12, 1  ;;  %s1423_s12 = sphi %s1446_s12, %s13_s12  }
   0x2   : > { %p139_p1 = scmp.lt.s32.totalorder %s1423_s12, 13 }
   0x4   : > { %p140_p2 = pnand %p1174_p0, %p139_p1 }
   0x5   : > { %v1305_v0 = vld [vmem:[%s1752_s1] sm:$0xff] (!%p140_p2)   ;;  %v1425_v1 = vmov (!%p140_p2), 0   ;;  %s1175_s16 = sshll.u32 (!%p140_p2), %s1170_s13, 6  ;;  %v1306_v2 = vld [vmem:[%s1752_s1 + $0x8] sm:$0xff] (!%p140_p2)   ;;  %v1307_v3 = vld [vmem:[%s1752_s1 + $0x10] sm:$0xff] (!%p140_p2)  }
   0x6   : > { %143 = sbr.rel (%p140_p2) target bundleno = 409 (0x199), region = 32  ;;  %697 = vmatprep.subr.bf16.mxu0 (!%p140_p2), %v1425_v1  ;;  %1264 = vmatprep.subr.bf16.mxu1 (!%p140_p2), %v1425_v1  ;;  %p165_p3 = scmp.lt.s32.totalorder (!%p140_p2), %s1175_s16, 767  ;;  %v1308_v4 = vld [vmem:[%s1752_s1 + $0x18] sm:$0xff] (!%p140_p2)   ;;  %v1309_v5 = vld [vmem:[%s1752_s1 + $0x20] sm:$0xff] (!%p140_p2)   ;;  %v1310_v7 = vld [vmem:[%s1752_s1 + $0x28] sm:$0xff] (!%p140_p2)  }
   0x7   : > { %698 = vmatpush1.bf16.msra.mxu0 (!%p140_p2), %v1305_v0  ;;  %1280 = vmatpush1.bf16.msra.mxu1 (!%p140_p2), %v1305_v0  ;;  %v1311_v9 = vld [vmem:[%s1752_s1 + $0x30] sm:$0xff] (!%p140_p2)   ;;  %v1312_v10 = vld [vmem:[%s1752_s1 + $0x38] sm:$0xff] (!%p140_p2)   ;;  %v1313_v11 = vld [vmem:[%s1752_s1 + $0x40] sm:$0xff] (!%p140_p2)  }
   0x8   : > { %699 = vmatprep.subr.bf16.mxu0 (!%p140_p2), %v1425_v1  ;;  %1265 = vmatprep.subr.bf16.mxu1 (!%p140_p2), %v1425_v1  ;;  %v1314_v12 = vld [vmem:[%s1752_s1 + $0x48] sm:$0xff] (!%p140_p2)   ;;  %v1315_v13 = vld [vmem:[%s1752_s1 + $0x50] sm:$0xff] (!%p140_p2)   ;;  %v1316_v14 = vld [vmem:[%s1752_s1 + $0x58] sm:$0xff] (!%p140_p2)  }
   0x9   : > { %v1317_v15 = vld [vmem:[%s1752_s1 + $0x60] sm:$0xff] (!%p140_p2)   ;;  %v1318_v16 = vld [vmem:[%s1752_s1 + $0x68] sm:$0xff] (!%p140_p2)   ;;  %v1319_v17 = vld [vmem:[%s1752_s1 + $0x70] sm:$0xff] (!%p140_p2)  }
   0xa   : > { %v1320_v18 = vld [vmem:[%s1752_s1 + $0x78] sm:$0xff] (!%p140_p2)  }
   0xb   : > { %700 = vmatpush1.bf16.msra.mxu0 (!%p140_p2), %v1306_v2  ;;  %1281 = vmatpush1.bf16.msra.mxu1 (!%p140_p2), %v1306_v2 }
   0xc   : > { %701 = vmatprep.subr.bf16.mxu0 (!%p140_p2), %v1425_v1  ;;  %1266 = vmatprep.subr.bf16.mxu1 (!%p140_p2), %v1425_v1 }
   0xd   : > { %s1756_s16 = smov (!%p165_p3, %s1175_s16), 767 }
   0xe   : > { %s1263_s23 = sshll.u32 %s1756_s16, 3 }
   0xf   : > { %702 = vmatpush1.bf16.msra.mxu0 %v1307_v3  ;;  %1282 = vmatpush1.bf16.msra.mxu1 %v1307_v3  ;;  %s1485_s28 = scalar_lea.vmem %s1751_s0, %s1263_s23 }
  0x10   : > { %703 = vmatprep.subr.bf16.mxu0 %v1425_v1  ;;  %1267 = vmatprep.subr.bf16.mxu1 %v1425_v1  ;;  %v1323_v6 = vld [vmem:[%s1485_s28 + $0x4] ss:$8 sps:$4 sm:$0xff]   ;;  %v1321_v19 = vld [vmem:[%s1485_s28] ss:$8 sps:$4 sm:$0xff]   ;;  %v1327_v21 = vld [vmem:[%s1485_s28 + $0x14] ss:$8 sps:$4 sm:$0xff]  }
  0x11   : > { %v1326_v8 = vld [vmem:[%s1485_s28 + $0x104] ss:$8 sps:$4 sm:$0xff]   ;;  %729 = vmatprep.mubr.bf16.mxu0 %v1323_v6  ;;  %v1324_v20 = vld [vmem:[%s1485_s28 + $0x100] ss:$8 sps:$4 sm:$0xff]   ;;  %v1329_v22 = vld [vmem:[%s1485_s28 + $0x114] ss:$8 sps:$4 sm:$0xff]  }
  0x12   : > { %857 = vmatprep.mubr.bf16.mxu1 %v1326_v8  ;;  %v1331_v23 = vld [vmem:[%s1485_s28 + $0x10] ss:$8 sps:$4 sm:$0xff]   ;;  %v1333_v25 = vld [vmem:[%s1485_s28 + $0x24] ss:$8 sps:$4 sm:$0xff]   ;;  %v1337_v27 = vld [vmem:[%s1485_s28 + $0x20] ss:$8 sps:$4 sm:$0xff]  }
  0x13   : > { %704 = vmatpush1.bf16.msra.mxu0 %v1308_v4  ;;  %1283 = vmatpush1.bf16.msra.mxu1 %v1308_v4  ;;  %v1332_v24 = vld [vmem:[%s1485_s28 + $0x110] ss:$8 sps:$4 sm:$0xff]   ;;  %v1335_v26 = vld [vmem:[%s1485_s28 + $0x124] ss:$8 sps:$4 sm:$0xff]   ;;  %v1338_v28 = vld [vmem:[%s1485_s28 + $0x120] ss:$8 sps:$4 sm:$0xff]  }
  0x14   : > { %705 = vmatprep.subr.bf16.mxu0 %v1425_v1  ;;  %1268 = vmatprep.subr.bf16.mxu1 %v1425_v1  ;;  %v1339_v29 = vld [vmem:[%s1485_s28 + $0x34] ss:$8 sps:$4 sm:$0xff]   ;;  %v1343_v31 = vld [vmem:[%s1485_s28 + $0x30] ss:$8 sps:$4 sm:$0xff]   ;;  %v1345_v33 = vld [vmem:[%s1485_s28 + $0x44] ss:$8 sps:$4 sm:$0xff]  }
  0x15   : > { %v1341_v30 = vld [vmem:[%s1485_s28 + $0x134] ss:$8 sps:$4 sm:$0xff]   ;;  %v1344_v32 = vld [vmem:[%s1485_s28 + $0x130] ss:$8 sps:$4 sm:$0xff]   ;;  %v1347_v34 = vld [vmem:[%s1485_s28 + $0x144] ss:$8 sps:$4 sm:$0xff]  }
  0x16   : > { %v1349_v35 = vld [vmem:[%s1485_s28 + $0x40] ss:$8 sps:$4 sm:$0xff]   ;;  %v1351_v37 = vld [vmem:[%s1485_s28 + $0x54] ss:$8 sps:$4 sm:$0xff]   ;;  %v1355_v39 = vld [vmem:[%s1485_s28 + $0x50] ss:$8 sps:$4 sm:$0xff]  }
  0x17   : > { %706 = vmatpush1.bf16.msra.mxu0 %v1309_v5  ;;  %1284 = vmatpush1.bf16.msra.mxu1 %v1309_v5  ;;  %v1350_v36 = vld [vmem:[%s1485_s28 + $0x140] ss:$8 sps:$4 sm:$0xff]   ;;  %v1353_v38 = vld [vmem:[%s1485_s28 + $0x154] ss:$8 sps:$4 sm:$0xff]   ;;  %v1356_v40 = vld [vmem:[%s1485_s28 + $0x150] ss:$8 sps:$4 sm:$0xff]  }
  0x18   : > { %707 = vmatprep.subr.bf16.mxu0 %v1425_v1  ;;  %1269 = vmatprep.subr.bf16.mxu1 %v1425_v1  ;;  %v1357_v41 = vld [vmem:[%s1485_s28 + $0x64] ss:$8 sps:$4 sm:$0xff]   ;;  %v1361_v43 = vld [vmem:[%s1485_s28 + $0x60] ss:$8 sps:$4 sm:$0xff]   ;;  %v1363_v45 = vld [vmem:[%s1485_s28 + $0x74] ss:$8 sps:$4 sm:$0xff]  }
  0x19   : > { %v1359_v42 = vld [vmem:[%s1485_s28 + $0x164] ss:$8 sps:$4 sm:$0xff]   ;;  %v1362_v44 = vld [vmem:[%s1485_s28 + $0x160] ss:$8 sps:$4 sm:$0xff]   ;;  %v1365_v46 = vld [vmem:[%s1485_s28 + $0x174] ss:$8 sps:$4 sm:$0xff]  }
  0x1a   : > { %v1367_v47 = vld [vmem:[%s1485_s28 + $0x70] ss:$8 sps:$4 sm:$0xff]   ;;  %v1369_v49 = vld [vmem:[%s1485_s28 + $0x84] ss:$8 sps:$4 sm:$0xff]   ;;  %v1373_v51 = vld [vmem:[%s1485_s28 + $0x80] ss:$8 sps:$4 sm:$0xff]  }
  0x1b   : > { %708 = vmatpush1.bf16.msra.mxu0 %v1310_v7  ;;  %1285 = vmatpush1.bf16.msra.mxu1 %v1310_v7  ;;  %v1368_v48 = vld [vmem:[%s1485_s28 + $0x170] ss:$8 sps:$4 sm:$0xff]   ;;  %v1371_v50 = vld [vmem:[%s1485_s28 + $0x184] ss:$8 sps:$4 sm:$0xff]   ;;  %v1374_v52 = vld [vmem:[%s1485_s28 + $0x180] ss:$8 sps:$4 sm:$0xff]  }
  0x1c   : > { %709 = vmatprep.subr.bf16.mxu0 %v1425_v1  ;;  %1270 = vmatprep.subr.bf16.mxu1 %v1425_v1  ;;  %v1375_v53 = vld [vmem:[%s1485_s28 + $0x94] ss:$8 sps:$4 sm:$0xff]   ;;  %v1379_v55 = vld [vmem:[%s1485_s28 + $0x90] ss:$8 sps:$4 sm:$0xff]   ;;  %v1381_v57 = vld [vmem:[%s1485_s28 + $0xa4] ss:$8 sps:$4 sm:$0xff]  }
  0x1d   : > { %v1377_v54 = vld [vmem:[%s1485_s28 + $0x194] ss:$8 sps:$4 sm:$0xff]   ;;  %v1380_v56 = vld [vmem:[%s1485_s28 + $0x190] ss:$8 sps:$4 sm:$0xff]   ;;  %v1383_v58 = vld [vmem:[%s1485_s28 + $0x1a4] ss:$8 sps:$4 sm:$0xff]  }
  0x1e   : > { %v1385_v59 = vld [vmem:[%s1485_s28 + $0xa0] ss:$8 sps:$4 sm:$0xff]   ;;  %v1387_v61 = vld [vmem:[%s1485_s28 + $0xb4] ss:$8 sps:$4 sm:$0xff]   ;;  %v1391_v63 = vld [vmem:[%s1485_s28 + $0xb0] ss:$8 sps:$4 sm:$0xff]  }
  0x1f   : > { %710 = vmatpush1.bf16.msra.mxu0 %v1311_v9  ;;  %1286 = vmatpush1.bf16.msra.mxu1 %v1311_v9  ;;  %v1386_v60 = vld [vmem:[%s1485_s28 + $0x1a0] ss:$8 sps:$4 sm:$0xff]   ;;  %v1389_v62 = vld [vmem:[%s1485_s28 + $0x1b4] ss:$8 sps:$4 sm:$0xff]   ;;  %v1392_v0 = vld [vmem:[%s1485_s28 + $0x1b0] ss:$8 sps:$4 sm:$0xff]  }
  0x20   : > { %711 = vmatprep.subr.bf16.mxu0 %v1425_v1  ;;  %1271 = vmatprep.subr.bf16.mxu1 %v1425_v1  ;;  %v1395_v2 = vld [vmem:[%s1485_s28 + $0x1c4] ss:$8 sps:$4 sm:$0xff]   ;;  %v1397_v3 = vld [vmem:[%s1485_s28 + $0xc0] ss:$8 sps:$4 sm:$0xff]   ;;  %v1399_v5 = vld [vmem:[%s1485_s28 + $0xd4] ss:$8 sps:$4 sm:$0xff]  }
  0x21   : > { %v1398_v4 = vld [vmem:[%s1485_s28 + $0x1c0] ss:$8 sps:$4 sm:$0xff]   ;;  %v1401_v6 = vld [vmem:[%s1485_s28 + $0x1d4] ss:$8 sps:$4 sm:$0xff]   ;;  %v1403_v7 = vld [vmem:[%s1485_s28 + $0xd0] ss:$8 sps:$4 sm:$0xff]  }
  0x22   : > { %v1404_v8 = vld [vmem:[%s1485_s28 + $0x1d0] ss:$8 sps:$4 sm:$0xff]   ;;  %v1405_v9 = vld [vmem:[%s1485_s28 + $0xe4] ss:$8 sps:$4 sm:$0xff]  }
  0x23   : > { %712 = vmatpush1.bf16.msra.mxu0 %v1312_v10  ;;  %1287 = vmatpush1.bf16.msra.mxu1 %v1312_v10  ;;  %v1407_v10 = vld [vmem:[%s1485_s28 + $0x1e4] ss:$8 sps:$4 sm:$0xff]  }
  0x24   : > { %713 = vmatprep.subr.bf16.mxu0 %v1425_v1  ;;  %1272 = vmatprep.subr.bf16.mxu1 %v1425_v1 }
  0x27   : > { %714 = vmatpush1.bf16.msra.mxu0 %v1313_v11  ;;  %1288 = vmatpush1.bf16.msra.mxu1 %v1313_v11  ;;  %v1409_v11 = vld [vmem:[%s1485_s28 + $0xe0] ss:$8 sps:$4 sm:$0xff]  }
  0x28   : > { %715 = vmatprep.subr.bf16.mxu0 %v1425_v1  ;;  %1273 = vmatprep.subr.bf16.mxu1 %v1425_v1 }
  0x2b   : > { %716 = vmatpush1.bf16.msra.mxu0 %v1314_v12  ;;  %1289 = vmatpush1.bf16.msra.mxu1 %v1314_v12  ;;  %v1410_v12 = vld [vmem:[%s1485_s28 + $0x1e0] ss:$8 sps:$4 sm:$0xff]  }
  0x2c   : > { %717 = vmatprep.subr.bf16.mxu0 %v1425_v1  ;;  %1274 = vmatprep.subr.bf16.mxu1 %v1425_v1 }
  0x2f   : > { %718 = vmatpush1.bf16.msra.mxu0 %v1315_v13  ;;  %1290 = vmatpush1.bf16.msra.mxu1 %v1315_v13  ;;  %v1411_v13 = vld [vmem:[%s1485_s28 + $0xf4] ss:$8 sps:$4 sm:$0xff]  }
  0x30   : > { %719 = vmatprep.subr.bf16.mxu0 %v1425_v1  ;;  %1275 = vmatprep.subr.bf16.mxu1 %v1425_v1 }
  0x33   : > { %720 = vmatpush1.bf16.msra.mxu0 %v1316_v14  ;;  %1291 = vmatpush1.bf16.msra.mxu1 %v1316_v14  ;;  %v1413_v14 = vld [vmem:[%s1485_s28 + $0x1f4] ss:$8 sps:$4 sm:$0xff]  }
  0x34   : > { %721 = vmatprep.subr.bf16.mxu0 %v1425_v1  ;;  %1276 = vmatprep.subr.bf16.mxu1 %v1425_v1 }
  0x37   : > { %722 = vmatpush1.bf16.msra.mxu0 %v1317_v15  ;;  %1292 = vmatpush1.bf16.msra.mxu1 %v1317_v15  ;;  %v1415_v15 = vld [vmem:[%s1485_s28 + $0xf0] ss:$8 sps:$4 sm:$0xff]  }
  0x38   : > { %723 = vmatprep.subr.bf16.mxu0 %v1425_v1  ;;  %1277 = vmatprep.subr.bf16.mxu1 %v1425_v1 }
  0x3b   : > { %724 = vmatpush1.bf16.msra.mxu0 %v1318_v16  ;;  %1293 = vmatpush1.bf16.msra.mxu1 %v1318_v16  ;;  %v1416_v16 = vld [vmem:[%s1485_s28 + $0x1f0] ss:$8 sps:$4 sm:$0xff]  }
  0x3c   : > { %725 = vmatprep.subr.bf16.mxu0 %v1425_v1  ;;  %1278 = vmatprep.subr.bf16.mxu1 %v1425_v1 }
  0x3f   : > { %726 = vmatpush1.bf16.msra.mxu0 %v1319_v17  ;;  %1294 = vmatpush1.bf16.msra.mxu1 %v1319_v17  ;;  %v1611_v17 = vld [vmem:[%s1753_s2] ss:$0 sm:$0xff] }
  0x40   : > { %727 = vmatprep.subr.bf16.mxu0 %v1425_v1  ;;  %1279 = vmatprep.subr.bf16.mxu1 %v1425_v1  ;;  %v1393_v1 = vld [vmem:[%s1485_s28 + $0xc4] ss:$8 sps:$4 sm:$0xff]   ;;  %s1620_s28 = scalar_lea.vmem %s1754_s3, %s1263_s23 }
  0x43   : > { %728 = vmatpush1.bf16.msra.mxu0 %v1320_v18  ;;  %1295 = vmatpush1.bf16.msra.mxu1 %v1320_v18 }
  0x46   : > { %730 = vmatmul.mubr.bf16.vlgmr.msra.gmra.mrb[0].mxu0 %v1321_v19  ;;  %858 = vmatmul.mubr.bf16.vlgmr.msra.gmra.mrb[0].mxu1 %v1324_v20 }
  0x47   : > { %737 = vmatprep.mubr.bf16.mxu0 %v1327_v21  ;;  %865 = vmatprep.mubr.bf16.mxu1 %v1329_v22 }
  0x4e   : > { %738 = vmatmul.mubr.bf16.gmra.mrb[4].mxu0 %v1331_v23  ;;  %866 = vmatmul.mubr.bf16.gmra.mrb[4].mxu1 %v1332_v24 }
  0x4f   : > { %745 = vmatprep.mubr.bf16.mxu0 %v1333_v25  ;;  %873 = vmatprep.mubr.bf16.mxu1 %v1335_v26 }
  0x56   : > { %746 = vmatmul.mubr.bf16.gmra.mrb[8].mxu0 %v1337_v27  ;;  %874 = vmatmul.mubr.bf16.gmra.mrb[8].mxu1 %v1338_v28 }
  0x57   : > { %753 = vmatprep.mubr.bf16.mxu0 %v1339_v29  ;;  %881 = vmatprep.mubr.bf16.mxu1 %v1341_v30 }
  0x5e   : > { %754 = vmatmul.mubr.bf16.gmra.mrb[12].mxu0 %v1343_v31  ;;  %882 = vmatmul.mubr.bf16.gmra.mrb[12].mxu1 %v1344_v32 }
  0x5f   : > { %761 = vmatprep.mubr.bf16.mxu0 %v1345_v33  ;;  %889 = vmatprep.mubr.bf16.mxu1 %v1347_v34 }
  0x66   : > { %762 = vmatmul.mubr.bf16.gmra.mrb[16].mxu0 %v1349_v35  ;;  %890 = vmatmul.mubr.bf16.gmra.mrb[16].mxu1 %v1350_v36 }
  0x67   : > { %769 = vmatprep.mubr.bf16.mxu0 %v1351_v37  ;;  %897 = vmatprep.mubr.bf16.mxu1 %v1353_v38 }
  0x6e   : > { %770 = vmatmul.mubr.bf16.gmra.mrb[20].mxu0 %v1355_v39  ;;  %898 = vmatmul.mubr.bf16.gmra.mrb[20].mxu1 %v1356_v40 }
  0x6f   : > { %777 = vmatprep.mubr.bf16.mxu0 %v1357_v41  ;;  %905 = vmatprep.mubr.bf16.mxu1 %v1359_v42 }
  0x76   : > { %778 = vmatmul.mubr.bf16.gmra.mrb[24].mxu0 %v1361_v43  ;;  %906 = vmatmul.mubr.bf16.gmra.mrb[24].mxu1 %v1362_v44 }
  0x77   : > { %785 = vmatprep.mubr.bf16.mxu0 %v1363_v45  ;;  %913 = vmatprep.mubr.bf16.mxu1 %v1365_v46 }
  0x7e   : > { %786 = vmatmul.mubr.bf16.gmra.mrb[28].mxu0 %v1367_v47  ;;  %914 = vmatmul.mubr.bf16.gmra.mrb[28].mxu1 %v1368_v48 }
  0x7f   : > { %793 = vmatprep.mubr.bf16.mxu0 %v1369_v49  ;;  %921 = vmatprep.mubr.bf16.mxu1 %v1371_v50 }
  0x86   : > { %794 = vmatmul.mubr.bf16.gmra.mrb[32].mxu0 %v1373_v51  ;;  %922 = vmatmul.mubr.bf16.gmra.mrb[32].mxu1 %v1374_v52 }
  0x87   : > { %801 = vmatprep.mubr.bf16.mxu0 %v1375_v53  ;;  %929 = vmatprep.mubr.bf16.mxu1 %v1377_v54 }
  0x8e   : > { %802 = vmatmul.mubr.bf16.gmra.mrb[36].mxu0 %v1379_v55  ;;  %930 = vmatmul.mubr.bf16.gmra.mrb[36].mxu1 %v1380_v56 }
  0x8f   : > { %809 = vmatprep.mubr.bf16.mxu0 %v1381_v57  ;;  %937 = vmatprep.mubr.bf16.mxu1 %v1383_v58 }
  0x96   : > { %810 = vmatmul.mubr.bf16.gmra.mrb[40].mxu0 %v1385_v59  ;;  %938 = vmatmul.mubr.bf16.gmra.mrb[40].mxu1 %v1386_v60 }
  0x97   : > { %817 = vmatprep.mubr.bf16.mxu0 %v1387_v61  ;;  %945 = vmatprep.mubr.bf16.mxu1 %v1389_v62 }
  0x9e   : > { %818 = vmatmul.mubr.bf16.gmra.mrb[44].mxu0 %v1391_v63  ;;  %946 = vmatmul.mubr.bf16.gmra.mrb[44].mxu1 %v1392_v0 }
  0x9f   : > { %825 = vmatprep.mubr.bf16.mxu0 %v1393_v1  ;;  %953 = vmatprep.mubr.bf16.mxu1 %v1395_v2 }
  0xa6   : > { %826 = vmatmul.mubr.bf16.gmra.mrb[48].mxu0 %v1397_v3  ;;  %954 = vmatmul.mubr.bf16.gmra.mrb[48].mxu1 %v1398_v4 }
  0xa7   : > { %833 = vmatprep.mubr.bf16.mxu0 %v1399_v5  ;;  %961 = vmatprep.mubr.bf16.mxu1 %v1401_v6 }
  0xae   : > { %834 = vmatmul.mubr.bf16.gmra.mrb[52].mxu0 %v1403_v7  ;;  %962 = vmatmul.mubr.bf16.gmra.mrb[52].mxu1 %v1404_v8 }
  0xaf   : > { %841 = vmatprep.mubr.bf16.mxu0 %v1405_v9  ;;  %969 = vmatprep.mubr.bf16.mxu1 %v1407_v10 }
  0xb6   : > { %842 = vmatmul.mubr.bf16.gmra.mrb[56].mxu0 %v1409_v11  ;;  %970 = vmatmul.mubr.bf16.gmra.mrb[56].mxu1 %v1410_v12 }
  0xb7   : > { %849 = vmatprep.mubr.bf16.mxu0 %v1411_v13  ;;  %977 = vmatprep.mubr.bf16.mxu1 %v1413_v14 }
  0xbe   : > { %850 = vmatmul.mubr.bf16.gmra.mrb[60].mxu0 %v1415_v15  ;;  %978 = vmatmul.mubr.bf16.gmra.mrb[60].mxu1 %v1416_v16 }
 0x119   : > { %v731_v18 = vpop.f32.mrb[0].mxu0  ;;  %v859_v19 = vpop.f32.mrb[0].mxu1 }
 0x11a   : > { %v732_v20 = vadd.f32 %v1611_v17, %v731_v18  ;;  %v860_v21 = vadd.f32 %v1611_v17, %v859_v19  ;;  %v733_v22 = vpop.f32.mrb[1].mxu0  ;;  %v861_v23 = vpop.f32.mrb[1].mxu1 }
 0x11b   : > { %v734_v24 = vpop.f32.mrb[2].mxu0  ;;  %v862_v25 = vpop.f32.mrb[2].mxu1 }
 0x11c   : > { %v986_v26 = vmax.f32 %v732_v20, 0.0  ;;  %v1018_v27 = vmax.f32 %v860_v21, 0.0  ;;  %v735_v28 = vadd.f32 %v1611_v17, %v734_v24  ;;  %v863_v29 = vadd.f32 %v1611_v17, %v862_v25  ;;  %v736_v30 = vpop.f32.mrb[3].mxu0  ;;  %v864_v31 = vpop.f32.mrb[3].mxu1 }
 0x11e   : > { %1050 = vst [vmem:[%s1620_s28] sm:$0xff] %v986_v26  ;;  %1082 = vst [vmem:[%s1620_s28 + $0x100] sm:$0xff] %v1018_v27  ;;  %v987_v32 = vmax.f32 %v735_v28, 0.0  ;;  %v1019_v33 = vmax.f32 %v863_v29, 0.0 }
 0x120   : > { %1051 = vst [vmem:[%s1620_s28 + $0x8] sm:$0xff] %v987_v32  ;;  %1083 = vst [vmem:[%s1620_s28 + $0x108] sm:$0xff] %v1019_v33 }
 0x121   : > { %v739_v34 = vpop.f32.mrb[4].mxu0  ;;  %v867_v35 = vpop.f32.mrb[4].mxu1 }
 0x122   : > { %v740_v36 = vadd.f32 %v1611_v17, %v739_v34  ;;  %v868_v37 = vadd.f32 %v1611_v17, %v867_v35  ;;  %v741_v38 = vpop.f32.mrb[5].mxu0  ;;  %v869_v39 = vpop.f32.mrb[5].mxu1 }
 0x123   : > { %v742_v40 = vpop.f32.mrb[6].mxu0  ;;  %v870_v41 = vpop.f32.mrb[6].mxu1 }
 0x124   : > { %v988_v42 = vmax.f32 %v740_v36, 0.0  ;;  %v1020_v43 = vmax.f32 %v868_v37, 0.0  ;;  %v743_v44 = vadd.f32 %v1611_v17, %v742_v40  ;;  %v871_v45 = vadd.f32 %v1611_v17, %v870_v41  ;;  %v744_v46 = vpop.f32.mrb[7].mxu0  ;;  %v872_v47 = vpop.f32.mrb[7].mxu1 }
 0x126   : > { %1052 = vst [vmem:[%s1620_s28 + $0x10] sm:$0xff] %v988_v42  ;;  %1084 = vst [vmem:[%s1620_s28 + $0x110] sm:$0xff] %v1020_v43  ;;  %v989_v48 = vmax.f32 %v743_v44, 0.0  ;;  %v1021_v49 = vmax.f32 %v871_v45, 0.0 }
 0x128   : > { %1053 = vst [vmem:[%s1620_s28 + $0x18] sm:$0xff] %v989_v48  ;;  %1085 = vst [vmem:[%s1620_s28 + $0x118] sm:$0xff] %v1021_v49 }
 0x129   : > { %v747_v50 = vpop.f32.mrb[8].mxu0  ;;  %v875_v51 = vpop.f32.mrb[8].mxu1 }
 0x12a   : > { %v748_v52 = vadd.f32 %v1611_v17, %v747_v50  ;;  %v876_v53 = vadd.f32 %v1611_v17, %v875_v51  ;;  %v749_v54 = vpop.f32.mrb[9].mxu0  ;;  %v877_v55 = vpop.f32.mrb[9].mxu1 }
 0x12b   : > { %v750_v56 = vpop.f32.mrb[10].mxu0  ;;  %v878_v57 = vpop.f32.mrb[10].mxu1 }
 0x12c   : > { %v990_v58 = vmax.f32 %v748_v52, 0.0  ;;  %v1022_v59 = vmax.f32 %v876_v53, 0.0  ;;  %v751_v60 = vadd.f32 %v1611_v17, %v750_v56  ;;  %v879_v61 = vadd.f32 %v1611_v17, %v878_v57  ;;  %v752_v62 = vpop.f32.mrb[11].mxu0  ;;  %v880_v63 = vpop.f32.mrb[11].mxu1 }
 0x12e   : > { %1054 = vst [vmem:[%s1620_s28 + $0x20] sm:$0xff] %v990_v58  ;;  %1086 = vst [vmem:[%s1620_s28 + $0x120] sm:$0xff] %v1022_v59  ;;  %v991_v0 = vmax.f32 %v751_v60, 0.0  ;;  %v1023_v1 = vmax.f32 %v879_v61, 0.0 }
 0x130   : > { %1055 = vst [vmem:[%s1620_s28 + $0x28] sm:$0xff] %v991_v0  ;;  %1087 = vst [vmem:[%s1620_s28 + $0x128] sm:$0xff] %v1023_v1 }
 0x131   : > { %v755_v2 = vpop.f32.mrb[12].mxu0  ;;  %v883_v3 = vpop.f32.mrb[12].mxu1 }
 0x132   : > { %v756_v4 = vadd.f32 %v1611_v17, %v755_v2  ;;  %v884_v5 = vadd.f32 %v1611_v17, %v883_v3  ;;  %v757_v6 = vpop.f32.mrb[13].mxu0  ;;  %v885_v7 = vpop.f32.mrb[13].mxu1 }
 0x133   : > { %v758_v8 = vpop.f32.mrb[14].mxu0  ;;  %v886_v9 = vpop.f32.mrb[14].mxu1 }
 0x134   : > { %v992_v10 = vmax.f32 %v756_v4, 0.0  ;;  %v1024_v11 = vmax.f32 %v884_v5, 0.0  ;;  %v759_v12 = vadd.f32 %v1611_v17, %v758_v8  ;;  %v887_v13 = vadd.f32 %v1611_v17, %v886_v9  ;;  %v760_v14 = vpop.f32.mrb[15].mxu0  ;;  %v888_v15 = vpop.f32.mrb[15].mxu1 }
 0x136   : > { %1056 = vst [vmem:[%s1620_s28 + $0x30] sm:$0xff] %v992_v10  ;;  %1088 = vst [vmem:[%s1620_s28 + $0x130] sm:$0xff] %v1024_v11  ;;  %v993_v16 = vmax.f32 %v759_v12, 0.0  ;;  %v1025_v18 = vmax.f32 %v887_v13, 0.0 }
 0x138   : > { %1057 = vst [vmem:[%s1620_s28 + $0x38] sm:$0xff] %v993_v16  ;;  %1089 = vst [vmem:[%s1620_s28 + $0x138] sm:$0xff] %v1025_v18 }
 0x139   : > { %v763_v19 = vpop.f32.mrb[16].mxu0  ;;  %v891_v20 = vpop.f32.mrb[16].mxu1 }
 0x13a   : > { %v764_v21 = vadd.f32 %v1611_v17, %v763_v19  ;;  %v892_v22 = vadd.f32 %v1611_v17, %v891_v20  ;;  %v765_v23 = vpop.f32.mrb[17].mxu0  ;;  %v893_v24 = vpop.f32.mrb[17].mxu1 }
 0x13b   : > { %v766_v25 = vpop.f32.mrb[18].mxu0  ;;  %v894_v26 = vpop.f32.mrb[18].mxu1 }
 0x13c   : > { %v994_v27 = vmax.f32 %v764_v21, 0.0  ;;  %v1026_v28 = vmax.f32 %v892_v22, 0.0  ;;  %v767_v29 = vadd.f32 %v1611_v17, %v766_v25  ;;  %v895_v30 = vadd.f32 %v1611_v17, %v894_v26  ;;  %v768_v31 = vpop.f32.mrb[19].mxu0  ;;  %v896_v32 = vpop.f32.mrb[19].mxu1 }
 0x13e   : > { %1058 = vst [vmem:[%s1620_s28 + $0x40] sm:$0xff] %v994_v27  ;;  %1090 = vst [vmem:[%s1620_s28 + $0x140] sm:$0xff] %v1026_v28  ;;  %v995_v33 = vmax.f32 %v767_v29, 0.0  ;;  %v1027_v34 = vmax.f32 %v895_v30, 0.0 }
 0x140   : > { %1059 = vst [vmem:[%s1620_s28 + $0x48] sm:$0xff] %v995_v33  ;;  %1091 = vst [vmem:[%s1620_s28 + $0x148] sm:$0xff] %v1027_v34 }
 0x141   : > { %v771_v35 = vpop.f32.mrb[20].mxu0  ;;  %v899_v36 = vpop.f32.mrb[20].mxu1 }
 0x142   : > { %v772_v37 = vadd.f32 %v1611_v17, %v771_v35  ;;  %v900_v38 = vadd.f32 %v1611_v17, %v899_v36  ;;  %v773_v39 = vpop.f32.mrb[21].mxu0  ;;  %v901_v40 = vpop.f32.mrb[21].mxu1 }
 0x143   : > { %v774_v41 = vpop.f32.mrb[22].mxu0  ;;  %v902_v42 = vpop.f32.mrb[22].mxu1 }
 0x144   : > { %v996_v43 = vmax.f32 %v772_v37, 0.0  ;;  %v1028_v44 = vmax.f32 %v900_v38, 0.0  ;;  %v775_v45 = vadd.f32 %v1611_v17, %v774_v41  ;;  %v903_v46 = vadd.f32 %v1611_v17, %v902_v42  ;;  %v776_v47 = vpop.f32.mrb[23].mxu0  ;;  %v904_v48 = vpop.f32.mrb[23].mxu1 }
 0x146   : > { %1060 = vst [vmem:[%s1620_s28 + $0x50] sm:$0xff] %v996_v43  ;;  %1092 = vst [vmem:[%s1620_s28 + $0x150] sm:$0xff] %v1028_v44  ;;  %v997_v49 = vmax.f32 %v775_v45, 0.0  ;;  %v1029_v50 = vmax.f32 %v903_v46, 0.0 }
 0x148   : > { %1061 = vst [vmem:[%s1620_s28 + $0x58] sm:$0xff] %v997_v49  ;;  %1093 = vst [vmem:[%s1620_s28 + $0x158] sm:$0xff] %v1029_v50 }
 0x149   : > { %v779_v51 = vpop.f32.mrb[24].mxu0  ;;  %v907_v52 = vpop.f32.mrb[24].mxu1 }
 0x14a   : > { %v780_v53 = vadd.f32 %v1611_v17, %v779_v51  ;;  %v908_v54 = vadd.f32 %v1611_v17, %v907_v52  ;;  %v781_v55 = vpop.f32.mrb[25].mxu0  ;;  %v909_v56 = vpop.f32.mrb[25].mxu1 }
 0x14b   : > { %v782_v57 = vpop.f32.mrb[26].mxu0  ;;  %v910_v58 = vpop.f32.mrb[26].mxu1 }
 0x14c   : > { %v998_v59 = vmax.f32 %v780_v53, 0.0  ;;  %v1030_v60 = vmax.f32 %v908_v54, 0.0  ;;  %v783_v61 = vadd.f32 %v1611_v17, %v782_v57  ;;  %v911_v62 = vadd.f32 %v1611_v17, %v910_v58  ;;  %v784_v63 = vpop.f32.mrb[27].mxu0  ;;  %v912_v0 = vpop.f32.mrb[27].mxu1 }
 0x14e   : > { %1062 = vst [vmem:[%s1620_s28 + $0x60] sm:$0xff] %v998_v59  ;;  %1094 = vst [vmem:[%s1620_s28 + $0x160] sm:$0xff] %v1030_v60  ;;  %v999_v1 = vmax.f32 %v783_v61, 0.0  ;;  %v1031_v2 = vmax.f32 %v911_v62, 0.0 }
 0x150   : > { %1063 = vst [vmem:[%s1620_s28 + $0x68] sm:$0xff] %v999_v1  ;;  %1095 = vst [vmem:[%s1620_s28 + $0x168] sm:$0xff] %v1031_v2 }
 0x151   : > { %v787_v3 = vpop.f32.mrb[28].mxu0  ;;  %v915_v4 = vpop.f32.mrb[28].mxu1 }
 0x152   : > { %v788_v5 = vadd.f32 %v1611_v17, %v787_v3  ;;  %v916_v6 = vadd.f32 %v1611_v17, %v915_v4  ;;  %v789_v7 = vpop.f32.mrb[29].mxu0  ;;  %v917_v8 = vpop.f32.mrb[29].mxu1 }
 0x153   : > { %v790_v9 = vpop.f32.mrb[30].mxu0  ;;  %v918_v10 = vpop.f32.mrb[30].mxu1 }
 0x154   : > { %v1000_v11 = vmax.f32 %v788_v5, 0.0  ;;  %v1032_v12 = vmax.f32 %v916_v6, 0.0  ;;  %v791_v13 = vadd.f32 %v1611_v17, %v790_v9  ;;  %v919_v14 = vadd.f32 %v1611_v17, %v918_v10  ;;  %v792_v15 = vpop.f32.mrb[31].mxu0  ;;  %v920_v16 = vpop.f32.mrb[31].mxu1 }
 0x156   : > { %1064 = vst [vmem:[%s1620_s28 + $0x70] sm:$0xff] %v1000_v11  ;;  %1096 = vst [vmem:[%s1620_s28 + $0x170] sm:$0xff] %v1032_v12  ;;  %v1001_v18 = vmax.f32 %v791_v13, 0.0  ;;  %v1033_v19 = vmax.f32 %v919_v14, 0.0 }
 0x158   : > { %1065 = vst [vmem:[%s1620_s28 + $0x78] sm:$0xff] %v1001_v18  ;;  %1097 = vst [vmem:[%s1620_s28 + $0x178] sm:$0xff] %v1033_v19 }
 0x159   : > { %v795_v20 = vpop.f32.mrb[32].mxu0  ;;  %v923_v21 = vpop.f32.mrb[32].mxu1 }
 0x15a   : > { %v796_v22 = vadd.f32 %v1611_v17, %v795_v20  ;;  %v924_v23 = vadd.f32 %v1611_v17, %v923_v21  ;;  %v797_v24 = vpop.f32.mrb[33].mxu0  ;;  %v925_v25 = vpop.f32.mrb[33].mxu1 }
 0x15b   : > { %v798_v26 = vpop.f32.mrb[34].mxu0  ;;  %v926_v27 = vpop.f32.mrb[34].mxu1 }
 0x15c   : > { %v1002_v28 = vmax.f32 %v796_v22, 0.0  ;;  %v1034_v29 = vmax.f32 %v924_v23, 0.0  ;;  %v799_v30 = vadd.f32 %v1611_v17, %v798_v26  ;;  %v927_v31 = vadd.f32 %v1611_v17, %v926_v27  ;;  %v800_v32 = vpop.f32.mrb[35].mxu0  ;;  %v928_v33 = vpop.f32.mrb[35].mxu1 }
 0x15e   : > { %1066 = vst [vmem:[%s1620_s28 + $0x80] sm:$0xff] %v1002_v28  ;;  %1098 = vst [vmem:[%s1620_s28 + $0x180] sm:$0xff] %v1034_v29  ;;  %v1003_v34 = vmax.f32 %v799_v30, 0.0  ;;  %v1035_v35 = vmax.f32 %v927_v31, 0.0 }
 0x160   : > { %1067 = vst [vmem:[%s1620_s28 + $0x88] sm:$0xff] %v1003_v34  ;;  %1099 = vst [vmem:[%s1620_s28 + $0x188] sm:$0xff] %v1035_v35 }
 0x161   : > { %v803_v36 = vpop.f32.mrb[36].mxu0  ;;  %v931_v37 = vpop.f32.mrb[36].mxu1 }
 0x162   : > { %v804_v38 = vadd.f32 %v1611_v17, %v803_v36  ;;  %v932_v39 = vadd.f32 %v1611_v17, %v931_v37  ;;  %v805_v40 = vpop.f32.mrb[37].mxu0  ;;  %v933_v41 = vpop.f32.mrb[37].mxu1 }
 0x163   : > { %v806_v42 = vpop.f32.mrb[38].mxu0  ;;  %v934_v43 = vpop.f32.mrb[38].mxu1 }
 0x164   : > { %v1004_v44 = vmax.f32 %v804_v38, 0.0  ;;  %v1036_v45 = vmax.f32 %v932_v39, 0.0  ;;  %v807_v46 = vadd.f32 %v1611_v17, %v806_v42  ;;  %v935_v47 = vadd.f32 %v1611_v17, %v934_v43  ;;  %v808_v48 = vpop.f32.mrb[39].mxu0  ;;  %v936_v49 = vpop.f32.mrb[39].mxu1 }
 0x166   : > { %1068 = vst [vmem:[%s1620_s28 + $0x90] sm:$0xff] %v1004_v44  ;;  %1100 = vst [vmem:[%s1620_s28 + $0x190] sm:$0xff] %v1036_v45  ;;  %v1005_v50 = vmax.f32 %v807_v46, 0.0  ;;  %v1037_v51 = vmax.f32 %v935_v47, 0.0 }
 0x168   : > { %1069 = vst [vmem:[%s1620_s28 + $0x98] sm:$0xff] %v1005_v50  ;;  %1101 = vst [vmem:[%s1620_s28 + $0x198] sm:$0xff] %v1037_v51 }
 0x169   : > { %v811_v52 = vpop.f32.mrb[40].mxu0  ;;  %v939_v53 = vpop.f32.mrb[40].mxu1 }
 0x16a   : > { %v812_v54 = vadd.f32 %v1611_v17, %v811_v52  ;;  %v940_v55 = vadd.f32 %v1611_v17, %v939_v53  ;;  %v813_v56 = vpop.f32.mrb[41].mxu0  ;;  %v941_v57 = vpop.f32.mrb[41].mxu1 }
 0x16b   : > { %v814_v58 = vpop.f32.mrb[42].mxu0  ;;  %v942_v59 = vpop.f32.mrb[42].mxu1 }
 0x16c   : > { %v1006_v60 = vmax.f32 %v812_v54, 0.0  ;;  %v1038_v61 = vmax.f32 %v940_v55, 0.0  ;;  %v815_v62 = vadd.f32 %v1611_v17, %v814_v58  ;;  %v943_v63 = vadd.f32 %v1611_v17, %v942_v59  ;;  %v816_v0 = vpop.f32.mrb[43].mxu0  ;;  %v944_v1 = vpop.f32.mrb[43].mxu1 }
 0x16e   : > { %1070 = vst [vmem:[%s1620_s28 + $0xa0] sm:$0xff] %v1006_v60  ;;  %1102 = vst [vmem:[%s1620_s28 + $0x1a0] sm:$0xff] %v1038_v61  ;;  %v1007_v2 = vmax.f32 %v815_v62, 0.0  ;;  %v1039_v3 = vmax.f32 %v943_v63, 0.0 }
 0x170   : > { %1071 = vst [vmem:[%s1620_s28 + $0xa8] sm:$0xff] %v1007_v2  ;;  %1103 = vst [vmem:[%s1620_s28 + $0x1a8] sm:$0xff] %v1039_v3 }
 0x171   : > { %v819_v4 = vpop.f32.mrb[44].mxu0  ;;  %v947_v5 = vpop.f32.mrb[44].mxu1 }
 0x172   : > { %v820_v6 = vadd.f32 %v1611_v17, %v819_v4  ;;  %v948_v7 = vadd.f32 %v1611_v17, %v947_v5  ;;  %v821_v8 = vpop.f32.mrb[45].mxu0  ;;  %v949_v9 = vpop.f32.mrb[45].mxu1 }
 0x173   : > { %v822_v10 = vpop.f32.mrb[46].mxu0  ;;  %v950_v11 = vpop.f32.mrb[46].mxu1 }
 0x174   : > { %v1008_v12 = vmax.f32 %v820_v6, 0.0  ;;  %v1040_v13 = vmax.f32 %v948_v7, 0.0  ;;  %v823_v14 = vadd.f32 %v1611_v17, %v822_v10  ;;  %v951_v15 = vadd.f32 %v1611_v17, %v950_v11  ;;  %v824_v16 = vpop.f32.mrb[47].mxu0  ;;  %v952_v18 = vpop.f32.mrb[47].mxu1 }
 0x176   : > { %1072 = vst [vmem:[%s1620_s28 + $0xb0] sm:$0xff] %v1008_v12  ;;  %1104 = vst [vmem:[%s1620_s28 + $0x1b0] sm:$0xff] %v1040_v13  ;;  %v1009_v19 = vmax.f32 %v823_v14, 0.0  ;;  %v1041_v20 = vmax.f32 %v951_v15, 0.0 }
 0x178   : > { %1073 = vst [vmem:[%s1620_s28 + $0xb8] sm:$0xff] %v1009_v19  ;;  %1105 = vst [vmem:[%s1620_s28 + $0x1b8] sm:$0xff] %v1041_v20 }
 0x179   : > { %v827_v21 = vpop.f32.mrb[48].mxu0  ;;  %v955_v22 = vpop.f32.mrb[48].mxu1 }
 0x17a   : > { %v828_v23 = vadd.f32 %v1611_v17, %v827_v21  ;;  %v956_v24 = vadd.f32 %v1611_v17, %v955_v22  ;;  %v829_v25 = vpop.f32.mrb[49].mxu0  ;;  %v957_v26 = vpop.f32.mrb[49].mxu1 }
 0x17b   : > { %v830_v27 = vpop.f32.mrb[50].mxu0  ;;  %v958_v28 = vpop.f32.mrb[50].mxu1 }
 0x17c   : > { %v1010_v29 = vmax.f32 %v828_v23, 0.0  ;;  %v1042_v30 = vmax.f32 %v956_v24, 0.0  ;;  %v831_v31 = vadd.f32 %v1611_v17, %v830_v27  ;;  %v959_v32 = vadd.f32 %v1611_v17, %v958_v28  ;;  %v832_v33 = vpop.f32.mrb[51].mxu0  ;;  %v960_v34 = vpop.f32.mrb[51].mxu1 }
 0x17e   : > { %1074 = vst [vmem:[%s1620_s28 + $0xc0] sm:$0xff] %v1010_v29  ;;  %1106 = vst [vmem:[%s1620_s28 + $0x1c0] sm:$0xff] %v1042_v30  ;;  %v1011_v35 = vmax.f32 %v831_v31, 0.0  ;;  %v1043_v36 = vmax.f32 %v959_v32, 0.0 }
 0x180   : > { %1075 = vst [vmem:[%s1620_s28 + $0xc8] sm:$0xff] %v1011_v35  ;;  %1107 = vst [vmem:[%s1620_s28 + $0x1c8] sm:$0xff] %v1043_v36 }
 0x181   : > { %v835_v37 = vpop.f32.mrb[52].mxu0  ;;  %v963_v38 = vpop.f32.mrb[52].mxu1 }
 0x182   : > { %v836_v39 = vadd.f32 %v1611_v17, %v835_v37  ;;  %v964_v40 = vadd.f32 %v1611_v17, %v963_v38  ;;  %v837_v41 = vpop.f32.mrb[53].mxu0  ;;  %v965_v42 = vpop.f32.mrb[53].mxu1 }
 0x183   : > { %v838_v43 = vpop.f32.mrb[54].mxu0  ;;  %v966_v44 = vpop.f32.mrb[54].mxu1 }
 0x184   : > { %v1012_v45 = vmax.f32 %v836_v39, 0.0  ;;  %v1044_v46 = vmax.f32 %v964_v40, 0.0  ;;  %v839_v47 = vadd.f32 %v1611_v17, %v838_v43  ;;  %v967_v48 = vadd.f32 %v1611_v17, %v966_v44  ;;  %v840_v49 = vpop.f32.mrb[55].mxu0  ;;  %v968_v50 = vpop.f32.mrb[55].mxu1 }
 0x186   : > { %1076 = vst [vmem:[%s1620_s28 + $0xd0] sm:$0xff] %v1012_v45  ;;  %1108 = vst [vmem:[%s1620_s28 + $0x1d0] sm:$0xff] %v1044_v46  ;;  %v1013_v51 = vmax.f32 %v839_v47, 0.0  ;;  %v1045_v52 = vmax.f32 %v967_v48, 0.0 }
 0x188   : > { %1077 = vst [vmem:[%s1620_s28 + $0xd8] sm:$0xff] %v1013_v51  ;;  %1109 = vst [vmem:[%s1620_s28 + $0x1d8] sm:$0xff] %v1045_v52 }
 0x189   : > { %v843_v53 = vpop.f32.mrb[56].mxu0  ;;  %v971_v54 = vpop.f32.mrb[56].mxu1 }
 0x18a   : > { %v844_v55 = vadd.f32 %v1611_v17, %v843_v53  ;;  %v972_v56 = vadd.f32 %v1611_v17, %v971_v54  ;;  %v845_v57 = vpop.f32.mrb[57].mxu0  ;;  %v973_v58 = vpop.f32.mrb[57].mxu1 }
 0x18b   : > { %v846_v59 = vpop.f32.mrb[58].mxu0  ;;  %v974_v60 = vpop.f32.mrb[58].mxu1 }
 0x18c   : > { %v1014_v61 = vmax.f32 %v844_v55, 0.0  ;;  %v1046_v62 = vmax.f32 %v972_v56, 0.0  ;;  %v847_v63 = vadd.f32 %v1611_v17, %v846_v59  ;;  %v975_v0 = vadd.f32 %v1611_v17, %v974_v60  ;;  %v848_v1 = vpop.f32.mrb[59].mxu0  ;;  %v976_v2 = vpop.f32.mrb[59].mxu1 }
 0x18e   : > { %1078 = vst [vmem:[%s1620_s28 + $0xe0] sm:$0xff] %v1014_v61  ;;  %1110 = vst [vmem:[%s1620_s28 + $0x1e0] sm:$0xff] %v1046_v62  ;;  %v1015_v3 = vmax.f32 %v847_v63, 0.0  ;;  %v1047_v4 = vmax.f32 %v975_v0, 0.0 }
 0x190   : > { %1079 = vst [vmem:[%s1620_s28 + $0xe8] sm:$0xff] %v1015_v3  ;;  %1111 = vst [vmem:[%s1620_s28 + $0x1e8] sm:$0xff] %v1047_v4 }
 0x191   : > { %v851_v5 = vpop.f32.mrb[60].mxu0  ;;  %v979_v6 = vpop.f32.mrb[60].mxu1 }
 0x192   : > { %v852_v7 = vadd.f32 %v1611_v17, %v851_v5  ;;  %v980_v8 = vadd.f32 %v1611_v17, %v979_v6  ;;  %v853_v9 = vpop.f32.mrb[61].mxu0  ;;  %v981_v10 = vpop.f32.mrb[61].mxu1 }
 0x193   : > { %v854_v11 = vpop.f32.mrb[62].mxu0  ;;  %v982_v12 = vpop.f32.mrb[62].mxu1 }
 0x194   : > { %v1016_v13 = vmax.f32 %v852_v7, 0.0  ;;  %v1048_v14 = vmax.f32 %v980_v8, 0.0  ;;  %v855_v15 = vadd.f32 %v1611_v17, %v854_v11  ;;  %v983_v16 = vadd.f32 %v1611_v17, %v982_v12  ;;  %v856_v18 = vpop.f32.mrb[63].mxu0  ;;  %v984_v19 = vpop.f32.mrb[63].mxu1 }
 0x196   : > { %1080 = vst [vmem:[%s1620_s28 + $0xf0] sm:$0xff] %v1016_v13  ;;  %1112 = vst [vmem:[%s1620_s28 + $0x1f0] sm:$0xff] %v1048_v14  ;;  %v1017_v20 = vmax.f32 %v855_v15, 0.0  ;;  %v1049_v21 = vmax.f32 %v983_v16, 0.0 }
 0x198   : > { %1081 = vst [vmem:[%s1620_s28 + $0xf8] sm:$0xff] %v1017_v20  ;;  %1113 = vst [vmem:[%s1620_s28 + $0x1f8] sm:$0xff] %v1049_v21 }
 0x199 PF: > { %s13_s12 = sadd.s32 1, %s1423_s12  }
 0x19a   : > { %p10_p4 = scmp.ge.s32.totalorder %s13_s12, 14  }
 0x19c   :  { %12 = sbr.rel (!%p10_p4) target bundleno = 1 (0x1), region = 62 }

// kernel: forward.9
= control target key start
LH: loop header
LB: loop body
LE: loop exit
PB: predicated region body
PF: predicated region fallthrough
CT: control target
= control target key end

     0   :  { %s1175_s12 = smov 0   ;;  %s1389_s0 = inlined_call_operand.vmem [shape: bf16[6656,128], index: 0, kind: input, shape index: {}]   ;;  %s1390_s1 = inlined_call_operand.vmem [shape: bf16[128,128], index: 1, kind: input, shape index: {}]   ;;  %s1391_s2 = inlined_call_operand.vmem [shape: f32[1,128], index: 2, kind: input, shape index: {}]   ;;  %s1392_s3 = inlined_call_operand.vmem [shape: f32[6656,128], index: 3, kind: output, shape index: {}]  }
   0x1 LB: > { %s911_s13 = sadd.s32 4294967295, %s1153_s12   ;;  %p915_p0 = scmp.ge.s32.totalorder %s1153_s12, 1  ;;  %s1153_s12 = sphi %s1175_s12, %s13_s12  }
   0x2   : > { %p138_p1 = scmp.lt.s32.totalorder %s1153_s12, 14 }
   0x4   : > { %p139_p2 = pnand %p915_p0, %p138_p1 }
   0x5   : > { %v1107_v0 = vld [vmem:[%s1390_s1] sm:$0xff] (!%p139_p2)   ;;  %s916_s16 = sshll.u32 (!%p139_p2), %s911_s13, 6  ;;  %v1108_v1 = vld [vmem:[%s1390_s1 + $0x8] sm:$0xff] (!%p139_p2)   ;;  %v1109_v2 = vld [vmem:[%s1390_s1 + $0x10] sm:$0xff] (!%p139_p2)  }
   0x6   : > { %142 = sbr.rel (%p139_p2) target bundleno = 312 (0x138), region = 32  ;;  %p163_p3 = scmp.lt.s32.totalorder (!%p139_p2), %s916_s16, 831  ;;  %1003 = vmatprep.subr.bf16.mxu0 (!%p139_p2), %v1107_v0  ;;  %1083 = vmatprep.subr.bf16.mxu1 (!%p139_p2), %v1107_v0  ;;  %v1110_v3 = vld [vmem:[%s1390_s1 + $0x18] sm:$0xff] (!%p139_p2)   ;;  %v1111_v6 = vld [vmem:[%s1390_s1 + $0x20] sm:$0xff] (!%p139_p2)   ;;  %v1112_v7 = vld [vmem:[%s1390_s1 + $0x28] sm:$0xff] (!%p139_p2)  }
   0x7   : > { %1004 = vmatpush3.bf16.msra.mxu0 (!%p139_p2), %v1107_v0  ;;  %1091 = vmatpush3.bf16.msra.mxu1 (!%p139_p2), %v1107_v0  ;;  %v1113_v8 = vld [vmem:[%s1390_s1 + $0x30] sm:$0xff] (!%p139_p2)   ;;  %v1114_v9 = vld [vmem:[%s1390_s1 + $0x38] sm:$0xff] (!%p139_p2)   ;;  %v1251_v40 = vld [vmem:[%s1391_s2] ss:$0 sm:$0xff] (!%p139_p2) }
   0x8   : > { %1005 = vmatprep.subr.bf16.mxu0 (!%p139_p2), %v1108_v1  ;;  %1084 = vmatprep.subr.bf16.mxu1 (!%p139_p2), %v1108_v1 }
   0xb   : > { %1006 = vmatpush3.bf16.msra.mxu0 (!%p139_p2), %v1108_v1  ;;  %1092 = vmatpush3.bf16.msra.mxu1 (!%p139_p2), %v1108_v1 }
   0xc   : > { %1007 = vmatprep.subr.bf16.mxu0 (!%p139_p2), %v1109_v2  ;;  %1085 = vmatprep.subr.bf16.mxu1 (!%p139_p2), %v1109_v2 }
   0xd   : > { %s1394_s16 = smov (!%p163_p3, %s916_s16), 831 }
   0xe   : > { %s917_s21 = sshll.u32 %s1394_s16, 2  ;;  %s919_s8 = sshll.u32 %s1394_s16, 3 }
   0xf   : > { %s1198_s24 = scalar_lea.vmem %s1389_s0, %s917_s21  ;;  %1008 = vmatpush3.bf16.msra.mxu0 %v1109_v2  ;;  %1093 = vmatpush3.bf16.msra.mxu1 %v1109_v2  ;;  %s1256_s14 = scalar_lea.vmem %s1392_s3, %s919_s8 }
  0x10   : > { %v1115_v4 = vld [vmem:[%s1198_s24] sm:$0xff]   ;;  %1009 = vmatprep.subr.bf16.mxu0 %v1110_v3  ;;  %1086 = vmatprep.subr.bf16.mxu1 %v1110_v3  ;;  %v1117_v10 = vld [vmem:[%s1198_s24 + $0x8] sm:$0xff]   ;;  %v1119_v12 = vld [vmem:[%s1198_s24 + $0x10] sm:$0xff]  }
  0x11   : > { %v1116_v5 = vld [vmem:[%s1198_s24 + $0x80] sm:$0xff]   ;;  %1019 = vmatprep.mubr.bf16.mxu0 %v1115_v4  ;;  %v1118_v11 = vld [vmem:[%s1198_s24 + $0x88] sm:$0xff]   ;;  %v1120_v13 = vld [vmem:[%s1198_s24 + $0x90] sm:$0xff]  }
  0x12   : > { %1051 = vmatprep.mubr.bf16.mxu1 %v1116_v5  ;;  %v1121_v14 = vld [vmem:[%s1198_s24 + $0x18] sm:$0xff]   ;;  %v1123_v16 = vld [vmem:[%s1198_s24 + $0x20] sm:$0xff]   ;;  %v1125_v18 = vld [vmem:[%s1198_s24 + $0x28] sm:$0xff]  }
  0x13   : > { %1010 = vmatpush3.bf16.msra.mxu0 %v1110_v3  ;;  %1094 = vmatpush3.bf16.msra.mxu1 %v1110_v3  ;;  %v1122_v15 = vld [vmem:[%s1198_s24 + $0x98] sm:$0xff]   ;;  %v1124_v17 = vld [vmem:[%s1198_s24 + $0xa0] sm:$0xff]   ;;  %v1126_v19 = vld [vmem:[%s1198_s24 + $0xa8] sm:$0xff]  }
  0x14   : > { %1011 = vmatprep.subr.bf16.mxu0 %v1111_v6  ;;  %1087 = vmatprep.subr.bf16.mxu1 %v1111_v6  ;;  %v1127_v20 = vld [vmem:[%s1198_s24 + $0x30] sm:$0xff]   ;;  %v1129_v22 = vld [vmem:[%s1198_s24 + $0x38] sm:$0xff]   ;;  %v1131_v24 = vld [vmem:[%s1198_s24 + $0x40] sm:$0xff]  }
  0x15   : > { %v1128_v21 = vld [vmem:[%s1198_s24 + $0xb0] sm:$0xff]   ;;  %v1130_v23 = vld [vmem:[%s1198_s24 + $0xb8] sm:$0xff]   ;;  %v1132_v25 = vld [vmem:[%s1198_s24 + $0xc0] sm:$0xff]  }
  0x16   : > { %v1133_v26 = vld [vmem:[%s1198_s24 + $0x48] sm:$0xff]   ;;  %v1135_v28 = vld [vmem:[%s1198_s24 + $0x50] sm:$0xff]   ;;  %v1137_v30 = vld [vmem:[%s1198_s24 + $0x58] sm:$0xff]  }
  0x17   : > { %1012 = vmatpush3.bf16.msra.mxu0 %v1111_v6  ;;  %1095 = vmatpush3.bf16.msra.mxu1 %v1111_v6  ;;  %v1134_v27 = vld [vmem:[%s1198_s24 + $0xc8] sm:$0xff]   ;;  %v1136_v29 = vld [vmem:[%s1198_s24 + $0xd0] sm:$0xff]   ;;  %v1138_v31 = vld [vmem:[%s1198_s24 + $0xd8] sm:$0xff]  }
  0x18   : > { %1013 = vmatprep.subr.bf16.mxu0 %v1112_v7  ;;  %1088 = vmatprep.subr.bf16.mxu1 %v1112_v7  ;;  %v1139_v32 = vld [vmem:[%s1198_s24 + $0x60] sm:$0xff]   ;;  %v1141_v34 = vld [vmem:[%s1198_s24 + $0x68] sm:$0xff]   ;;  %v1143_v36 = vld [vmem:[%s1198_s24 + $0x70] sm:$0xff]  }
  0x19   : > { %v1140_v33 = vld [vmem:[%s1198_s24 + $0xe0] sm:$0xff]   ;;  %v1142_v35 = vld [vmem:[%s1198_s24 + $0xe8] sm:$0xff]   ;;  %v1144_v37 = vld [vmem:[%s1198_s24 + $0xf0] sm:$0xff]  }
  0x1a   : > { %v1145_v38 = vld [vmem:[%s1198_s24 + $0x78] sm:$0xff]  }
  0x1b   : > { %1014 = vmatpush3.bf16.msra.mxu0 %v1112_v7  ;;  %1096 = vmatpush3.bf16.msra.mxu1 %v1112_v7  ;;  %v1146_v39 = vld [vmem:[%s1198_s24 + $0xf8] sm:$0xff]  }
  0x1c   : > { %1015 = vmatprep.subr.bf16.mxu0 %v1113_v8  ;;  %1089 = vmatprep.subr.bf16.mxu1 %v1113_v8 }
  0x1f   : > { %1016 = vmatpush3.bf16.msra.mxu0 %v1113_v8  ;;  %1097 = vmatpush3.bf16.msra.mxu1 %v1113_v8 }
  0x20   : > { %1017 = vmatprep.subr.bf16.mxu0 %v1114_v9  ;;  %1090 = vmatprep.subr.bf16.mxu1 %v1114_v9 }
  0x23   : > { %1018 = vmatpush3.bf16.msra.mxu0 %v1114_v9  ;;  %1098 = vmatpush3.bf16.msra.mxu1 %v1114_v9 }
  0x26   : > { %1020 = vmatmul.mubr.bf16.vlgmr.msra.gmra.mrb[0].mxu0 %v1117_v10  ;;  %1052 = vmatmul.mubr.bf16.vlgmr.msra.gmra.mrb[0].mxu1 %v1118_v11 }
  0x27   : > { %1023 = vmatprep.mubr.bf16.mxu0 %v1119_v12  ;;  %1055 = vmatprep.mubr.bf16.mxu1 %v1120_v13 }
  0x2e   : > { %1024 = vmatmul.mubr.bf16.gmra.mrb[4].mxu0 %v1121_v14  ;;  %1056 = vmatmul.mubr.bf16.gmra.mrb[4].mxu1 %v1122_v15 }
  0x2f   : > { %1027 = vmatprep.mubr.bf16.mxu0 %v1123_v16  ;;  %1059 = vmatprep.mubr.bf16.mxu1 %v1124_v17 }
  0x36   : > { %1028 = vmatmul.mubr.bf16.gmra.mrb[8].mxu0 %v1125_v18  ;;  %1060 = vmatmul.mubr.bf16.gmra.mrb[8].mxu1 %v1126_v19 }
  0x37   : > { %1031 = vmatprep.mubr.bf16.mxu0 %v1127_v20  ;;  %1063 = vmatprep.mubr.bf16.mxu1 %v1128_v21 }
  0x3e   : > { %1032 = vmatmul.mubr.bf16.gmra.mrb[12].mxu0 %v1129_v22  ;;  %1064 = vmatmul.mubr.bf16.gmra.mrb[12].mxu1 %v1130_v23 }
  0x3f   : > { %1035 = vmatprep.mubr.bf16.mxu0 %v1131_v24  ;;  %1067 = vmatprep.mubr.bf16.mxu1 %v1132_v25 }
  0x46   : > { %1036 = vmatmul.mubr.bf16.gmra.mrb[16].mxu0 %v1133_v26  ;;  %1068 = vmatmul.mubr.bf16.gmra.mrb[16].mxu1 %v1134_v27 }
  0x47   : > { %1039 = vmatprep.mubr.bf16.mxu0 %v1135_v28  ;;  %1071 = vmatprep.mubr.bf16.mxu1 %v1136_v29 }
  0x4e   : > { %1040 = vmatmul.mubr.bf16.gmra.mrb[20].mxu0 %v1137_v30  ;;  %1072 = vmatmul.mubr.bf16.gmra.mrb[20].mxu1 %v1138_v31 }
  0x4f   : > { %1043 = vmatprep.mubr.bf16.mxu0 %v1139_v32  ;;  %1075 = vmatprep.mubr.bf16.mxu1 %v1140_v33 }
  0x56   : > { %1044 = vmatmul.mubr.bf16.gmra.mrb[24].mxu0 %v1141_v34  ;;  %1076 = vmatmul.mubr.bf16.gmra.mrb[24].mxu1 %v1142_v35 }
  0x57   : > { %1047 = vmatprep.mubr.bf16.mxu0 %v1143_v36  ;;  %1079 = vmatprep.mubr.bf16.mxu1 %v1144_v37 }
  0x5e   : > { %1048 = vmatmul.mubr.bf16.gmra.mrb[28].mxu0 %v1145_v38  ;;  %1080 = vmatmul.mubr.bf16.gmra.mrb[28].mxu1 %v1146_v39 }
  0xf9   : > { %v1021_v41 = vpop.f32.mrb[0].mxu0  ;;  %v1053_v42 = vpop.f32.mrb[0].mxu1 }
  0xfa   : > { %v545_v43 = vadd.f32 %v1021_v41, %v1251_v40  ;;  %v673_v44 = vadd.f32 %v1053_v42, %v1251_v40  ;;  %v536_v45 = vpop.f32.mrb[1].mxu0  ;;  %v664_v46 = vpop.f32.mrb[1].mxu1 }
  0xfb   : > { %v537_v47 = vadd.f32 %v1251_v40, %v536_v45  ;;  %v665_v48 = vadd.f32 %v1251_v40, %v664_v46  ;;  %v1022_v49 = vpop.f32.mrb[2].mxu0  ;;  %v1054_v50 = vpop.f32.mrb[2].mxu1 }
  0xfc   : > { %793 = vst [vmem:[%s1256_s14 + $0x10] sm:$0xff] %v545_v43  ;;  %825 = vst [vmem:[%s1256_s14 + $0x110] sm:$0xff] %v673_v44  ;;  %v548_v51 = vadd.f32 %v1022_v49, %v1251_v40  ;;  %v676_v52 = vadd.f32 %v1054_v50, %v1251_v40  ;;  %v539_v53 = vpop.f32.mrb[3].mxu0  ;;  %v667_v54 = vpop.f32.mrb[3].mxu1 }
  0xfd   : > { %791 = vst [vmem:[%s1256_s14] sm:$0xff] %v537_v47  ;;  %823 = vst [vmem:[%s1256_s14 + $0x100] sm:$0xff] %v665_v48  ;;  %v540_v55 = vadd.f32 %v1251_v40, %v539_v53  ;;  %v668_v56 = vadd.f32 %v1251_v40, %v667_v54 }
  0xfe   : > { %794 = vst [vmem:[%s1256_s14 + $0x18] sm:$0xff] %v548_v51  ;;  %826 = vst [vmem:[%s1256_s14 + $0x118] sm:$0xff] %v676_v52 }
  0xff   : > { %792 = vst [vmem:[%s1256_s14 + $0x8] sm:$0xff] %v540_v55  ;;  %824 = vst [vmem:[%s1256_s14 + $0x108] sm:$0xff] %v668_v56 }
 0x101   : > { %v1025_v57 = vpop.f32.mrb[4].mxu0  ;;  %v1057_v58 = vpop.f32.mrb[4].mxu1 }
 0x102   : > { %v561_v59 = vadd.f32 %v1025_v57, %v1251_v40  ;;  %v689_v60 = vadd.f32 %v1057_v58, %v1251_v40  ;;  %v552_v61 = vpop.f32.mrb[5].mxu0  ;;  %v680_v62 = vpop.f32.mrb[5].mxu1 }
 0x103   : > { %v553_v63 = vadd.f32 %v1251_v40, %v552_v61  ;;  %v681_v0 = vadd.f32 %v1251_v40, %v680_v62  ;;  %v1026_v1 = vpop.f32.mrb[6].mxu0  ;;  %v1058_v2 = vpop.f32.mrb[6].mxu1 }
 0x104   : > { %797 = vst [vmem:[%s1256_s14 + $0x30] sm:$0xff] %v561_v59  ;;  %829 = vst [vmem:[%s1256_s14 + $0x130] sm:$0xff] %v689_v60  ;;  %v564_v3 = vadd.f32 %v1026_v1, %v1251_v40  ;;  %v692_v4 = vadd.f32 %v1058_v2, %v1251_v40  ;;  %v555_v5 = vpop.f32.mrb[7].mxu0  ;;  %v683_v6 = vpop.f32.mrb[7].mxu1 }
 0x105   : > { %795 = vst [vmem:[%s1256_s14 + $0x20] sm:$0xff] %v553_v63  ;;  %827 = vst [vmem:[%s1256_s14 + $0x120] sm:$0xff] %v681_v0  ;;  %v556_v7 = vadd.f32 %v1251_v40, %v555_v5  ;;  %v684_v8 = vadd.f32 %v1251_v40, %v683_v6 }
 0x106   : > { %798 = vst [vmem:[%s1256_s14 + $0x38] sm:$0xff] %v564_v3  ;;  %830 = vst [vmem:[%s1256_s14 + $0x138] sm:$0xff] %v692_v4 }
 0x107   : > { %796 = vst [vmem:[%s1256_s14 + $0x28] sm:$0xff] %v556_v7  ;;  %828 = vst [vmem:[%s1256_s14 + $0x128] sm:$0xff] %v684_v8 }
 0x109   : > { %v1029_v9 = vpop.f32.mrb[8].mxu0  ;;  %v1061_v10 = vpop.f32.mrb[8].mxu1 }
 0x10a   : > { %v577_v11 = vadd.f32 %v1029_v9, %v1251_v40  ;;  %v705_v12 = vadd.f32 %v1061_v10, %v1251_v40  ;;  %v568_v13 = vpop.f32.mrb[9].mxu0  ;;  %v696_v14 = vpop.f32.mrb[9].mxu1 }
 0x10b   : > { %v569_v15 = vadd.f32 %v1251_v40, %v568_v13  ;;  %v697_v16 = vadd.f32 %v1251_v40, %v696_v14  ;;  %v1030_v17 = vpop.f32.mrb[10].mxu0  ;;  %v1062_v18 = vpop.f32.mrb[10].mxu1 }
 0x10c   : > { %801 = vst [vmem:[%s1256_s14 + $0x50] sm:$0xff] %v577_v11  ;;  %833 = vst [vmem:[%s1256_s14 + $0x150] sm:$0xff] %v705_v12  ;;  %v580_v19 = vadd.f32 %v1030_v17, %v1251_v40  ;;  %v708_v20 = vadd.f32 %v1062_v18, %v1251_v40  ;;  %v571_v21 = vpop.f32.mrb[11].mxu0  ;;  %v699_v22 = vpop.f32.mrb[11].mxu1 }
 0x10d   : > { %799 = vst [vmem:[%s1256_s14 + $0x40] sm:$0xff] %v569_v15  ;;  %831 = vst [vmem:[%s1256_s14 + $0x140] sm:$0xff] %v697_v16  ;;  %v572_v23 = vadd.f32 %v1251_v40, %v571_v21  ;;  %v700_v24 = vadd.f32 %v1251_v40, %v699_v22 }
 0x10e   : > { %802 = vst [vmem:[%s1256_s14 + $0x58] sm:$0xff] %v580_v19  ;;  %834 = vst [vmem:[%s1256_s14 + $0x158] sm:$0xff] %v708_v20 }
 0x10f   : > { %800 = vst [vmem:[%s1256_s14 + $0x48] sm:$0xff] %v572_v23  ;;  %832 = vst [vmem:[%s1256_s14 + $0x148] sm:$0xff] %v700_v24 }
 0x111   : > { %v1033_v25 = vpop.f32.mrb[12].mxu0  ;;  %v1065_v26 = vpop.f32.mrb[12].mxu1 }
 0x112   : > { %v593_v27 = vadd.f32 %v1033_v25, %v1251_v40  ;;  %v721_v28 = vadd.f32 %v1065_v26, %v1251_v40  ;;  %v584_v29 = vpop.f32.mrb[13].mxu0  ;;  %v712_v30 = vpop.f32.mrb[13].mxu1 }
 0x113   : > { %v585_v31 = vadd.f32 %v1251_v40, %v584_v29  ;;  %v713_v32 = vadd.f32 %v1251_v40, %v712_v30  ;;  %v1034_v33 = vpop.f32.mrb[14].mxu0  ;;  %v1066_v34 = vpop.f32.mrb[14].mxu1 }
 0x114   : > { %805 = vst [vmem:[%s1256_s14 + $0x70] sm:$0xff] %v593_v27  ;;  %837 = vst [vmem:[%s1256_s14 + $0x170] sm:$0xff] %v721_v28  ;;  %v596_v35 = vadd.f32 %v1034_v33, %v1251_v40  ;;  %v724_v36 = vadd.f32 %v1066_v34, %v1251_v40  ;;  %v587_v37 = vpop.f32.mrb[15].mxu0  ;;  %v715_v38 = vpop.f32.mrb[15].mxu1 }
 0x115   : > { %803 = vst [vmem:[%s1256_s14 + $0x60] sm:$0xff] %v585_v31  ;;  %835 = vst [vmem:[%s1256_s14 + $0x160] sm:$0xff] %v713_v32  ;;  %v588_v39 = vadd.f32 %v1251_v40, %v587_v37  ;;  %v716_v41 = vadd.f32 %v1251_v40, %v715_v38 }
 0x116   : > { %806 = vst [vmem:[%s1256_s14 + $0x78] sm:$0xff] %v596_v35  ;;  %838 = vst [vmem:[%s1256_s14 + $0x178] sm:$0xff] %v724_v36 }
 0x117   : > { %804 = vst [vmem:[%s1256_s14 + $0x68] sm:$0xff] %v588_v39  ;;  %836 = vst [vmem:[%s1256_s14 + $0x168] sm:$0xff] %v716_v41 }
 0x119   : > { %v1037_v42 = vpop.f32.mrb[16].mxu0  ;;  %v1069_v43 = vpop.f32.mrb[16].mxu1 }
 0x11a   : > { %v609_v44 = vadd.f32 %v1037_v42, %v1251_v40  ;;  %v737_v45 = vadd.f32 %v1069_v43, %v1251_v40  ;;  %v600_v46 = vpop.f32.mrb[17].mxu0  ;;  %v728_v47 = vpop.f32.mrb[17].mxu1 }
 0x11b   : > { %v601_v48 = vadd.f32 %v1251_v40, %v600_v46  ;;  %v729_v49 = vadd.f32 %v1251_v40, %v728_v47  ;;  %v1038_v50 = vpop.f32.mrb[18].mxu0  ;;  %v1070_v51 = vpop.f32.mrb[18].mxu1 }
 0x11c   : > { %809 = vst [vmem:[%s1256_s14 + $0x90] sm:$0xff] %v609_v44  ;;  %841 = vst [vmem:[%s1256_s14 + $0x190] sm:$0xff] %v737_v45  ;;  %v612_v52 = vadd.f32 %v1038_v50, %v1251_v40  ;;  %v740_v53 = vadd.f32 %v1070_v51, %v1251_v40  ;;  %v603_v54 = vpop.f32.mrb[19].mxu0  ;;  %v731_v55 = vpop.f32.mrb[19].mxu1 }
 0x11d   : > { %807 = vst [vmem:[%s1256_s14 + $0x80] sm:$0xff] %v601_v48  ;;  %839 = vst [vmem:[%s1256_s14 + $0x180] sm:$0xff] %v729_v49  ;;  %v604_v56 = vadd.f32 %v1251_v40, %v603_v54  ;;  %v732_v57 = vadd.f32 %v1251_v40, %v731_v55 }
 0x11e   : > { %810 = vst [vmem:[%s1256_s14 + $0x98] sm:$0xff] %v612_v52  ;;  %842 = vst [vmem:[%s1256_s14 + $0x198] sm:$0xff] %v740_v53 }
 0x11f   : > { %808 = vst [vmem:[%s1256_s14 + $0x88] sm:$0xff] %v604_v56  ;;  %840 = vst [vmem:[%s1256_s14 + $0x188] sm:$0xff] %v732_v57 }
 0x121   : > { %v1041_v58 = vpop.f32.mrb[20].mxu0  ;;  %v1073_v59 = vpop.f32.mrb[20].mxu1 }
 0x122   : > { %v625_v60 = vadd.f32 %v1041_v58, %v1251_v40  ;;  %v753_v61 = vadd.f32 %v1073_v59, %v1251_v40  ;;  %v616_v62 = vpop.f32.mrb[21].mxu0  ;;  %v744_v63 = vpop.f32.mrb[21].mxu1 }
 0x123   : > { %v617_v0 = vadd.f32 %v1251_v40, %v616_v62  ;;  %v745_v1 = vadd.f32 %v1251_v40, %v744_v63  ;;  %v1042_v2 = vpop.f32.mrb[22].mxu0  ;;  %v1074_v3 = vpop.f32.mrb[22].mxu1 }
 0x124   : > { %813 = vst [vmem:[%s1256_s14 + $0xb0] sm:$0xff] %v625_v60  ;;  %845 = vst [vmem:[%s1256_s14 + $0x1b0] sm:$0xff] %v753_v61  ;;  %v628_v4 = vadd.f32 %v1042_v2, %v1251_v40  ;;  %v756_v5 = vadd.f32 %v1074_v3, %v1251_v40  ;;  %v619_v6 = vpop.f32.mrb[23].mxu0  ;;  %v747_v7 = vpop.f32.mrb[23].mxu1 }
 0x125   : > { %811 = vst [vmem:[%s1256_s14 + $0xa0] sm:$0xff] %v617_v0  ;;  %843 = vst [vmem:[%s1256_s14 + $0x1a0] sm:$0xff] %v745_v1  ;;  %v620_v8 = vadd.f32 %v1251_v40, %v619_v6  ;;  %v748_v9 = vadd.f32 %v1251_v40, %v747_v7 }
 0x126   : > { %814 = vst [vmem:[%s1256_s14 + $0xb8] sm:$0xff] %v628_v4  ;;  %846 = vst [vmem:[%s1256_s14 + $0x1b8] sm:$0xff] %v756_v5 }
 0x127   : > { %812 = vst [vmem:[%s1256_s14 + $0xa8] sm:$0xff] %v620_v8  ;;  %844 = vst [vmem:[%s1256_s14 + $0x1a8] sm:$0xff] %v748_v9 }
 0x129   : > { %v1045_v10 = vpop.f32.mrb[24].mxu0  ;;  %v1077_v11 = vpop.f32.mrb[24].mxu1 }
 0x12a   : > { %v641_v12 = vadd.f32 %v1045_v10, %v1251_v40  ;;  %v769_v13 = vadd.f32 %v1077_v11, %v1251_v40  ;;  %v632_v14 = vpop.f32.mrb[25].mxu0  ;;  %v760_v15 = vpop.f32.mrb[25].mxu1 }
 0x12b   : > { %v633_v16 = vadd.f32 %v1251_v40, %v632_v14  ;;  %v761_v17 = vadd.f32 %v1251_v40, %v760_v15  ;;  %v1046_v18 = vpop.f32.mrb[26].mxu0  ;;  %v1078_v19 = vpop.f32.mrb[26].mxu1 }
 0x12c   : > { %817 = vst [vmem:[%s1256_s14 + $0xd0] sm:$0xff] %v641_v12  ;;  %849 = vst [vmem:[%s1256_s14 + $0x1d0] sm:$0xff] %v769_v13  ;;  %v644_v20 = vadd.f32 %v1046_v18, %v1251_v40  ;;  %v772_v21 = vadd.f32 %v1078_v19, %v1251_v40  ;;  %v635_v22 = vpop.f32.mrb[27].mxu0  ;;  %v763_v23 = vpop.f32.mrb[27].mxu1 }
 0x12d   : > { %815 = vst [vmem:[%s1256_s14 + $0xc0] sm:$0xff] %v633_v16  ;;  %847 = vst [vmem:[%s1256_s14 + $0x1c0] sm:$0xff] %v761_v17  ;;  %v636_v24 = vadd.f32 %v1251_v40, %v635_v22  ;;  %v764_v25 = vadd.f32 %v1251_v40, %v763_v23 }
 0x12e   : > { %818 = vst [vmem:[%s1256_s14 + $0xd8] sm:$0xff] %v644_v20  ;;  %850 = vst [vmem:[%s1256_s14 + $0x1d8] sm:$0xff] %v772_v21 }
 0x12f   : > { %816 = vst [vmem:[%s1256_s14 + $0xc8] sm:$0xff] %v636_v24  ;;  %848 = vst [vmem:[%s1256_s14 + $0x1c8] sm:$0xff] %v764_v25 }
 0x131   : > { %v1049_v26 = vpop.f32.mrb[28].mxu0  ;;  %v1081_v27 = vpop.f32.mrb[28].mxu1 }
 0x132   : > { %v657_v28 = vadd.f32 %v1049_v26, %v1251_v40  ;;  %v785_v29 = vadd.f32 %v1081_v27, %v1251_v40  ;;  %v648_v30 = vpop.f32.mrb[29].mxu0  ;;  %v776_v31 = vpop.f32.mrb[29].mxu1 }
 0x133   : > { %v649_v32 = vadd.f32 %v1251_v40, %v648_v30  ;;  %v777_v33 = vadd.f32 %v1251_v40, %v776_v31  ;;  %v1050_v34 = vpop.f32.mrb[30].mxu0  ;;  %v1082_v35 = vpop.f32.mrb[30].mxu1 }
 0x134   : > { %821 = vst [vmem:[%s1256_s14 + $0xf0] sm:$0xff] %v657_v28  ;;  %853 = vst [vmem:[%s1256_s14 + $0x1f0] sm:$0xff] %v785_v29  ;;  %v660_v36 = vadd.f32 %v1050_v34, %v1251_v40  ;;  %v788_v37 = vadd.f32 %v1082_v35, %v1251_v40  ;;  %v651_v38 = vpop.f32.mrb[31].mxu0  ;;  %v779_v39 = vpop.f32.mrb[31].mxu1 }
 0x135   : > { %819 = vst [vmem:[%s1256_s14 + $0xe0] sm:$0xff] %v649_v32  ;;  %851 = vst [vmem:[%s1256_s14 + $0x1e0] sm:$0xff] %v777_v33  ;;  %v652_v41 = vadd.f32 %v1251_v40, %v651_v38  ;;  %v780_v42 = vadd.f32 %v1251_v40, %v779_v39 }
 0x136   : > { %822 = vst [vmem:[%s1256_s14 + $0xf8] sm:$0xff] %v660_v36  ;;  %854 = vst [vmem:[%s1256_s14 + $0x1f8] sm:$0xff] %v788_v37 }
 0x137   : > { %820 = vst [vmem:[%s1256_s14 + $0xe8] sm:$0xff] %v652_v41  ;;  %852 = vst [vmem:[%s1256_s14 + $0x1e8] sm:$0xff] %v780_v42 }
 0x138 PF: > { %s13_s12 = sadd.s32 1, %s1153_s12  }
 0x139   : > { %p10_p4 = scmp.ge.s32.totalorder %s13_s12, 15  }
 0x13b   :  { %12 = sbr.rel (!%p10_p4) target bundleno = 1 (0x1), region = 62 }

</bundles_post_ra>
